<compile_context>
chip_gen: v6e
topology: v6e:2x2x1
jax: 0.10.0
libtpu: 0.0.40
codegen_flags: <defaults>
</compile_context>

<pallas_src>
import jax
import jax.numpy as jnp
from jax import lax
from jax.experimental import pallas as pl
from jax.experimental.pallas import tpu as pltpu


def _sigmoid(v):
    # EUP tanh + VPU mul/add; avoids a VPU divide inside the serial recurrence.
    return 0.5 * (jnp.tanh(0.5 * v) + 1.0)


def lstmcnn_kernel(x_ref,            # (L, BT, 8H) bf16: emb@Wih + bias per token, gate-pair layout
                   whh_ref,          # (2H, 8H)   bf16: [h_f|h_b] -> gates (block structured)
                   h0_ref, c0_ref,   # (1, 2H)    f32 : [fwd|bwd] initial states
                   w13_ref,          # (5*2H, 2H) bf16: merged conv1 (zero-padded taps) | conv3
                   b13_ref,          # (1, 2H)    f32
                   w2_ref,           # (4*2H, H)  bf16: conv2
                   b2_ref,           # (1, H)     f32
                   fcw_ref,          # (1, 3H)    f32 : fc1 weights reordered to [z1|z3|z2]
                   fcb_ref,          # SMEM (1,1) f32
                   out_ref,          # (BT, 1)    f32
                   hf_s, hb_s):      # VMEM scratch (L, BT, H) f32 each
    f32, bf16 = jnp.float32, jnp.bfloat16
    L, BT = x_ref.shape[0], x_ref.shape[1]
    H = whh_ref.shape[0] // 2
    C = 2 * H                                     # 128: conv channels == lanes per gate pair

    whh = whh_ref[...]                            # hoisted out of the time loop
    lane = lax.broadcasted_iota(jnp.int32, (1, 4 * C), 1)
    fwd_lane = (lane % C) < H                     # True on forward-direction gate lanes

    # ---- BiLSTM: fwd and bwd recurrences interleaved, one MXU matmul per timestep ----
    def step(t, carry):
        h, c = carry                              # (BT, 2H) f32, lanes [0:H]=fwd, [H:2H]=bwd
        tb = L - 1 - t
        xg = jnp.where(fwd_lane, x_ref[t].astype(f32), x_ref[tb].astype(f32))   # (BT, 8H)
        gates = xg + jnp.dot(h.astype(bf16), whh, preferred_element_type=f32)
        i = _sigmoid(gates[:, 0 * C:1 * C])
        f = _sigmoid(gates[:, 1 * C:2 * C])
        g = jnp.tanh(gates[:, 2 * C:3 * C])
        o = _sigmoid(gates[:, 3 * C:4 * C])
        c = f * c + i * g
        h = o * jnp.tanh(c)
        hf_s[t] = h[:, 0:H]                       # forward output for sequence position t
        hb_s[tb] = h[:, H:2 * H]                  # backward output for position L-1-t
        return h, c

    h0 = jnp.broadcast_to(h0_ref[...], (BT, 2 * H)).astype(f32)
    c0 = jnp.broadcast_to(c0_ref[...], (BT, 2 * H)).astype(f32)
    lax.fori_loop(0, L, step, (h0, c0), unroll=True)

    # ---- ReLU + Conv1d branches as im2col matmuls over (lout*BT, K*128), max-pool over time ----
    a = jnp.maximum(jnp.concatenate([hf_s[...], hb_s[...]], axis=-1), 0.0).astype(bf16)
    zpad = jnp.zeros((2, BT, C), bf16)
    ap = jnp.concatenate([zpad, a, zpad], axis=0)                    # (L+4, BT, C)

    def conv_relu_max(w_ref, b_ref, K):
        lout = L + 4 - K + 1
        im = jnp.concatenate([ap[k:k + lout] for k in range(K)], axis=-1)   # (lout, BT, K*C)
        conv = jnp.dot(im.reshape(lout * BT, K * C), w_ref[...],
                       preferred_element_type=f32) + b_ref[...]
        conv = jnp.maximum(conv, 0.0).reshape(lout, BT, w_ref.shape[1])
        return jnp.max(conv, axis=0)                                 # (BT, Cout)

    p13 = conv_relu_max(w13_ref, b13_ref, 5)      # (BT, 128) = [conv1-pool | conv3-pool]
    p2 = conv_relu_max(w2_ref, b2_ref, 4)         # (BT, 64)

    # ---- fc1: VPU multiply + lane reduce; scalar bias read from SMEM ----
    # TODO(synk): F.dropout(z, 0.5, training) is identity at inference; train-mode dropout
    #             (and the nn.LSTM inter-layer dropout, inactive with 1 layer) not implemented.
    z = jnp.concatenate([p13, p2], axis=-1)                          # (BT, 192) = [z1|z3|z2]
    out_ref[...] = jnp.sum(z * fcw_ref[...], axis=-1, keepdims=True) + fcb_ref[0, 0]


def _round_up(x, m):
    return (x + m - 1) // m * m


def _interleave_gate_cols(wf, wb, H):
    """Column-interleave two (X, 4H) gate matrices -> (X, 8H); col = g*2H + dir*H + h."""
    X = wf.shape[0]
    return jnp.concatenate(
        [wf.reshape(X, 4, 1, H), wb.reshape(X, 4, 1, H)], axis=2).reshape(X, 8 * H)


def lstmcnn_forward(batch, params, b_tile_max=256):
    """Eval-mode forward of LSTMCNN. batch: (B, L) int32 token ids -> (B,) f32 logits."""
    f32, bf16 = jnp.float32, jnp.bfloat16
    B, L = batch.shape
    H = params["w_hh_f"].shape[1]                 # 64
    C = 2 * H                                     # 128
    hi = jax.lax.Precision.HIGHEST

    # ---- fold embedding + LSTM input projection + biases into one (V, 8H) bf16 table ----
    emb = params["embeddings"].astype(f32)
    wih = _interleave_gate_cols(params["w_ih_f"].T.astype(f32),
                                params["w_ih_b"].T.astype(f32), H)                 # (E, 8H)
    b_f = (params["b_ih_f"] + params["b_hh_f"]).astype(f32)
    b_b = (params["b_ih_b"] + params["b_hh_b"]).astype(f32)
    bias = _interleave_gate_cols(b_f.reshape(1, 4 * H), b_b.reshape(1, 4 * H), H)  # (1, 8H)
    table = (jnp.dot(emb, wih, precision=hi) + bias).astype(bf16)                  # (V, 8H)

    # recurrent weights: rows [h_f(0:H) | h_b(H:2H)] -> interleaved gate columns (8H)
    zH = jnp.zeros((H, 4 * H), f32)
    whh = jnp.concatenate(
        [_interleave_gate_cols(params["w_hh_f"].T.astype(f32), zH, H),
         _interleave_gate_cols(zH, params["w_hh_b"].T.astype(f32), H)], axis=0).astype(bf16)

    h0 = jnp.concatenate([params["h0"][0, 0], params["h0"][1, 0]]).reshape(1, C).astype(f32)
    c0 = jnp.concatenate([params["c0"][0, 0], params["c0"][1, 0]]).reshape(1, C).astype(f32)

    # ---- conv weights as im2col matrices; conv1 (K=3,pad=1) embedded in conv3's 5 taps ----
    def conv_mat(w):                              # (Cout, Cin, K) -> (K*Cin, Cout)
        Cout, Cin, K = w.shape
        return jnp.transpose(w, (2, 1, 0)).reshape(K * Cin, Cout).astype(f32)

    w1 = conv_mat(params["conv1_w"])              # (3*C, 64)
    w3 = conv_mat(params["conv3_w"])              # (5*C, 64)
    w1_5 = jnp.zeros((5 * C, H), f32).at[C:4 * C, :].set(w1)        # center taps 1..3 of 5
    w13 = jnp.concatenate([w1_5, w3], axis=1).astype(bf16)          # (5*C, 128)
    b13 = jnp.concatenate([params["conv1_b"], params["conv3_b"]]).reshape(1, C).astype(f32)
    w2 = conv_mat(params["conv2_w"]).astype(bf16)                   # (4*C, 64)
    b2 = params["conv2_b"].reshape(1, H).astype(f32)

    # fc1 weights reordered to the kernel's z layout [z1 | z3 | z2]
    fw = params["fc_w"].reshape(1, 3 * H).astype(f32)
    fcw = jnp.concatenate([fw[:, 0:H], fw[:, 2 * H:3 * H], fw[:, H:2 * H]], axis=1)
    fcb = params["fc_b"].reshape(1, 1).astype(f32)

    # ---- gather token rows in XLA, lay out as (L, B_pad, 8H) bf16, tile the batch ----
    b_tile = min(b_tile_max, _round_up(max(B, 1), 8))
    b_pad = _round_up(B, b_tile)
    n_tiles = b_pad // b_tile
    x = jnp.take(table, batch.astype(jnp.int32).reshape(-1), axis=0)
    x = x.reshape(B, L, 8 * H).transpose(1, 0, 2)
    x = jnp.pad(x, ((0, 0), (0, b_pad - B), (0, 0)))                # (L, B_pad, 8H) bf16

    def full(a):
        zeros = (0,) * a.ndim
        return pl.BlockSpec(a.shape, lambda i, _z=zeros: _z)

    grid_spec = pltpu.PrefetchScalarGridSpec(
        num_scalar_prefetch=0,
        grid=(n_tiles,),
        in_specs=[
            pl.BlockSpec((L, b_tile, 8 * H), lambda i: (0, i, 0)),
            full(whh), full(h0), full(c0),
            full(w13), full(b13), full(w2), full(b2), full(fcw),
            pl.BlockSpec(memory_space=pltpu.MemorySpace.SMEM),      # fc1 bias scalar
        ],
        out_specs=pl.BlockSpec((b_tile, 1), lambda i: (i, 0)),
        scratch_shapes=[pltpu.VMEM((L, b_tile, H), f32),
                        pltpu.VMEM((L, b_tile, H), f32)],
    )
    out = pl.pallas_call(
        lstmcnn_kernel,
        out_shape=jax.ShapeDtypeStruct((b_pad, 1), f32),
        grid_spec=grid_spec,
        compiler_params=pltpu.CompilerParams(dimension_semantics=("parallel",)),
    )(x, whh, h0, c0, w13, b13, w2, b2, fcw, fcb)
    return out[:B, 0]                             # matches `.squeeze()` in the module


def lstmcnn_reference(batch, params):
    """Pure-JAX reference of the PyTorch forward (eval mode)."""
    emb = params["embeddings"]
    x = emb[batch]                                # (B, L, E)
    Bn, Ln, _ = x.shape
    H = params["w_hh_f"].shape[1]

    def run_dir(w_ih, w_hh, b_ih, b_hh, h0, c0, reverse):
        h = jnp.broadcast_to(h0[None, :], (Bn, H))
        c = jnp.broadcast_to(c0[None, :], (Bn, H))
        outs = [None] * Ln
        order = range(Ln - 1, -1, -1) if reverse else range(Ln)
        for t in order:
            g = x[:, t, :] @ w_ih.T + h @ w_hh.T + b_ih + b_hh
            i = jax.nn.sigmoid(g[:, 0:H]); f = jax.nn.sigmoid(g[:, H:2 * H])
            gg = jnp.tanh(g[:, 2 * H:3 * H]); o = jax.nn.sigmoid(g[:, 3 * H:4 * H])
            c = f * c + i * gg
            h = o * jnp.tanh(c)
            outs[t] = h
        return jnp.stack(outs, axis=1)            # (B, L, H)

    h0 = params["h0"].reshape(2, H)
    c0 = params["c0"].reshape(2, H)
    hfwd = run_dir(params["w_ih_f"], params["w_hh_f"], params["b_ih_f"], params["b_hh_f"],
                   h0[0], c0[0], False)
    hbwd = run_dir(params["w_ih_b"], params["w_hh_b"], params["b_ih_b"], params["b_hh_b"],
                   h0[1], c0[1], True)
    a = jnp.maximum(jnp.concatenate([hfwd, hbwd], axis=-1), 0.0)    # (B, L, 128)

    def conv_relu_max(w, bias, pad):
        Cout, Cin, K = w.shape
        ap = jnp.pad(a, ((0, 0), (pad, pad), (0, 0)))
        lout = Ln + 2 * pad - K + 1
        cols = []
        for t in range(lout):
            win = ap[:, t:t + K, :]
            cols.append(jnp.einsum("bkc,ock->bo", win, w) + bias)
        conv = jnp.stack(cols, axis=1)            # (B, lout, Cout)
        return jnp.max(jnp.maximum(conv, 0.0), axis=1)

    z1 = conv_relu_max(params["conv1_w"], params["conv1_b"], 1)
    z2 = conv_relu_max(params["conv2_w"], params["conv2_b"], 2)
    z3 = conv_relu_max(params["conv3_w"], params["conv3_b"], 2)
    z = jnp.concatenate([z1, z2, z3], axis=1)     # (B, 192)
    y = z @ params["fc_w"].T + params["fc_b"]
    return y[:, 0]


if __name__ == "__main__":
    key = jax.random.PRNGKey(0)
    ks = jax.random.split(key, 24)
    V, E, H = 50, 300, 64                         # LSTM input must be 300 per the module
    B, L = 2, 8

    def nrm(k, shape, scale):
        return (scale * jax.random.normal(k, shape)).astype(jnp.float32)

    params = dict(
        embeddings=nrm(ks[0], (V, E), 0.5),
        w_ih_f=nrm(ks[1], (4 * H, E), 0.05), w_hh_f=nrm(ks[2], (4 * H, H), 0.1),
        b_ih_f=nrm(ks[3], (4 * H,), 0.05), b_hh_f=nrm(ks[4], (4 * H,), 0.05),
        w_ih_b=nrm(ks[5], (4 * H, E), 0.05), w_hh_b=nrm(ks[6], (4 * H, H), 0.1),
        b_ih_b=nrm(ks[7], (4 * H,), 0.05), b_hh_b=nrm(ks[8], (4 * H,), 0.05),
        h0=jnp.zeros((2, 1, H), jnp.float32),     # learnable but zero-init in the module
        c0=jnp.zeros((2, 1, H), jnp.float32),
        conv1_w=nrm(ks[9], (64, 128, 3), 0.08), conv1_b=nrm(ks[10], (64,), 0.05),
        conv2_w=nrm(ks[11], (64, 128, 4), 0.08), conv2_b=nrm(ks[12], (64,), 0.05),
        conv3_w=nrm(ks[13], (64, 128, 5), 0.08), conv3_b=nrm(ks[14], (64,), 0.05),
        fc_w=nrm(ks[15], (1, 192), 0.1), fc_b=nrm(ks[16], (1,), 0.05),
    )
    batch = jax.random.randint(ks[17], (B, L), 0, V, dtype=jnp.int32)

    logits = lstmcnn_forward(batch, params)
    jax.block_until_ready(logits)

    with jax.default_matmul_precision("highest"):
        ref = lstmcnn_reference(batch, params)
    ref = jax.block_until_ready(ref)

    assert logits.shape == (B,)
    # bf16 MXU operands (f32 accumulation) introduce a few 1e-3..1e-2 of drift vs the f32 ref;
    # real structural bugs (gate order, conv taps, direction swap) show up at O(0.1-1).
    assert jnp.allclose(logits, ref, atol=5e-2, rtol=5e-2), (logits, ref)

    print("KERNEL_OK")
</pallas_src>

<mosaic_0001>
module attributes {stable_mosaic.version = 11 : i64} {
  func.func @lstmcnn_kernel(%arg0: i32, %arg1: memref<8x8x512xbf16, #tpu.memory_space<vmem>>, %arg2: memref<128x512xbf16, #tpu.memory_space<vmem>>, %arg3: memref<1x128xf32, #tpu.memory_space<vmem>>, %arg4: memref<1x128xf32, #tpu.memory_space<vmem>>, %arg5: memref<640x128xbf16, #tpu.memory_space<vmem>>, %arg6: memref<1x128xf32, #tpu.memory_space<vmem>>, %arg7: memref<512x64xbf16, #tpu.memory_space<vmem>>, %arg8: memref<1x64xf32, #tpu.memory_space<vmem>>, %arg9: memref<1x192xf32, #tpu.memory_space<vmem>>, %arg10: memref<1x1xf32, #tpu.memory_space<smem>>, %arg11: memref<8x1xf32, #tpu.memory_space<vmem>>, %arg12: memref<8x8x64xf32, #tpu.memory_space<vmem>>, %arg13: memref<8x8x64xf32, #tpu.memory_space<vmem>>) attributes {dimension_semantics = [#tpu.dimension_semantics<parallel>], iteration_bounds = array<i64: 1>, scalar_prefetch = 0 : i64, scratch_operands = 2 : i64, tpu.core_type = #tpu.core_type<tc>, window_params = [{transform_indices = @transform_0, window_bounds = array<i64: 8, 8, 512>}, {pipeline_mode = #tpu.pipeline_mode<synchronous>, transform_indices = @transform_1, window_bounds = array<i64: 128, 512>}, {pipeline_mode = #tpu.pipeline_mode<synchronous>, transform_indices = @transform_2, window_bounds = array<i64: 1, 128>}, {pipeline_mode = #tpu.pipeline_mode<synchronous>, transform_indices = @transform_3, window_bounds = array<i64: 1, 128>}, {pipeline_mode = #tpu.pipeline_mode<synchronous>, transform_indices = @transform_4, window_bounds = array<i64: 640, 128>}, {pipeline_mode = #tpu.pipeline_mode<synchronous>, transform_indices = @transform_5, window_bounds = array<i64: 1, 128>}, {pipeline_mode = #tpu.pipeline_mode<synchronous>, transform_indices = @transform_6, window_bounds = array<i64: 512, 64>}, {pipeline_mode = #tpu.pipeline_mode<synchronous>, transform_indices = @transform_7, window_bounds = array<i64: 1, 64>}, {pipeline_mode = #tpu.pipeline_mode<synchronous>, transform_indices = @transform_8, window_bounds = array<i64: 1, 192>}, {transform_indices = @transform_9, window_bounds = array<i64: 1, 1>}, {transform_indices = @transform_10, window_bounds = array<i64: 8, 1>}]} {
    %c0 = arith.constant 0 : index
    %c0_0 = arith.constant 0 : index
    %0 = vector.load %arg2[%c0, %c0_0] : memref<128x512xbf16, #tpu.memory_space<vmem>>, vector<128x512xbf16>
    %1 = tpu.iota {dimensions = array<i32: 1>} : vector<1x512xi32>
    %c128_i32 = arith.constant 128 : i32
    %c0_i32 = arith.constant 0 : i32
    %2 = arith.cmpi eq, %c128_i32, %c0_i32 : i32
    %c1_i32 = arith.constant 1 : i32
    %3 = arith.select %2, %c1_i32, %c128_i32 : i32
    %4 = vector.broadcast %3 : i32 to vector<1x512xi32>
    %5 = arith.remsi %1, %4 : vector<1x512xi32>
    %c0_i32_1 = arith.constant 0 : i32
    %6 = vector.broadcast %c0_i32_1 : i32 to vector<1x512xi32>
    %7 = arith.cmpi ne, %5, %6 : vector<1x512xi32>
    %c0_i32_2 = arith.constant 0 : i32
    %8 = vector.broadcast %c0_i32_2 : i32 to vector<1x512xi32>
    %9 = arith.cmpi slt, %5, %8 : vector<1x512xi32>
    %c0_i32_3 = arith.constant 0 : i32
    %10 = arith.cmpi slt, %3, %c0_i32_3 : i32
    %11 = vector.broadcast %10 : i1 to vector<1x512xi1>
    %12 = vector.broadcast %11 : vector<1x512xi1> to vector<1x512xi1>
    %13 = arith.xori %9, %12 : vector<1x512xi1>
    %14 = arith.andi %13, %7 : vector<1x512xi1>
    %15 = vector.broadcast %3 : i32 to vector<1x512xi32>
    %16 = arith.addi %5, %15 : vector<1x512xi32>
    %17 = arith.select %14, %16, %5 : vector<1x512xi1>, vector<1x512xi32>
    %c64_i32 = arith.constant 64 : i32
    %18 = vector.broadcast %c64_i32 : i32 to vector<1x512xi32>
    %19 = arith.cmpi slt, %17, %18 : vector<1x512xi32>
    %c0_4 = arith.constant 0 : index
    %c0_5 = arith.constant 0 : index
    %20 = vector.load %arg3[%c0_4, %c0_5] : memref<1x128xf32, #tpu.memory_space<vmem>>, vector<1x128xf32>
    %21 = vector.shape_cast %20 : vector<1x128xf32> to vector<1x128xf32>
    %22 = vector.broadcast %21 : vector<1x128xf32> to vector<8x128xf32>
    %c0_6 = arith.constant 0 : index
    %c0_7 = arith.constant 0 : index
    %23 = vector.load %arg4[%c0_6, %c0_7] : memref<1x128xf32, #tpu.memory_space<vmem>>, vector<1x128xf32>
    %24 = vector.shape_cast %23 : vector<1x128xf32> to vector<1x128xf32>
    %25 = vector.broadcast %24 : vector<1x128xf32> to vector<8x128xf32>
    %c0_i32_8 = arith.constant 0 : i32
    %c7_i32 = arith.constant 7 : i32
    %26 = arith.subi %c7_i32, %c0_i32_8 : i32
    %27 = arith.index_cast %c0_i32_8 : i32 to index
    %c0_9 = arith.constant 0 : index
    %c0_10 = arith.constant 0 : index
    %28 = vector.load %arg1[%27, %c0_9, %c0_10] : memref<8x8x512xbf16, #tpu.memory_space<vmem>>, vector<1x8x512xbf16>
    %29 = vector.shape_cast %28 : vector<1x8x512xbf16> to vector<8x512xbf16>
    %30 = arith.extf %29 : vector<8x512xbf16> to vector<8x512xf32>
    %31 = arith.index_cast %26 : i32 to index
    %c0_11 = arith.constant 0 : index
    %c0_12 = arith.constant 0 : index
    %32 = vector.load %arg1[%31, %c0_11, %c0_12] : memref<8x8x512xbf16, #tpu.memory_space<vmem>>, vector<1x8x512xbf16>
    %33 = vector.shape_cast %32 : vector<1x8x512xbf16> to vector<8x512xbf16>
    %34 = arith.extf %33 : vector<8x512xbf16> to vector<8x512xf32>
    %35 = vector.shape_cast %19 : vector<1x512xi1> to vector<1x512xi1>
    %36 = vector.broadcast %35 : vector<1x512xi1> to vector<8x512xi1>
    %37 = arith.select %36, %30, %34 : vector<8x512xi1>, vector<8x512xf32>
    %38 = arith.truncf %22 : vector<8x128xf32> to vector<8x128xbf16>
    %cst = arith.constant dense<0.000000e+00> : vector<8x512xf32>
    %39 = tpu.matmul %38, %0, %cst {dimension_numbers = #tpu.dot_dimension_numbers<[1], [0], [0], [1], [0, 0, 1, 1], [], []>} : vector<8x128xbf16>, vector<128x512xbf16>, vector<8x512xf32> -> vector<8x512xf32>
    %40 = arith.addf %37, %39 : vector<8x512xf32>
    %41 = vector.extract_strided_slice %40 {offsets = [0, 0], sizes = [8, 128], strides = [1, 1]} : vector<8x512xf32> to vector<8x128xf32>
    %cst_13 = arith.constant 5.000000e-01 : f32
    %42 = vector.broadcast %cst_13 : f32 to vector<8x128xf32>
    %43 = arith.mulf %42, %41 : vector<8x128xf32>
    %44 = math.tanh %43 : vector<8x128xf32>
    %cst_14 = arith.constant 1.000000e+00 : f32
    %45 = vector.broadcast %cst_14 : f32 to vector<8x128xf32>
    %46 = arith.addf %44, %45 : vector<8x128xf32>
    %cst_15 = arith.constant 5.000000e-01 : f32
    %47 = vector.broadcast %cst_15 : f32 to vector<8x128xf32>
    %48 = arith.mulf %47, %46 : vector<8x128xf32>
    %49 = vector.extract_strided_slice %40 {offsets = [0, 128], sizes = [8, 128], strides = [1, 1]} : vector<8x512xf32> to vector<8x128xf32>
    %cst_16 = arith.constant 5.000000e-01 : f32
    %50 = vector.broadcast %cst_16 : f32 to vector<8x128xf32>
    %51 = arith.mulf %50, %49 : vector<8x128xf32>
    %52 = math.tanh %51 : vector<8x128xf32>
    %cst_17 = arith.constant 1.000000e+00 : f32
    %53 = vector.broadcast %cst_17 : f32 to vector<8x128xf32>
    %54 = arith.addf %52, %53 : vector<8x128xf32>
    %cst_18 = arith.constant 5.000000e-01 : f32
    %55 = vector.broadcast %cst_18 : f32 to vector<8x128xf32>
    %56 = arith.mulf %55, %54 : vector<8x128xf32>
    %57 = vector.extract_strided_slice %40 {offsets = [0, 256], sizes = [8, 128], strides = [1, 1]} : vector<8x512xf32> to vector<8x128xf32>
    %58 = math.tanh %57 : vector<8x128xf32>
    %59 = vector.extract_strided_slice %40 {offsets = [0, 384], sizes = [8, 128], strides = [1, 1]} : vector<8x512xf32> to vector<8x128xf32>
    %cst_19 = arith.constant 5.000000e-01 : f32
    %60 = vector.broadcast %cst_19 : f32 to vector<8x128xf32>
    %61 = arith.mulf %60, %59 : vector<8x128xf32>
    %62 = math.tanh %61 : vector<8x128xf32>
    %cst_20 = arith.constant 1.000000e+00 : f32
    %63 = vector.broadcast %cst_20 : f32 to vector<8x128xf32>
    %64 = arith.addf %62, %63 : vector<8x128xf32>
    %cst_21 = arith.constant 5.000000e-01 : f32
    %65 = vector.broadcast %cst_21 : f32 to vector<8x128xf32>
    %66 = arith.mulf %65, %64 : vector<8x128xf32>
    %67 = arith.mulf %56, %25 : vector<8x128xf32>
    %68 = arith.mulf %48, %58 : vector<8x128xf32>
    %69 = arith.addf %67, %68 : vector<8x128xf32>
    %70 = math.tanh %69 : vector<8x128xf32>
    %71 = arith.mulf %66, %70 : vector<8x128xf32>
    %72 = vector.extract_strided_slice %71 {offsets = [0, 0], sizes = [8, 64], strides = [1, 1]} : vector<8x128xf32> to vector<8x64xf32>
    %73 = arith.index_cast %c0_i32_8 : i32 to index
    %c0_22 = arith.constant 0 : index
    %c0_23 = arith.constant 0 : index
    %74 = vector.load %arg12[%73, %c0_22, %c0_23] : memref<8x8x64xf32, #tpu.memory_space<vmem>>, vector<1x8x64xf32>
    %75 = vector.shape_cast %74 : vector<1x8x64xf32> to vector<8x64xf32>
    %76 = vector.shape_cast %72 : vector<8x64xf32> to vector<1x8x64xf32>
    tpu.vector_store %arg12[%73, %c0_22, %c0_23], %76 {strides = array<i32>} : memref<8x8x64xf32, #tpu.memory_space<vmem>>, vector<1x8x64xf32>,
    %77 = vector.extract_strided_slice %71 {offsets = [0, 64], sizes = [8, 64], strides = [1, 1]} : vector<8x128xf32> to vector<8x64xf32>
    %78 = arith.index_cast %26 : i32 to index
    %c0_24 = arith.constant 0 : index
    %c0_25 = arith.constant 0 : index
    %79 = vector.load %arg13[%78, %c0_24, %c0_25] : memref<8x8x64xf32, #tpu.memory_space<vmem>>, vector<1x8x64xf32>
    %80 = vector.shape_cast %79 : vector<1x8x64xf32> to vector<8x64xf32>
    %81 = vector.shape_cast %77 : vector<8x64xf32> to vector<1x8x64xf32>
    tpu.vector_store %arg13[%78, %c0_24, %c0_25], %81 {strides = array<i32>} : memref<8x8x64xf32, #tpu.memory_space<vmem>>, vector<1x8x64xf32>,
    %c1_i32_26 = arith.constant 1 : i32
    %c7_i32_27 = arith.constant 7 : i32
    %82 = arith.subi %c7_i32_27, %c1_i32_26 : i32
    %83 = arith.index_cast %c1_i32_26 : i32 to index
    %c0_28 = arith.constant 0 : index
    %c0_29 = arith.constant 0 : index
    %84 = vector.load %arg1[%83, %c0_28, %c0_29] : memref<8x8x512xbf16, #tpu.memory_space<vmem>>, vector<1x8x512xbf16>
    %85 = vector.shape_cast %84 : vector<1x8x512xbf16> to vector<8x512xbf16>
    %86 = arith.extf %85 : vector<8x512xbf16> to vector<8x512xf32>
    %87 = arith.index_cast %82 : i32 to index
    %c0_30 = arith.constant 0 : index
    %c0_31 = arith.constant 0 : index
    %88 = vector.load %arg1[%87, %c0_30, %c0_31] : memref<8x8x512xbf16, #tpu.memory_space<vmem>>, vector<1x8x512xbf16>
    %89 = vector.shape_cast %88 : vector<1x8x512xbf16> to vector<8x512xbf16>
    %90 = arith.extf %89 : vector<8x512xbf16> to vector<8x512xf32>
    %91 = vector.shape_cast %19 : vector<1x512xi1> to vector<1x512xi1>
    %92 = vector.broadcast %91 : vector<1x512xi1> to vector<8x512xi1>
    %93 = arith.select %92, %86, %90 : vector<8x512xi1>, vector<8x512xf32>
    %94 = arith.truncf %71 : vector<8x128xf32> to vector<8x128xbf16>
    %cst_32 = arith.constant dense<0.000000e+00> : vector<8x512xf32>
    %95 = tpu.matmul %94, %0, %cst_32 {dimension_numbers = #tpu.dot_dimension_numbers<[1], [0], [0], [1], [0, 0, 1, 1], [], []>} : vector<8x128xbf16>, vector<128x512xbf16>, vector<8x512xf32> -> vector<8x512xf32>
    %96 = arith.addf %93, %95 : vector<8x512xf32>
    %97 = vector.extract_strided_slice %96 {offsets = [0, 0], sizes = [8, 128], strides = [1, 1]} : vector<8x512xf32> to vector<8x128xf32>
    %cst_33 = arith.constant 5.000000e-01 : f32
    %98 = vector.broadcast %cst_33 : f32 to vector<8x128xf32>
    %99 = arith.mulf %98, %97 : vector<8x128xf32>
    %100 = math.tanh %99 : vector<8x128xf32>
    %cst_34 = arith.constant 1.000000e+00 : f32
    %101 = vector.broadcast %cst_34 : f32 to vector<8x128xf32>
    %102 = arith.addf %100, %101 : vector<8x128xf32>
    %cst_35 = arith.constant 5.000000e-01 : f32
    %103 = vector.broadcast %cst_35 : f32 to vector<8x128xf32>
    %104 = arith.mulf %103, %102 : vector<8x128xf32>
    %105 = vector.extract_strided_slice %96 {offsets = [0, 128], sizes = [8, 128], strides = [1, 1]} : vector<8x512xf32> to vector<8x128xf32>
    %cst_36 = arith.constant 5.000000e-01 : f32
    %106 = vector.broadcast %cst_36 : f32 to vector<8x128xf32>
    %107 = arith.mulf %106, %105 : vector<8x128xf32>
    %108 = math.tanh %107 : vector<8x128xf32>
    %cst_37 = arith.constant 1.000000e+00 : f32
    %109 = vector.broadcast %cst_37 : f32 to vector<8x128xf32>
    %110 = arith.addf %108, %109 : vector<8x128xf32>
    %cst_38 = arith.constant 5.000000e-01 : f32
    %111 = vector.broadcast %cst_38 : f32 to vector<8x128xf32>
    %112 = arith.mulf %111, %110 : vector<8x128xf32>
    %113 = vector.extract_strided_slice %96 {offsets = [0, 256], sizes = [8, 128], strides = [1, 1]} : vector<8x512xf32> to vector<8x128xf32>
    %114 = math.tanh %113 : vector<8x128xf32>
    %115 = vector.extract_strided_slice %96 {offsets = [0, 384], sizes = [8, 128], strides = [1, 1]} : vector<8x512xf32> to vector<8x128xf32>
    %cst_39 = arith.constant 5.000000e-01 : f32
    %116 = vector.broadcast %cst_39 : f32 to vector<8x128xf32>
    %117 = arith.mulf %116, %115 : vector<8x128xf32>
    %118 = math.tanh %117 : vector<8x128xf32>
    %cst_40 = arith.constant 1.000000e+00 : f32
    %119 = vector.broadcast %cst_40 : f32 to vector<8x128xf32>
    %120 = arith.addf %118, %119 : vector<8x128xf32>
    %cst_41 = arith.constant 5.000000e-01 : f32
    %121 = vector.broadcast %cst_41 : f32 to vector<8x128xf32>
    %122 = arith.mulf %121, %120 : vector<8x128xf32>
    %123 = arith.mulf %112, %69 : vector<8x128xf32>
    %124 = arith.mulf %104, %114 : vector<8x128xf32>
    %125 = arith.addf %123, %124 : vector<8x128xf32>
    %126 = math.tanh %125 : vector<8x128xf32>
    %127 = arith.mulf %122, %126 : vector<8x128xf32>
    %128 = vector.extract_strided_slice %127 {offsets = [0, 0], sizes = [8, 64], strides = [1, 1]} : vector<8x128xf32> to vector<8x64xf32>
    %129 = arith.index_cast %c1_i32_26 : i32 to index
    %c0_42 = arith.constant 0 : index
    %c0_43 = arith.constant 0 : index
    %130 = vector.load %arg12[%129, %c0_42, %c0_43] : memref<8x8x64xf32, #tpu.memory_space<vmem>>, vector<1x8x64xf32>
    %131 = vector.shape_cast %130 : vector<1x8x64xf32> to vector<8x64xf32>
    %132 = vector.shape_cast %128 : vector<8x64xf32> to vector<1x8x64xf32>
    tpu.vector_store %arg12[%129, %c0_42, %c0_43], %132 {strides = array<i32>} : memref<8x8x64xf32, #tpu.memory_space<vmem>>, vector<1x8x64xf32>,
    %133 = vector.extract_strided_slice %127 {offsets = [0, 64], sizes = [8, 64], strides = [1, 1]} : vector<8x128xf32> to vector<8x64xf32>
    %134 = arith.index_cast %82 : i32 to index
    %c0_44 = arith.constant 0 : index
    %c0_45 = arith.constant 0 : index
    %135 = vector.load %arg13[%134, %c0_44, %c0_45] : memref<8x8x64xf32, #tpu.memory_space<vmem>>, vector<1x8x64xf32>
    %136 = vector.shape_cast %135 : vector<1x8x64xf32> to vector<8x64xf32>
    %137 = vector.shape_cast %133 : vector<8x64xf32> to vector<1x8x64xf32>
    tpu.vector_store %arg13[%134, %c0_44, %c0_45], %137 {strides = array<i32>} : memref<8x8x64xf32, #tpu.memory_space<vmem>>, vector<1x8x64xf32>,
    %c2_i32 = arith.constant 2 : i32
    %c7_i32_46 = arith.constant 7 : i32
    %138 = arith.subi %c7_i32_46, %c2_i32 : i32
    %139 = arith.index_cast %c2_i32 : i32 to index
    %c0_47 = arith.constant 0 : index
    %c0_48 = arith.constant 0 : index
    %140 = vector.load %arg1[%139, %c0_47, %c0_48] : memref<8x8x512xbf16, #tpu.memory_space<vmem>>, vector<1x8x512xbf16>
    %141 = vector.shape_cast %140 : vector<1x8x512xbf16> to vector<8x512xbf16>
    %142 = arith.extf %141 : vector<8x512xbf16> to vector<8x512xf32>
    %143 = arith.index_cast %138 : i32 to index
    %c0_49 = arith.constant 0 : index
    %c0_50 = arith.constant 0 : index
    %144 = vector.load %arg1[%143, %c0_49, %c0_50] : memref<8x8x512xbf16, #tpu.memory_space<vmem>>, vector<1x8x512xbf16>
    %145 = vector.shape_cast %144 : vector<1x8x512xbf16> to vector<8x512xbf16>
    %146 = arith.extf %145 : vector<8x512xbf16> to vector<8x512xf32>
    %147 = vector.shape_cast %19 : vector<1x512xi1> to vector<1x512xi1>
    %148 = vector.broadcast %147 : vector<1x512xi1> to vector<8x512xi1>
    %149 = arith.select %148, %142, %146 : vector<8x512xi1>, vector<8x512xf32>
    %150 = arith.truncf %127 : vector<8x128xf32> to vector<8x128xbf16>
    %cst_51 = arith.constant dense<0.000000e+00> : vector<8x512xf32>
    %151 = tpu.matmul %150, %0, %cst_51 {dimension_numbers = #tpu.dot_dimension_numbers<[1], [0], [0], [1], [0, 0, 1, 1], [], []>} : vector<8x128xbf16>, vector<128x512xbf16>, vector<8x512xf32> -> vector<8x512xf32>
    %152 = arith.addf %149, %151 : vector<8x512xf32>
    %153 = vector.extract_strided_slice %152 {offsets = [0, 0], sizes = [8, 128], strides = [1, 1]} : vector<8x512xf32> to vector<8x128xf32>
    %cst_52 = arith.constant 5.000000e-01 : f32
    %154 = vector.broadcast %cst_52 : f32 to vector<8x128xf32>
    %155 = arith.mulf %154, %153 : vector<8x128xf32>
    %156 = math.tanh %155 : vector<8x128xf32>
    %cst_53 = arith.constant 1.000000e+00 : f32
    %157 = vector.broadcast %cst_53 : f32 to vector<8x128xf32>
    %158 = arith.addf %156, %157 : vector<8x128xf32>
    %cst_54 = arith.constant 5.000000e-01 : f32
    %159 = vector.broadcast %cst_54 : f32 to vector<8x128xf32>
    %160 = arith.mulf %159, %158 : vector<8x128xf32>
    %161 = vector.extract_strided_slice %152 {offsets = [0, 128], sizes = [8, 128], strides = [1, 1]} : vector<8x512xf32> to vector<8x128xf32>
    %cst_55 = arith.constant 5.000000e-01 : f32
    %162 = vector.broadcast %cst_55 : f32 to vector<8x128xf32>
    %163 = arith.mulf %162, %161 : vector<8x128xf32>
    %164 = math.tanh %163 : vector<8x128xf32>
    %cst_56 = arith.constant 1.000000e+00 : f32
    %165 = vector.broadcast %cst_56 : f32 to vector<8x128xf32>
    %166 = arith.addf %164, %165 : vector<8x128xf32>
    %cst_57 = arith.constant 5.000000e-01 : f32
    %167 = vector.broadcast %cst_57 : f32 to vector<8x128xf32>
    %168 = arith.mulf %167, %166 : vector<8x128xf32>
    %169 = vector.extract_strided_slice %152 {offsets = [0, 256], sizes = [8, 128], strides = [1, 1]} : vector<8x512xf32> to vector<8x128xf32>
    %170 = math.tanh %169 : vector<8x128xf32>
    %171 = vector.extract_strided_slice %152 {offsets = [0, 384], sizes = [8, 128], strides = [1, 1]} : vector<8x512xf32> to vector<8x128xf32>
    %cst_58 = arith.constant 5.000000e-01 : f32
    %172 = vector.broadcast %cst_58 : f32 to vector<8x128xf32>
    %173 = arith.mulf %172, %171 : vector<8x128xf32>
    %174 = math.tanh %173 : vector<8x128xf32>
    %cst_59 = arith.constant 1.000000e+00 : f32
    %175 = vector.broadcast %cst_59 : f32 to vector<8x128xf32>
    %176 = arith.addf %174, %175 : vector<8x128xf32>
    %cst_60 = arith.constant 5.000000e-01 : f32
    %177 = vector.broadcast %cst_60 : f32 to vector<8x128xf32>
    %178 = arith.mulf %177, %176 : vector<8x128xf32>
    %179 = arith.mulf %168, %125 : vector<8x128xf32>
    %180 = arith.mulf %160, %170 : vector<8x128xf32>
    %181 = arith.addf %179, %180 : vector<8x128xf32>
    %182 = math.tanh %181 : vector<8x128xf32>
    %183 = arith.mulf %178, %182 : vector<8x128xf32>
    %184 = vector.extract_strided_slice %183 {offsets = [0, 0], sizes = [8, 64], strides = [1, 1]} : vector<8x128xf32> to vector<8x64xf32>
    %185 = arith.index_cast %c2_i32 : i32 to index
    %c0_61 = arith.constant 0 : index
    %c0_62 = arith.constant 0 : index
    %186 = vector.load %arg12[%185, %c0_61, %c0_62] : memref<8x8x64xf32, #tpu.memory_space<vmem>>, vector<1x8x64xf32>
    %187 = vector.shape_cast %186 : vector<1x8x64xf32> to vector<8x64xf32>
    %188 = vector.shape_cast %184 : vector<8x64xf32> to vector<1x8x64xf32>
    tpu.vector_store %arg12[%185, %c0_61, %c0_62], %188 {strides = array<i32>} : memref<8x8x64xf32, #tpu.memory_space<vmem>>, vector<1x8x64xf32>,
    %189 = vector.extract_strided_slice %183 {offsets = [0, 64], sizes = [8, 64], strides = [1, 1]} : vector<8x128xf32> to vector<8x64xf32>
    %190 = arith.index_cast %138 : i32 to index
    %c0_63 = arith.constant 0 : index
    %c0_64 = arith.constant 0 : index
    %191 = vector.load %arg13[%190, %c0_63, %c0_64] : memref<8x8x64xf32, #tpu.memory_space<vmem>>, vector<1x8x64xf32>
    %192 = vector.shape_cast %191 : vector<1x8x64xf32> to vector<8x64xf32>
    %193 = vector.shape_cast %189 : vector<8x64xf32> to vector<1x8x64xf32>
    tpu.vector_store %arg13[%190, %c0_63, %c0_64], %193 {strides = array<i32>} : memref<8x8x64xf32, #tpu.memory_space<vmem>>, vector<1x8x64xf32>,
    %c3_i32 = arith.constant 3 : i32
    %c7_i32_65 = arith.constant 7 : i32
    %194 = arith.subi %c7_i32_65, %c3_i32 : i32
    %195 = arith.index_cast %c3_i32 : i32 to index
    %c0_66 = arith.constant 0 : index
    %c0_67 = arith.constant 0 : index
    %196 = vector.load %arg1[%195, %c0_66, %c0_67] : memref<8x8x512xbf16, #tpu.memory_space<vmem>>, vector<1x8x512xbf16>
    %197 = vector.shape_cast %196 : vector<1x8x512xbf16> to vector<8x512xbf16>
    %198 = arith.extf %197 : vector<8x512xbf16> to vector<8x512xf32>
    %199 = arith.index_cast %194 : i32 to index
    %c0_68 = arith.constant 0 : index
    %c0_69 = arith.constant 0 : index
    %200 = vector.load %arg1[%199, %c0_68, %c0_69] : memref<8x8x512xbf16, #tpu.memory_space<vmem>>, vector<1x8x512xbf16>
    %201 = vector.shape_cast %200 : vector<1x8x512xbf16> to vector<8x512xbf16>
    %202 = arith.extf %201 : vector<8x512xbf16> to vector<8x512xf32>
    %203 = vector.shape_cast %19 : vector<1x512xi1> to vector<1x512xi1>
    %204 = vector.broadcast %203 : vector<1x512xi1> to vector<8x512xi1>
    %205 = arith.select %204, %198, %202 : vector<8x512xi1>, vector<8x512xf32>
    %206 = arith.truncf %183 : vector<8x128xf32> to vector<8x128xbf16>
    %cst_70 = arith.constant dense<0.000000e+00> : vector<8x512xf32>
    %207 = tpu.matmul %206, %0, %cst_70 {dimension_numbers = #tpu.dot_dimension_numbers<[1], [0], [0], [1], [0, 0, 1, 1], [], []>} : vector<8x128xbf16>, vector<128x512xbf16>, vector<8x512xf32> -> vector<8x512xf32>
    %208 = arith.addf %205, %207 : vector<8x512xf32>
    %209 = vector.extract_strided_slice %208 {offsets = [0, 0], sizes = [8, 128], strides = [1, 1]} : vector<8x512xf32> to vector<8x128xf32>
    %cst_71 = arith.constant 5.000000e-01 : f32
    %210 = vector.broadcast %cst_71 : f32 to vector<8x128xf32>
    %211 = arith.mulf %210, %209 : vector<8x128xf32>
    %212 = math.tanh %211 : vector<8x128xf32>
    %cst_72 = arith.constant 1.000000e+00 : f32
    %213 = vector.broadcast %cst_72 : f32 to vector<8x128xf32>
    %214 = arith.addf %212, %213 : vector<8x128xf32>
    %cst_73 = arith.constant 5.000000e-01 : f32
    %215 = vector.broadcast %cst_73 : f32 to vector<8x128xf32>
    %216 = arith.mulf %215, %214 : vector<8x128xf32>
    %217 = vector.extract_strided_slice %208 {offsets = [0, 128], sizes = [8, 128], strides = [1, 1]} : vector<8x512xf32> to vector<8x128xf32>
    %cst_74 = arith.constant 5.000000e-01 : f32
    %218 = vector.broadcast %cst_74 : f32 to vector<8x128xf32>
    %219 = arith.mulf %218, %217 : vector<8x128xf32>
    %220 = math.tanh %219 : vector<8x128xf32>
    %cst_75 = arith.constant 1.000000e+00 : f32
    %221 = vector.broadcast %cst_75 : f32 to vector<8x128xf32>
    %222 = arith.addf %220, %221 : vector<8x128xf32>
    %cst_76 = arith.constant 5.000000e-01 : f32
    %223 = vector.broadcast %cst_76 : f32 to vector<8x128xf32>
    %224 = arith.mulf %223, %222 : vector<8x128xf32>
    %225 = vector.extract_strided_slice %208 {offsets = [0, 256], sizes = [8, 128], strides = [1, 1]} : vector<8x512xf32> to vector<8x128xf32>
    %226 = math.tanh %225 : vector<8x128xf32>
    %227 = vector.extract_strided_slice %208 {offsets = [0, 384], sizes = [8, 128], strides = [1, 1]} : vector<8x512xf32> to vector<8x128xf32>
    %cst_77 = arith.constant 5.000000e-01 : f32
    %228 = vector.broadcast %cst_77 : f32 to vector<8x128xf32>
    %229 = arith.mulf %228, %227 : vector<8x128xf32>
    %230 = math.tanh %229 : vector<8x128xf32>
    %cst_78 = arith.constant 1.000000e+00 : f32
    %231 = vector.broadcast %cst_78 : f32 to vector<8x128xf32>
    %232 = arith.addf %230, %231 : vector<8x128xf32>
    %cst_79 = arith.constant 5.000000e-01 : f32
    %233 = vector.broadcast %cst_79 : f32 to vector<8x128xf32>
    %234 = arith.mulf %233, %232 : vector<8x128xf32>
    %235 = arith.mulf %224, %181 : vector<8x128xf32>
    %236 = arith.mulf %216, %226 : vector<8x128xf32>
    %237 = arith.addf %235, %236 : vector<8x128xf32>
    %238 = math.tanh %237 : vector<8x128xf32>
    %239 = arith.mulf %234, %238 : vector<8x128xf32>
    %240 = vector.extract_strided_slice %239 {offsets = [0, 0], sizes = [8, 64], strides = [1, 1]} : vector<8x128xf32> to vector<8x64xf32>
    %241 = arith.index_cast %c3_i32 : i32 to index
    %c0_80 = arith.constant 0 : index
    %c0_81 = arith.constant 0 : index
    %242 = vector.load %arg12[%241, %c0_80, %c0_81] : memref<8x8x64xf32, #tpu.memory_space<vmem>>, vector<1x8x64xf32>
    %243 = vector.shape_cast %242 : vector<1x8x64xf32> to vector<8x64xf32>
    %244 = vector.shape_cast %240 : vector<8x64xf32> to vector<1x8x64xf32>
    tpu.vector_store %arg12[%241, %c0_80, %c0_81], %244 {strides = array<i32>} : memref<8x8x64xf32, #tpu.memory_space<vmem>>, vector<1x8x64xf32>,
    %245 = vector.extract_strided_slice %239 {offsets = [0, 64], sizes = [8, 64], strides = [1, 1]} : vector<8x128xf32> to vector<8x64xf32>
    %246 = arith.index_cast %194 : i32 to index
    %c0_82 = arith.constant 0 : index
    %c0_83 = arith.constant 0 : index
    %247 = vector.load %arg13[%246, %c0_82, %c0_83] : memref<8x8x64xf32, #tpu.memory_space<vmem>>, vector<1x8x64xf32>
    %248 = vector.shape_cast %247 : vector<1x8x64xf32> to vector<8x64xf32>
    %249 = vector.shape_cast %245 : vector<8x64xf32> to vector<1x8x64xf32>
    tpu.vector_store %arg13[%246, %c0_82, %c0_83], %249 {strides = array<i32>} : memref<8x8x64xf32, #tpu.memory_space<vmem>>, vector<1x8x64xf32>,
    %c4_i32 = arith.constant 4 : i32
    %c7_i32_84 = arith.constant 7 : i32
    %250 = arith.subi %c7_i32_84, %c4_i32 : i32
    %251 = arith.index_cast %c4_i32 : i32 to index
    %c0_85 = arith.constant 0 : index
    %c0_86 = arith.constant 0 : index
    %252 = vector.load %arg1[%251, %c0_85, %c0_86] : memref<8x8x512xbf16, #tpu.memory_space<vmem>>, vector<1x8x512xbf16>
    %253 = vector.shape_cast %252 : vector<1x8x512xbf16> to vector<8x512xbf16>
    %254 = arith.extf %253 : vector<8x512xbf16> to vector<8x512xf32>
    %255 = arith.index_cast %250 : i32 to index
    %c0_87 = arith.constant 0 : index
    %c0_88 = arith.constant 0 : index
    %256 = vector.load %arg1[%255, %c0_87, %c0_88] : memref<8x8x512xbf16, #tpu.memory_space<vmem>>, vector<1x8x512xbf16>
    %257 = vector.shape_cast %256 : vector<1x8x512xbf16> to vector<8x512xbf16>
    %258 = arith.extf %257 : vector<8x512xbf16> to vector<8x512xf32>
    %259 = vector.shape_cast %19 : vector<1x512xi1> to vector<1x512xi1>
    %260 = vector.broadcast %259 : vector<1x512xi1> to vector<8x512xi1>
    %261 = arith.select %260, %254, %258 : vector<8x512xi1>, vector<8x512xf32>
    %262 = arith.truncf %239 : vector<8x128xf32> to vector<8x128xbf16>
    %cst_89 = arith.constant dense<0.000000e+00> : vector<8x512xf32>
    %263 = tpu.matmul %262, %0, %cst_89 {dimension_numbers = #tpu.dot_dimension_numbers<[1], [0], [0], [1], [0, 0, 1, 1], [], []>} : vector<8x128xbf16>, vector<128x512xbf16>, vector<8x512xf32> -> vector<8x512xf32>
    %264 = arith.addf %261, %263 : vector<8x512xf32>
    %265 = vector.extract_strided_slice %264 {offsets = [0, 0], sizes = [8, 128], strides = [1, 1]} : vector<8x512xf32> to vector<8x128xf32>
    %cst_90 = arith.constant 5.000000e-01 : f32
    %266 = vector.broadcast %cst_90 : f32 to vector<8x128xf32>
    %267 = arith.mulf %266, %265 : vector<8x128xf32>
    %268 = math.tanh %267 : vector<8x128xf32>
    %cst_91 = arith.constant 1.000000e+00 : f32
    %269 = vector.broadcast %cst_91 : f32 to vector<8x128xf32>
    %270 = arith.addf %268, %269 : vector<8x128xf32>
    %cst_92 = arith.constant 5.000000e-01 : f32
    %271 = vector.broadcast %cst_92 : f32 to vector<8x128xf32>
    %272 = arith.mulf %271, %270 : vector<8x128xf32>
    %273 = vector.extract_strided_slice %264 {offsets = [0, 128], sizes = [8, 128], strides = [1, 1]} : vector<8x512xf32> to vector<8x128xf32>
    %cst_93 = arith.constant 5.000000e-01 : f32
    %274 = vector.broadcast %cst_93 : f32 to vector<8x128xf32>
    %275 = arith.mulf %274, %273 : vector<8x128xf32>
    %276 = math.tanh %275 : vector<8x128xf32>
    %cst_94 = arith.constant 1.000000e+00 : f32
    %277 = vector.broadcast %cst_94 : f32 to vector<8x128xf32>
    %278 = arith.addf %276, %277 : vector<8x128xf32>
    %cst_95 = arith.constant 5.000000e-01 : f32
    %279 = vector.broadcast %cst_95 : f32 to vector<8x128xf32>
    %280 = arith.mulf %279, %278 : vector<8x128xf32>
    %281 = vector.extract_strided_slice %264 {offsets = [0, 256], sizes = [8, 128], strides = [1, 1]} : vector<8x512xf32> to vector<8x128xf32>
    %282 = math.tanh %281 : vector<8x128xf32>
    %283 = vector.extract_strided_slice %264 {offsets = [0, 384], sizes = [8, 128], strides = [1, 1]} : vector<8x512xf32> to vector<8x128xf32>
    %cst_96 = arith.constant 5.000000e-01 : f32
    %284 = vector.broadcast %cst_96 : f32 to vector<8x128xf32>
    %285 = arith.mulf %284, %283 : vector<8x128xf32>
    %286 = math.tanh %285 : vector<8x128xf32>
    %cst_97 = arith.constant 1.000000e+00 : f32
    %287 = vector.broadcast %cst_97 : f32 to vector<8x128xf32>
    %288 = arith.addf %286, %287 : vector<8x128xf32>
    %cst_98 = arith.constant 5.000000e-01 : f32
    %289 = vector.broadcast %cst_98 : f32 to vector<8x128xf32>
    %290 = arith.mulf %289, %288 : vector<8x128xf32>
    %291 = arith.mulf %280, %237 : vector<8x128xf32>
    %292 = arith.mulf %272, %282 : vector<8x128xf32>
    %293 = arith.addf %291, %292 : vector<8x128xf32>
    %294 = math.tanh %293 : vector<8x128xf32>
    %295 = arith.mulf %290, %294 : vector<8x128xf32>
    %296 = vector.extract_strided_slice %295 {offsets = [0, 0], sizes = [8, 64], strides = [1, 1]} : vector<8x128xf32> to vector<8x64xf32>
    %297 = arith.index_cast %c4_i32 : i32 to index
    %c0_99 = arith.constant 0 : index
    %c0_100 = arith.constant 0 : index
    %298 = vector.load %arg12[%297, %c0_99, %c0_100] : memref<8x8x64xf32, #tpu.memory_space<vmem>>, vector<1x8x64xf32>
    %299 = vector.shape_cast %298 : vector<1x8x64xf32> to vector<8x64xf32>
    %300 = vector.shape_cast %296 : vector<8x64xf32> to vector<1x8x64xf32>
    tpu.vector_store %arg12[%297, %c0_99, %c0_100], %300 {strides = array<i32>} : memref<8x8x64xf32, #tpu.memory_space<vmem>>, vector<1x8x64xf32>,
    %301 = vector.extract_strided_slice %295 {offsets = [0, 64], sizes = [8, 64], strides = [1, 1]} : vector<8x128xf32> to vector<8x64xf32>
    %302 = arith.index_cast %250 : i32 to index
    %c0_101 = arith.constant 0 : index
    %c0_102 = arith.constant 0 : index
    %303 = vector.load %arg13[%302, %c0_101, %c0_102] : memref<8x8x64xf32, #tpu.memory_space<vmem>>, vector<1x8x64xf32>
    %304 = vector.shape_cast %303 : vector<1x8x64xf32> to vector<8x64xf32>
    %305 = vector.shape_cast %301 : vector<8x64xf32> to vector<1x8x64xf32>
    tpu.vector_store %arg13[%302, %c0_101, %c0_102], %305 {strides = array<i32>} : memref<8x8x64xf32, #tpu.memory_space<vmem>>, vector<1x8x64xf32>,
    %c5_i32 = arith.constant 5 : i32
    %c7_i32_103 = arith.constant 7 : i32
    %306 = arith.subi %c7_i32_103, %c5_i32 : i32
    %307 = arith.index_cast %c5_i32 : i32 to index
    %c0_104 = arith.constant 0 : index
    %c0_105 = arith.constant 0 : index
    %308 = vector.load %arg1[%307, %c0_104, %c0_105] : memref<8x8x512xbf16, #tpu.memory_space<vmem>>, vector<1x8x512xbf16>
    %309 = vector.shape_cast %308 : vector<1x8x512xbf16> to vector<8x512xbf16>
    %310 = arith.extf %309 : vector<8x512xbf16> to vector<8x512xf32>
    %311 = arith.index_cast %306 : i32 to index
    %c0_106 = arith.constant 0 : index
    %c0_107 = arith.constant 0 : index
    %312 = vector.load %arg1[%311, %c0_106, %c0_107] : memref<8x8x512xbf16, #tpu.memory_space<vmem>>, vector<1x8x512xbf16>
    %313 = vector.shape_cast %312 : vector<1x8x512xbf16> to vector<8x512xbf16>
    %314 = arith.extf %313 : vector<8x512xbf16> to vector<8x512xf32>
    %315 = vector.shape_cast %19 : vector<1x512xi1> to vector<1x512xi1>
    %316 = vector.broadcast %315 : vector<1x512xi1> to vector<8x512xi1>
    %317 = arith.select %316, %310, %314 : vector<8x512xi1>, vector<8x512xf32>
    %318 = arith.truncf %295 : vector<8x128xf32> to vector<8x128xbf16>
    %cst_108 = arith.constant dense<0.000000e+00> : vector<8x512xf32>
    %319 = tpu.matmul %318, %0, %cst_108 {dimension_numbers = #tpu.dot_dimension_numbers<[1], [0], [0], [1], [0, 0, 1, 1], [], []>} : vector<8x128xbf16>, vector<128x512xbf16>, vector<8x512xf32> -> vector<8x512xf32>
    %320 = arith.addf %317, %319 : vector<8x512xf32>
    %321 = vector.extract_strided_slice %320 {offsets = [0, 0], sizes = [8, 128], strides = [1, 1]} : vector<8x512xf32> to vector<8x128xf32>
    %cst_109 = arith.constant 5.000000e-01 : f32
    %322 = vector.broadcast %cst_109 : f32 to vector<8x128xf32>
    %323 = arith.mulf %322, %321 : vector<8x128xf32>
    %324 = math.tanh %323 : vector<8x128xf32>
    %cst_110 = arith.constant 1.000000e+00 : f32
    %325 = vector.broadcast %cst_110 : f32 to vector<8x128xf32>
    %326 = arith.addf %324, %325 : vector<8x128xf32>
    %cst_111 = arith.constant 5.000000e-01 : f32
    %327 = vector.broadcast %cst_111 : f32 to vector<8x128xf32>
    %328 = arith.mulf %327, %326 : vector<8x128xf32>
    %329 = vector.extract_strided_slice %320 {offsets = [0, 128], sizes = [8, 128], strides = [1, 1]} : vector<8x512xf32> to vector<8x128xf32>
    %cst_112 = arith.constant 5.000000e-01 : f32
    %330 = vector.broadcast %cst_112 : f32 to vector<8x128xf32>
    %331 = arith.mulf %330, %329 : vector<8x128xf32>
    %332 = math.tanh %331 : vector<8x128xf32>
    %cst_113 = arith.constant 1.000000e+00 : f32
    %333 = vector.broadcast %cst_113 : f32 to vector<8x128xf32>
    %334 = arith.addf %332, %333 : vector<8x128xf32>
    %cst_114 = arith.constant 5.000000e-01 : f32
    %335 = vector.broadcast %cst_114 : f32 to vector<8x128xf32>
    %336 = arith.mulf %335, %334 : vector<8x128xf32>
    %337 = vector.extract_strided_slice %320 {offsets = [0, 256], sizes = [8, 128], strides = [1, 1]} : vector<8x512xf32> to vector<8x128xf32>
    %338 = math.tanh %337 : vector<8x128xf32>
    %339 = vector.extract_strided_slice %320 {offsets = [0, 384], sizes = [8, 128], strides = [1, 1]} : vector<8x512xf32> to vector<8x128xf32>
    %cst_115 = arith.constant 5.000000e-01 : f32
    %340 = vector.broadcast %cst_115 : f32 to vector<8x128xf32>
    %341 = arith.mulf %340, %339 : vector<8x128xf32>
    %342 = math.tanh %341 : vector<8x128xf32>
    %cst_116 = arith.constant 1.000000e+00 : f32
    %343 = vector.broadcast %cst_116 : f32 to vector<8x128xf32>
    %344 = arith.addf %342, %343 : vector<8x128xf32>
    %cst_117 = arith.constant 5.000000e-01 : f32
    %345 = vector.broadcast %cst_117 : f32 to vector<8x128xf32>
    %346 = arith.mulf %345, %344 : vector<8x128xf32>
    %347 = arith.mulf %336, %293 : vector<8x128xf32>
    %348 = arith.mulf %328, %338 : vector<8x128xf32>
    %349 = arith.addf %347, %348 : vector<8x128xf32>
    %350 = math.tanh %349 : vector<8x128xf32>
    %351 = arith.mulf %346, %350 : vector<8x128xf32>
    %352 = vector.extract_strided_slice %351 {offsets = [0, 0], sizes = [8, 64], strides = [1, 1]} : vector<8x128xf32> to vector<8x64xf32>
    %353 = arith.index_cast %c5_i32 : i32 to index
    %c0_118 = arith.constant 0 : index
    %c0_119 = arith.constant 0 : index
    %354 = vector.load %arg12[%353, %c0_118, %c0_119] : memref<8x8x64xf32, #tpu.memory_space<vmem>>, vector<1x8x64xf32>
    %355 = vector.shape_cast %354 : vector<1x8x64xf32> to vector<8x64xf32>
    %356 = vector.shape_cast %352 : vector<8x64xf32> to vector<1x8x64xf32>
    tpu.vector_store %arg12[%353, %c0_118, %c0_119], %356 {strides = array<i32>} : memref<8x8x64xf32, #tpu.memory_space<vmem>>, vector<1x8x64xf32>,
    %357 = vector.extract_strided_slice %351 {offsets = [0, 64], sizes = [8, 64], strides = [1, 1]} : vector<8x128xf32> to vector<8x64xf32>
    %358 = arith.index_cast %306 : i32 to index
    %c0_120 = arith.constant 0 : index
    %c0_121 = arith.constant 0 : index
    %359 = vector.load %arg13[%358, %c0_120, %c0_121] : memref<8x8x64xf32, #tpu.memory_space<vmem>>, vector<1x8x64xf32>
    %360 = vector.shape_cast %359 : vector<1x8x64xf32> to vector<8x64xf32>
    %361 = vector.shape_cast %357 : vector<8x64xf32> to vector<1x8x64xf32>
    tpu.vector_store %arg13[%358, %c0_120, %c0_121], %361 {strides = array<i32>} : memref<8x8x64xf32, #tpu.memory_space<vmem>>, vector<1x8x64xf32>,
    %c6_i32 = arith.constant 6 : i32
    %c7_i32_122 = arith.constant 7 : i32
    %362 = arith.subi %c7_i32_122, %c6_i32 : i32
    %363 = arith.index_cast %c6_i32 : i32 to index
    %c0_123 = arith.constant 0 : index
    %c0_124 = arith.constant 0 : index
    %364 = vector.load %arg1[%363, %c0_123, %c0_124] : memref<8x8x512xbf16, #tpu.memory_space<vmem>>, vector<1x8x512xbf16>
    %365 = vector.shape_cast %364 : vector<1x8x512xbf16> to vector<8x512xbf16>
    %366 = arith.extf %365 : vector<8x512xbf16> to vector<8x512xf32>
    %367 = arith.index_cast %362 : i32 to index
    %c0_125 = arith.constant 0 : index
    %c0_126 = arith.constant 0 : index
    %368 = vector.load %arg1[%367, %c0_125, %c0_126] : memref<8x8x512xbf16, #tpu.memory_space<vmem>>, vector<1x8x512xbf16>
    %369 = vector.shape_cast %368 : vector<1x8x512xbf16> to vector<8x512xbf16>
    %370 = arith.extf %369 : vector<8x512xbf16> to vector<8x512xf32>
    %371 = vector.shape_cast %19 : vector<1x512xi1> to vector<1x512xi1>
    %372 = vector.broadcast %371 : vector<1x512xi1> to vector<8x512xi1>
    %373 = arith.select %372, %366, %370 : vector<8x512xi1>, vector<8x512xf32>
    %374 = arith.truncf %351 : vector<8x128xf32> to vector<8x128xbf16>
    %cst_127 = arith.constant dense<0.000000e+00> : vector<8x512xf32>
    %375 = tpu.matmul %374, %0, %cst_127 {dimension_numbers = #tpu.dot_dimension_numbers<[1], [0], [0], [1], [0, 0, 1, 1], [], []>} : vector<8x128xbf16>, vector<128x512xbf16>, vector<8x512xf32> -> vector<8x512xf32>
    %376 = arith.addf %373, %375 : vector<8x512xf32>
    %377 = vector.extract_strided_slice %376 {offsets = [0, 0], sizes = [8, 128], strides = [1, 1]} : vector<8x512xf32> to vector<8x128xf32>
    %cst_128 = arith.constant 5.000000e-01 : f32
    %378 = vector.broadcast %cst_128 : f32 to vector<8x128xf32>
    %379 = arith.mulf %378, %377 : vector<8x128xf32>
    %380 = math.tanh %379 : vector<8x128xf32>
    %cst_129 = arith.constant 1.000000e+00 : f32
    %381 = vector.broadcast %cst_129 : f32 to vector<8x128xf32>
    %382 = arith.addf %380, %381 : vector<8x128xf32>
    %cst_130 = arith.constant 5.000000e-01 : f32
    %383 = vector.broadcast %cst_130 : f32 to vector<8x128xf32>
    %384 = arith.mulf %383, %382 : vector<8x128xf32>
    %385 = vector.extract_strided_slice %376 {offsets = [0, 128], sizes = [8, 128], strides = [1, 1]} : vector<8x512xf32> to vector<8x128xf32>
    %cst_131 = arith.constant 5.000000e-01 : f32
    %386 = vector.broadcast %cst_131 : f32 to vector<8x128xf32>
    %387 = arith.mulf %386, %385 : vector<8x128xf32>
    %388 = math.tanh %387 : vector<8x128xf32>
    %cst_132 = arith.constant 1.000000e+00 : f32
    %389 = vector.broadcast %cst_132 : f32 to vector<8x128xf32>
    %390 = arith.addf %388, %389 : vector<8x128xf32>
    %cst_133 = arith.constant 5.000000e-01 : f32
    %391 = vector.broadcast %cst_133 : f32 to vector<8x128xf32>
    %392 = arith.mulf %391, %390 : vector<8x128xf32>
    %393 = vector.extract_strided_slice %376 {offsets = [0, 256], sizes = [8, 128], strides = [1, 1]} : vector<8x512xf32> to vector<8x128xf32>
    %394 = math.tanh %393 : vector<8x128xf32>
    %395 = vector.extract_strided_slice %376 {offsets = [0, 384], sizes = [8, 128], strides = [1, 1]} : vector<8x512xf32> to vector<8x128xf32>
    %cst_134 = arith.constant 5.000000e-01 : f32
    %396 = vector.broadcast %cst_134 : f32 to vector<8x128xf32>
    %397 = arith.mulf %396, %395 : vector<8x128xf32>
    %398 = math.tanh %397 : vector<8x128xf32>
    %cst_135 = arith.constant 1.000000e+00 : f32
    %399 = vector.broadcast %cst_135 : f32 to vector<8x128xf32>
    %400 = arith.addf %398, %399 : vector<8x128xf32>
    %cst_136 = arith.constant 5.000000e-01 : f32
    %401 = vector.broadcast %cst_136 : f32 to vector<8x128xf32>
    %402 = arith.mulf %401, %400 : vector<8x128xf32>
    %403 = arith.mulf %392, %349 : vector<8x128xf32>
    %404 = arith.mulf %384, %394 : vector<8x128xf32>
    %405 = arith.addf %403, %404 : vector<8x128xf32>
    %406 = math.tanh %405 : vector<8x128xf32>
    %407 = arith.mulf %402, %406 : vector<8x128xf32>
    %408 = vector.extract_strided_slice %407 {offsets = [0, 0], sizes = [8, 64], strides = [1, 1]} : vector<8x128xf32> to vector<8x64xf32>
    %409 = arith.index_cast %c6_i32 : i32 to index
    %c0_137 = arith.constant 0 : index
    %c0_138 = arith.constant 0 : index
    %410 = vector.load %arg12[%409, %c0_137, %c0_138] : memref<8x8x64xf32, #tpu.memory_space<vmem>>, vector<1x8x64xf32>
    %411 = vector.shape_cast %410 : vector<1x8x64xf32> to vector<8x64xf32>
    %412 = vector.shape_cast %408 : vector<8x64xf32> to vector<1x8x64xf32>
    tpu.vector_store %arg12[%409, %c0_137, %c0_138], %412 {strides = array<i32>} : memref<8x8x64xf32, #tpu.memory_space<vmem>>, vector<1x8x64xf32>,
    %413 = vector.extract_strided_slice %407 {offsets = [0, 64], sizes = [8, 64], strides = [1, 1]} : vector<8x128xf32> to vector<8x64xf32>
    %414 = arith.index_cast %362 : i32 to index
    %c0_139 = arith.constant 0 : index
    %c0_140 = arith.constant 0 : index
    %415 = vector.load %arg13[%414, %c0_139, %c0_140] : memref<8x8x64xf32, #tpu.memory_space<vmem>>, vector<1x8x64xf32>
    %416 = vector.shape_cast %415 : vector<1x8x64xf32> to vector<8x64xf32>
    %417 = vector.shape_cast %413 : vector<8x64xf32> to vector<1x8x64xf32>
    tpu.vector_store %arg13[%414, %c0_139, %c0_140], %417 {strides = array<i32>} : memref<8x8x64xf32, #tpu.memory_space<vmem>>, vector<1x8x64xf32>,
    %c7_i32_141 = arith.constant 7 : i32
    %c7_i32_142 = arith.constant 7 : i32
    %418 = arith.subi %c7_i32_142, %c7_i32_141 : i32
    %419 = arith.index_cast %c7_i32_141 : i32 to index
    %c0_143 = arith.constant 0 : index
    %c0_144 = arith.constant 0 : index
    %420 = vector.load %arg1[%419, %c0_143, %c0_144] : memref<8x8x512xbf16, #tpu.memory_space<vmem>>, vector<1x8x512xbf16>
    %421 = vector.shape_cast %420 : vector<1x8x512xbf16> to vector<8x512xbf16>
    %422 = arith.extf %421 : vector<8x512xbf16> to vector<8x512xf32>
    %423 = arith.index_cast %418 : i32 to index
    %c0_145 = arith.constant 0 : index
    %c0_146 = arith.constant 0 : index
    %424 = vector.load %arg1[%423, %c0_145, %c0_146] : memref<8x8x512xbf16, #tpu.memory_space<vmem>>, vector<1x8x512xbf16>
    %425 = vector.shape_cast %424 : vector<1x8x512xbf16> to vector<8x512xbf16>
    %426 = arith.extf %425 : vector<8x512xbf16> to vector<8x512xf32>
    %427 = vector.shape_cast %19 : vector<1x512xi1> to vector<1x512xi1>
    %428 = vector.broadcast %427 : vector<1x512xi1> to vector<8x512xi1>
    %429 = arith.select %428, %422, %426 : vector<8x512xi1>, vector<8x512xf32>
    %430 = arith.truncf %407 : vector<8x128xf32> to vector<8x128xbf16>
    %cst_147 = arith.constant dense<0.000000e+00> : vector<8x512xf32>
    %431 = tpu.matmul %430, %0, %cst_147 {dimension_numbers = #tpu.dot_dimension_numbers<[1], [0], [0], [1], [0, 0, 1, 1], [], []>} : vector<8x128xbf16>, vector<128x512xbf16>, vector<8x512xf32> -> vector<8x512xf32>
    %432 = arith.addf %429, %431 : vector<8x512xf32>
    %433 = vector.extract_strided_slice %432 {offsets = [0, 0], sizes = [8, 128], strides = [1, 1]} : vector<8x512xf32> to vector<8x128xf32>
    %cst_148 = arith.constant 5.000000e-01 : f32
    %434 = vector.broadcast %cst_148 : f32 to vector<8x128xf32>
    %435 = arith.mulf %434, %433 : vector<8x128xf32>
    %436 = math.tanh %435 : vector<8x128xf32>
    %cst_149 = arith.constant 1.000000e+00 : f32
    %437 = vector.broadcast %cst_149 : f32 to vector<8x128xf32>
    %438 = arith.addf %436, %437 : vector<8x128xf32>
    %cst_150 = arith.constant 5.000000e-01 : f32
    %439 = vector.broadcast %cst_150 : f32 to vector<8x128xf32>
    %440 = arith.mulf %439, %438 : vector<8x128xf32>
    %441 = vector.extract_strided_slice %432 {offsets = [0, 128], sizes = [8, 128], strides = [1, 1]} : vector<8x512xf32> to vector<8x128xf32>
    %cst_151 = arith.constant 5.000000e-01 : f32
    %442 = vector.broadcast %cst_151 : f32 to vector<8x128xf32>
    %443 = arith.mulf %442, %441 : vector<8x128xf32>
    %444 = math.tanh %443 : vector<8x128xf32>
    %cst_152 = arith.constant 1.000000e+00 : f32
    %445 = vector.broadcast %cst_152 : f32 to vector<8x128xf32>
    %446 = arith.addf %444, %445 : vector<8x128xf32>
    %cst_153 = arith.constant 5.000000e-01 : f32
    %447 = vector.broadcast %cst_153 : f32 to vector<8x128xf32>
    %448 = arith.mulf %447, %446 : vector<8x128xf32>
    %449 = vector.extract_strided_slice %432 {offsets = [0, 256], sizes = [8, 128], strides = [1, 1]} : vector<8x512xf32> to vector<8x128xf32>
    %450 = math.tanh %449 : vector<8x128xf32>
    %451 = vector.extract_strided_slice %432 {offsets = [0, 384], sizes = [8, 128], strides = [1, 1]} : vector<8x512xf32> to vector<8x128xf32>
    %cst_154 = arith.constant 5.000000e-01 : f32
    %452 = vector.broadcast %cst_154 : f32 to vector<8x128xf32>
    %453 = arith.mulf %452, %451 : vector<8x128xf32>
    %454 = math.tanh %453 : vector<8x128xf32>
    %cst_155 = arith.constant 1.000000e+00 : f32
    %455 = vector.broadcast %cst_155 : f32 to vector<8x128xf32>
    %456 = arith.addf %454, %455 : vector<8x128xf32>
    %cst_156 = arith.constant 5.000000e-01 : f32
    %457 = vector.broadcast %cst_156 : f32 to vector<8x128xf32>
    %458 = arith.mulf %457, %456 : vector<8x128xf32>
    %459 = arith.mulf %448, %405 : vector<8x128xf32>
    %460 = arith.mulf %440, %450 : vector<8x128xf32>
    %461 = arith.addf %459, %460 : vector<8x128xf32>
    %462 = math.tanh %461 : vector<8x128xf32>
    %463 = arith.mulf %458, %462 : vector<8x128xf32>
    %464 = vector.extract_strided_slice %463 {offsets = [0, 0], sizes = [8, 64], strides = [1, 1]} : vector<8x128xf32> to vector<8x64xf32>
    %465 = arith.index_cast %c7_i32_141 : i32 to index
    %c0_157 = arith.constant 0 : index
    %c0_158 = arith.constant 0 : index
    %466 = vector.load %arg12[%465, %c0_157, %c0_158] : memref<8x8x64xf32, #tpu.memory_space<vmem>>, vector<1x8x64xf32>
    %467 = vector.shape_cast %466 : vector<1x8x64xf32> to vector<8x64xf32>
    %468 = vector.shape_cast %464 : vector<8x64xf32> to vector<1x8x64xf32>
    tpu.vector_store %arg12[%465, %c0_157, %c0_158], %468 {strides = array<i32>} : memref<8x8x64xf32, #tpu.memory_space<vmem>>, vector<1x8x64xf32>,
    %469 = vector.extract_strided_slice %463 {offsets = [0, 64], sizes = [8, 64], strides = [1, 1]} : vector<8x128xf32> to vector<8x64xf32>
    %470 = arith.index_cast %418 : i32 to index
    %c0_159 = arith.constant 0 : index
    %c0_160 = arith.constant 0 : index
    %471 = vector.load %arg13[%470, %c0_159, %c0_160] : memref<8x8x64xf32, #tpu.memory_space<vmem>>, vector<1x8x64xf32>
    %472 = vector.shape_cast %471 : vector<1x8x64xf32> to vector<8x64xf32>
    %473 = vector.shape_cast %469 : vector<8x64xf32> to vector<1x8x64xf32>
    tpu.vector_store %arg13[%470, %c0_159, %c0_160], %473 {strides = array<i32>} : memref<8x8x64xf32, #tpu.memory_space<vmem>>, vector<1x8x64xf32>,
    %c8_i32 = arith.constant 8 : i32
    %c0_161 = arith.constant 0 : index
    %c0_162 = arith.constant 0 : index
    %c0_163 = arith.constant 0 : index
    %474 = vector.load %arg12[%c0_161, %c0_162, %c0_163] : memref<8x8x64xf32, #tpu.memory_space<vmem>>, vector<8x8x64xf32>
    %c0_164 = arith.constant 0 : index
    %c0_165 = arith.constant 0 : index
    %c0_166 = arith.constant 0 : index
    %475 = vector.load %arg13[%c0_164, %c0_165, %c0_166] : memref<8x8x64xf32, #tpu.memory_space<vmem>>, vector<8x8x64xf32>
    %476 = tpu.concatenate %474, %475 in 2 : vector<8x8x64xf32>, vector<8x8x64xf32> -> vector<8x8x128xf32>
    %cst_167 = arith.constant 0.000000e+00 : f32
    %477 = vector.broadcast %cst_167 : f32 to vector<8x8x128xf32>
    %478 = arith.maximumf %476, %477 : vector<8x8x128xf32>
    %479 = arith.truncf %478 : vector<8x8x128xf32> to vector<8x8x128xbf16>
    %cst_168 = arith.constant 0.000000e+00 : bf16
    %480 = vector.broadcast %cst_168 : bf16 to vector<2x8x128xbf16>
    %481 = tpu.concatenate %480, %479, %480 in 0 : vector<2x8x128xbf16>, vector<8x8x128xbf16>, vector<2x8x128xbf16> -> vector<12x8x128xbf16>
    %482 = vector.extract_strided_slice %481 {offsets = [0, 0, 0], sizes = [8, 8, 128], strides = [1, 1, 1]} : vector<12x8x128xbf16> to vector<8x8x128xbf16>
    %483 = vector.extract_strided_slice %481 {offsets = [1, 0, 0], sizes = [8, 8, 128], strides = [1, 1, 1]} : vector<12x8x128xbf16> to vector<8x8x128xbf16>
    %484 = vector.extract_strided_slice %481 {offsets = [2, 0, 0], sizes = [8, 8, 128], strides = [1, 1, 1]} : vector<12x8x128xbf16> to vector<8x8x128xbf16>
    %485 = vector.extract_strided_slice %481 {offsets = [3, 0, 0], sizes = [8, 8, 128], strides = [1, 1, 1]} : vector<12x8x128xbf16> to vector<8x8x128xbf16>
    %486 = vector.extract_strided_slice %481 {offsets = [4, 0, 0], sizes = [8, 8, 128], strides = [1, 1, 1]} : vector<12x8x128xbf16> to vector<8x8x128xbf16>
    %487 = tpu.concatenate %482, %483, %484, %485, %486 in 2 : vector<8x8x128xbf16>, vector<8x8x128xbf16>, vector<8x8x128xbf16>, vector<8x8x128xbf16>, vector<8x8x128xbf16> -> vector<8x8x640xbf16>
    %488 = vector.shape_cast %487 : vector<8x8x640xbf16> to vector<64x640xbf16>
    %c0_169 = arith.constant 0 : index
    %c0_170 = arith.constant 0 : index
    %489 = vector.load %arg5[%c0_169, %c0_170] : memref<640x128xbf16, #tpu.memory_space<vmem>>, vector<640x128xbf16>
    %cst_171 = arith.constant dense<0.000000e+00> : vector<64x128xf32>
    %490 = tpu.matmul %488, %489, %cst_171 {dimension_numbers = #tpu.dot_dimension_numbers<[1], [0], [0], [1], [0, 0, 1, 1], [], []>} : vector<64x640xbf16>, vector<640x128xbf16>, vector<64x128xf32> -> vector<64x128xf32>
    %c0_172 = arith.constant 0 : index
    %c0_173 = arith.constant 0 : index
    %491 = vector.load %arg6[%c0_172, %c0_173] : memref<1x128xf32, #tpu.memory_space<vmem>>, vector<1x128xf32>
    %492 = vector.broadcast %491 : vector<1x128xf32> to vector<64x128xf32>
    %493 = arith.addf %490, %492 : vector<64x128xf32>
    %cst_174 = arith.constant 0.000000e+00 : f32
    %494 = vector.broadcast %cst_174 : f32 to vector<64x128xf32>
    %495 = arith.maximumf %493, %494 : vector<64x128xf32>
    %496 = vector.shape_cast %495 : vector<64x128xf32> to vector<8x8x128xf32>
    %cst_175 = arith.constant dense<0xFF800000> : vector<8x128xf32>
    %497 = vector.multi_reduction <maximumf>, %496, %cst_175 [0] : vector<8x8x128xf32> to vector<8x128xf32>
    %498 = vector.extract_strided_slice %481 {offsets = [0, 0, 0], sizes = [9, 8, 128], strides = [1, 1, 1]} : vector<12x8x128xbf16> to vector<9x8x128xbf16>
    %499 = vector.extract_strided_slice %481 {offsets = [1, 0, 0], sizes = [9, 8, 128], strides = [1, 1, 1]} : vector<12x8x128xbf16> to vector<9x8x128xbf16>
    %500 = vector.extract_strided_slice %481 {offsets = [2, 0, 0], sizes = [9, 8, 128], strides = [1, 1, 1]} : vector<12x8x128xbf16> to vector<9x8x128xbf16>
    %501 = vector.extract_strided_slice %481 {offsets = [3, 0, 0], sizes = [9, 8, 128], strides = [1, 1, 1]} : vector<12x8x128xbf16> to vector<9x8x128xbf16>
    %502 = tpu.concatenate %498, %499, %500, %501 in 2 : vector<9x8x128xbf16>, vector<9x8x128xbf16>, vector<9x8x128xbf16>, vector<9x8x128xbf16> -> vector<9x8x512xbf16>
    %503 = vector.shape_cast %502 : vector<9x8x512xbf16> to vector<72x512xbf16>
    %c0_176 = arith.constant 0 : index
    %c0_177 = arith.constant 0 : index
    %504 = vector.load %arg7[%c0_176, %c0_177] : memref<512x64xbf16, #tpu.memory_space<vmem>>, vector<512x64xbf16>
    %cst_178 = arith.constant dense<0.000000e+00> : vector<72x64xf32>
    %505 = tpu.matmul %503, %504, %cst_178 {dimension_numbers = #tpu.dot_dimension_numbers<[1], [0], [0], [1], [0, 0, 1, 1], [], []>} : vector<72x512xbf16>, vector<512x64xbf16>, vector<72x64xf32> -> vector<72x64xf32>
    %c0_179 = arith.constant 0 : index
    %c0_180 = arith.constant 0 : index
    %506 = vector.load %arg8[%c0_179, %c0_180] : memref<1x64xf32, #tpu.memory_space<vmem>>, vector<1x64xf32>
    %507 = vector.broadcast %506 : vector<1x64xf32> to vector<72x64xf32>
    %508 = arith.addf %505, %507 : vector<72x64xf32>
    %cst_181 = arith.constant 0.000000e+00 : f32
    %509 = vector.broadcast %cst_181 : f32 to vector<72x64xf32>
    %510 = arith.maximumf %508, %509 : vector<72x64xf32>
    %511 = vector.shape_cast %510 : vector<72x64xf32> to vector<9x8x64xf32>
    %cst_182 = arith.constant dense<0xFF800000> : vector<8x64xf32>
    %512 = vector.multi_reduction <maximumf>, %511, %cst_182 [0] : vector<9x8x64xf32> to vector<8x64xf32>
    %513 = tpu.concatenate %497, %512 in 1 : vector<8x128xf32>, vector<8x64xf32> -> vector<8x192xf32>
    %c0_183 = arith.constant 0 : index
    %c0_184 = arith.constant 0 : index
    %514 = vector.load %arg9[%c0_183, %c0_184] : memref<1x192xf32, #tpu.memory_space<vmem>>, vector<1x192xf32>
    %515 = vector.broadcast %514 : vector<1x192xf32> to vector<8x192xf32>
    %516 = arith.mulf %513, %515 : vector<8x192xf32>
    %cst_185 = arith.constant dense<0.000000e+00> : vector<8xf32>
    %517 = vector.multi_reduction <add>, %516, %cst_185 [1] : vector<8x192xf32> to vector<8xf32>
    %518 = vector.shape_cast %517 : vector<8xf32> to vector<8x1xf32>
    %c0_186 = arith.constant 0 : index
    %c0_187 = arith.constant 0 : index
    %519 = memref.load %arg10[%c0_186, %c0_187] : memref<1x1xf32, #tpu.memory_space<smem>>
    %520 = vector.broadcast %519 : f32 to vector<8x1xf32>
    %521 = arith.addf %518, %520 : vector<8x1xf32>
    %c0_188 = arith.constant 0 : index
    %c0_189 = arith.constant 0 : index
    %522 = vector.load %arg11[%c0_188, %c0_189] : memref<8x1xf32, #tpu.memory_space<vmem>>, vector<8x1xf32>
    tpu.vector_store %arg11[%c0_188, %c0_189], %521 {strides = array<i32>} : memref<8x1xf32, #tpu.memory_space<vmem>>, vector<8x1xf32>,
    return
  }
  func.func @transform_0(%arg0: i32) -> (i32, i32, i32) {
    %c0_i32 = arith.constant 0 : i32
    %c0_i32_0 = arith.constant 0 : i32
    %c0_i32_1 = arith.constant 0 : i32
    return %c0_i32, %arg0, %c0_i32_0 : i32, i32, i32
  }
  func.func @transform_1(%arg0: i32) -> (i32, i32) {
    %c0_i32 = arith.constant 0 : i32
    %c0_i32_0 = arith.constant 0 : i32
    %c0_i32_1 = arith.constant 0 : i32
    return %c0_i32, %c0_i32_0 : i32, i32
  }
  func.func @transform_2(%arg0: i32) -> (i32, i32) {
    %c0_i32 = arith.constant 0 : i32
    %c0_i32_0 = arith.constant 0 : i32
    %c0_i32_1 = arith.constant 0 : i32
    return %c0_i32, %c0_i32_0 : i32, i32
  }
  func.func @transform_3(%arg0: i32) -> (i32, i32) {
    %c0_i32 = arith.constant 0 : i32
    %c0_i32_0 = arith.constant 0 : i32
    %c0_i32_1 = arith.constant 0 : i32
    return %c0_i32, %c0_i32_0 : i32, i32
  }
  func.func @transform_4(%arg0: i32) -> (i32, i32) {
    %c0_i32 = arith.constant 0 : i32
    %c0_i32_0 = arith.constant 0 : i32
    %c0_i32_1 = arith.constant 0 : i32
    return %c0_i32, %c0_i32_0 : i32, i32
  }
  func.func @transform_5(%arg0: i32) -> (i32, i32) {
    %c0_i32 = arith.constant 0 : i32
    %c0_i32_0 = arith.constant 0 : i32
    %c0_i32_1 = arith.constant 0 : i32
    return %c0_i32, %c0_i32_0 : i32, i32
  }
  func.func @transform_6(%arg0: i32) -> (i32, i32) {
    %c0_i32 = arith.constant 0 : i32
    %c0_i32_0 = arith.constant 0 : i32
    %c0_i32_1 = arith.constant 0 : i32
    return %c0_i32, %c0_i32_0 : i32, i32
  }
  func.func @transform_7(%arg0: i32) -> (i32, i32) {
    %c0_i32 = arith.constant 0 : i32
    %c0_i32_0 = arith.constant 0 : i32
    %c0_i32_1 = arith.constant 0 : i32
    return %c0_i32, %c0_i32_0 : i32, i32
  }
  func.func @transform_8(%arg0: i32) -> (i32, i32) {
    %c0_i32 = arith.constant 0 : i32
    %c0_i32_0 = arith.constant 0 : i32
    %c0_i32_1 = arith.constant 0 : i32
    return %c0_i32, %c0_i32_0 : i32, i32
  }
  func.func @transform_9(%arg0: i32) -> (i32, i32) {
    %c0_i32 = arith.constant 0 : i32
    %c0_i32_0 = arith.constant 0 : i32
    %c0_i32_1 = arith.constant 0 : i32
    return %c0_i32, %c0_i32_0 : i32, i32
  }
  func.func @transform_10(%arg0: i32) -> (i32, i32) {
    %c0_i32 = arith.constant 0 : i32
    %c0_i32_0 = arith.constant 0 : i32
    return %arg0, %c0_i32 : i32, i32
  }
}

</mosaic_0001>

<bundles_post_ra>
// kernel: tpu_custom_call.1
= control target key start
LH: loop header
LB: loop body
LE: loop exit
PB: predicated region body
PF: predicated region fallthrough
CT: control target
= control target key end

     0   :  { %16 = vsyncpa [#allocation6], 0  ;;  %s4268_s0 = inlined_call_operand.hbm [shape: bf16[8,8,512], index: 0, kind: input, shape index: {}]   ;;  %s4269_s1 = inlined_call_operand.hbm [shape: bf16[128,512], index: 1, kind: input, shape index: {}]   ;;  %s4270_s2 = inlined_call_operand.vmem [shape: f32[1,128], index: 2, kind: input, shape index: {}]   ;;  %s4271_s3 = inlined_call_operand.vmem [shape: f32[1,128], index: 3, kind: input, shape index: {}]   ;;  %s4272_s4 = inlined_call_operand.vmem [shape: bf16[640,128], index: 4, kind: input, shape index: {}]   ;;  %s4273_s5 = inlined_call_operand.vmem [shape: f32[1,128], index: 5, kind: input, shape index: {}]   ;;  %s4274_s6 = inlined_call_operand.vmem [shape: bf16[512,64], index: 6, kind: input, shape index: {}]   ;;  %s4275_s7 = inlined_call_operand.vmem [shape: f32[1,64], index: 7, kind: input, shape index: {}]   ;;  %s4276_s8 = inlined_call_operand.vmem [shape: f32[1,192], index: 8, kind: input, shape index: {}]   ;;  %s4277_s9 = inlined_call_operand.<no memory space> [shape: f32[1,1], index: 9, kind: input, shape index: {}]   ;;  %s4278_s10 = inlined_call_operand.vmem [shape: f32[8,1], index: 10, kind: output, shape index: {}]  }
   0x1   :  { %17 = vsyncpa [#allocation8], 0  ;;  %s3137_s13 = smov [#allocation5]  }
   0x2   :  { %s23_s14 = sshll.u32 %s3137_s13, 4  ;;  %s24_s14 = int_to_ptr.vmem [resolvable:$true] %s23_s14 }
   0x3   :  { %s3101_s15 = scalar_lea.vmem %s24_s14, 2048  ;;  %p3106_p1 = scmp.lt.s32.totalorder %s24_s14, %s24_s14 }
   0x4   :  { %p3102_p0 = scmp.ne.s32.totalorder %s24_s14, %s3101_s15  ;;  %p3107_p2 = scmp.lt.s32.totalorder %s3101_s15, %s3101_s15 }
   0x6   :  { %p3108_p3 = por %p3107_p2, %p3106_p1 }
   0x8   :  { %p3109_p4 = pnand %p3108_p3, %p3102_p0 }
   0xa   :  { %3112 = shalt.err (!%p3109_p4)
}
   0xb   :  { %s3138_s16 = smov 256   ;;  %s3139_s17 = smov 16  }
   0xc   :  { %29 = dma.hbm_to_vmem [thread:$0]  %s4268_s0, 2048, %s24_s14, [#allocation6], %s3138_s16, %s3138_s16, %s3139_s17  }
   0xd   :  { %s3140_s20 = smov [#allocation7]  }
   0xe   :  { %s35_s21 = sshll.u32 %s3140_s20, 4  ;;  %s36_s21 = int_to_ptr.vmem [resolvable:$true] %s35_s21 }
   0xf   :  { %s3121_s22 = scalar_lea.vmem %s36_s21, 4096  ;;  %p3126_p6 = scmp.lt.s32.totalorder %s36_s21, %s36_s21 }
  0x10   :  { %p3122_p5 = scmp.ne.s32.totalorder %s36_s21, %s3121_s22  ;;  %p3127_p7 = scmp.lt.s32.totalorder %s3121_s22, %s3121_s22 }
  0x12   :  { %p3128_p8 = por %p3127_p7, %p3126_p6 }
  0x14   :  { %p3129_p9 = pnand %p3128_p8, %p3122_p5 }
  0x16   :  { %3132 = shalt.err (!%p3129_p9)
}
  0x17   :  { %41 = dma.hbm_to_vmem [thread:$0]  %s4269_s1, 4096, %s36_s21, [#allocation8], %s3138_s16, %s3138_s16, %s3139_s17  }
  0x18   :  { %3133 = dma.done.wait [#allocation6], 2048  }
  0x19   :  { %3134 = vsyncadd [#allocation6], 4294965248 }
  0x1a   :  { %3135 = dma.done.wait [#allocation8], 4096  }
  0x1b   :  { %3136 = vsyncadd [#allocation8], 4294963200  ;;  %v4296_v0 = vmov 0   ;;  %v3206_v1 = vld [vmem:[#allocation7 + $0xe4] ss:$16 sps:$4 sm:$0xff]   ;;  %v4279_v35 = vlaneseq  ;;  %v169_v45 = vld [vmem:[#allocation5 + $0x8] sm:$0xff] }
  0x1c   :  { %386 = vmatprep.mubr.bf16.mxu0 %v4296_v0  ;;  %427 = vmatprep.mubr.bf16.mxu1 %v4296_v0  ;;  %v3208_v2 = vld [vmem:[#allocation7 + $0xe0] ss:$16 sps:$4 sm:$0xff]   ;;  %v3211_v3 = vld [vmem:[#allocation7 + $0xec] ss:$16 sps:$4 sm:$0xff]   ;;  %v3213_v4 = vld [vmem:[#allocation7 + $0xe8] ss:$16 sps:$4 sm:$0xff]   ;;  %v172_v51 = vunpack.c.l.bf16 %v169_v45 }
  0x1d   :  { %354 = vmatprep.subr.bf16.mxu0 %v3206_v1  ;;  %v3216_v5 = vld [vmem:[#allocation7 + $0xc4] ss:$16 sps:$4 sm:$0xff]   ;;  %v3218_v6 = vld [vmem:[#allocation7 + $0xc0] ss:$16 sps:$4 sm:$0xff]   ;;  %395 = vmatprep.subr.bf16.mxu1 %v3211_v3  ;;  %v3221_v7 = vld [vmem:[#allocation7 + $0xcc] ss:$16 sps:$4 sm:$0xff]  }
  0x1e   :  { %355 = vmatpush1.bf16.msra.mxu0 %v3208_v2  ;;  %396 = vmatpush1.bf16.msra.mxu1 %v3213_v4  ;;  %v3225_v8 = vld [vmem:[#allocation7 + $0xc8] ss:$16 sps:$4 sm:$0xff]   ;;  %v3228_v9 = vld [vmem:[#allocation7 + $0xa4] ss:$16 sps:$4 sm:$0xff]   ;;  %v3231_v10 = vld [vmem:[#allocation7 + $0xa0] ss:$16 sps:$4 sm:$0xff]  }
  0x1f   :  { %356 = vmatprep.subr.bf16.mxu0 %v3216_v5  ;;  %397 = vmatprep.subr.bf16.mxu1 %v3221_v7  ;;  %v3233_v11 = vld [vmem:[#allocation7 + $0xac] ss:$16 sps:$4 sm:$0xff]   ;;  %v3236_v12 = vld [vmem:[#allocation7 + $0x84] ss:$16 sps:$4 sm:$0xff]   ;;  %v3239_v13 = vld [vmem:[#allocation7 + $0xa8] ss:$16 sps:$4 sm:$0xff]  }
  0x20   :  { %v3242_v14 = vld [vmem:[#allocation7 + $0x8c] ss:$16 sps:$4 sm:$0xff]   ;;  %v3245_v15 = vld [vmem:[#allocation7 + $0x80] ss:$16 sps:$4 sm:$0xff]   ;;  %v3248_v16 = vld [vmem:[#allocation7 + $0x64] ss:$16 sps:$4 sm:$0xff]  }
  0x21   :  { %v3251_v17 = vld [vmem:[#allocation7 + $0x88] ss:$16 sps:$4 sm:$0xff]   ;;  %v3254_v18 = vld [vmem:[#allocation7 + $0x6c] ss:$16 sps:$4 sm:$0xff]   ;;  %v3257_v19 = vld [vmem:[#allocation7 + $0x60] ss:$16 sps:$4 sm:$0xff]  }
  0x22   :  { %357 = vmatpush1.bf16.msra.mxu0 %v3218_v6  ;;  %398 = vmatpush1.bf16.msra.mxu1 %v3225_v8  ;;  %v3260_v20 = vld [vmem:[#allocation7 + $0x44] ss:$16 sps:$4 sm:$0xff]   ;;  %v3263_v21 = vld [vmem:[#allocation7 + $0x68] ss:$16 sps:$4 sm:$0xff]   ;;  %v3266_v22 = vld [vmem:[#allocation7 + $0x4c] ss:$16 sps:$4 sm:$0xff]  }
  0x23   :  { %358 = vmatprep.subr.bf16.mxu0 %v3228_v9  ;;  %399 = vmatprep.subr.bf16.mxu1 %v3233_v11  ;;  %v3269_v23 = vld [vmem:[#allocation7 + $0x40] ss:$16 sps:$4 sm:$0xff]   ;;  %v3272_v24 = vld [vmem:[#allocation7 + $0x24] ss:$16 sps:$4 sm:$0xff]   ;;  %v3275_v25 = vld [vmem:[#allocation7 + $0x48] ss:$16 sps:$4 sm:$0xff]  }
  0x24   :  { %v3277_v26 = vld [vmem:[#allocation7 + $0x20] ss:$16 sps:$4 sm:$0xff]   ;;  %v3279_v27 = vld [vmem:[#allocation7 + $0x2c] ss:$16 sps:$4 sm:$0xff]   ;;  %v3282_v28 = vld [vmem:[#allocation7 + $0x4] ss:$16 sps:$4 sm:$0xff]  }
  0x25   :  { %v3285_v29 = vld [vmem:[#allocation7 + $0x28] ss:$16 sps:$4 sm:$0xff]   ;;  %v3288_v30 = vld [vmem:[#allocation7 + $0xc] ss:$16 sps:$4 sm:$0xff]   ;;  %v3291_v31 = vld [vmem:[#allocation7] ss:$16 sps:$4 sm:$0xff]  }
  0x26   :  { %359 = vmatpush1.bf16.msra.mxu0 %v3231_v10  ;;  %400 = vmatpush1.bf16.msra.mxu1 %v3239_v13  ;;  %v2487_v32 = vld [vmem:[%s4270_s2] ss:$0 sm:$0xff]  ;;  %v3298_v33 = vld [vmem:[#allocation7 + $0x8] ss:$16 sps:$4 sm:$0xff]   ;;  %v3342_v36 = vand.u32 127, %v4279_v35  ;;  %v175_v39 = vld [vmem:[#allocation5 + $0x70] sm:$0xff] }
  0x27   :  { %360 = vmatprep.subr.bf16.mxu0 %v3236_v12  ;;  %401 = vmatprep.subr.bf16.mxu1 %v3242_v14  ;;  %v193_v34 = vpack.c.bf16 %v2487_v32, %v2487_v32  ;;  %v168_v38 = vld [vmem:[#allocation5] sm:$0xff]  ;;  %v177_v43 = vunpack.c.l.bf16 %v175_v39  ;;  %v176_v46 = vld [vmem:[#allocation5 + $0x78] sm:$0xff]  ;;  %v178_v48 = vunpack.c.h.bf16 %v175_v39  ;;  %v173_v39 = vunpack.c.h.bf16 %v169_v45 }
  0x28   :  { %v99_v37 = vadd.s32 128, %v3342_v36  ;;  %v100_v40 = vadd.s32 256, %v3342_v36  ;;  %v170_v42 = vunpack.c.l.bf16 %v168_v38  ;;  %vm150_vm0 = vcmp.lt.s32.totalorder %v3342_v36, 64 }
  0x29   :  { %v171_v47 = vunpack.c.h.bf16 %v168_v38  ;;  %v179_v52 = vunpack.c.l.bf16 %v176_v46  ;;  %v101_v54 = vadd.s32 384, %v3342_v36  ;;  %vm458_vm4 = vcmask 523264  }
  0x2a   :  { %361 = vmatpush1.bf16.msra.mxu0 %v3245_v15  ;;  %402 = vmatpush1.bf16.msra.mxu1 %v3251_v17  ;;  %v113_v41 = vand.u32 127, %v99_v37  ;;  %v120_v44 = vand.u32 127, %v100_v40  ;;  %v189_v50 = vsel %vm150_vm0, %v170_v42, %v177_v43  ;;  %v180_v40 = vunpack.c.h.bf16 %v176_v46 }
  0x2b   :  { %362 = vmatprep.subr.bf16.mxu0 %v3248_v16  ;;  %403 = vmatprep.subr.bf16.mxu1 %v3254_v18  ;;  %v127_v63 = vand.u32 127, %v101_v54  ;;  %vm2479_vm5 = vcmask 7168  }
  0x2c   :  { %vm3347_vm1 = vcmp.lt.s32.totalorder %v113_v41, 64  ;;  %vm3353_vm2 = vcmp.lt.s32.totalorder %v120_v44, 64 }
  0x2d   :  { %v190_v56 = vsel %vm3347_vm1, %v171_v47, %v178_v48  ;;  %v191_v59 = vsel %vm3353_vm2, %v172_v51, %v179_v52  ;;  %vm3362_vm3 = vcmp.lt.s32.totalorder %v127_v63, 64 }
  0x2e   :  { %363 = vmatpush1.bf16.msra.mxu0 %v3257_v19  ;;  %404 = vmatpush1.bf16.msra.mxu1 %v3263_v21  ;;  %v192_v47 = vsel %vm3362_vm3, %v173_v39, %v180_v40  ;;  %v3416_v39 = vld [vmem:[#allocation5 + $0x60] sm:$0xff] }
  0x2f   :  { %364 = vmatprep.subr.bf16.mxu0 %v3260_v20  ;;  %405 = vmatprep.subr.bf16.mxu1 %v3266_v22  ;;  %4319 = vst [vmem:[#allocation12_spill] sm:$0xff] %v3416_v39 }
  0x32   :  { %365 = vmatpush1.bf16.msra.mxu0 %v3269_v23  ;;  %406 = vmatpush1.bf16.msra.mxu1 %v3275_v25 }
  0x33   :  { %366 = vmatprep.subr.bf16.mxu0 %v3272_v24  ;;  %407 = vmatprep.subr.bf16.mxu1 %v3279_v27 }
  0x36   :  { %367 = vmatpush1.bf16.msra.mxu0 %v3277_v26  ;;  %408 = vmatpush1.bf16.msra.mxu1 %v3285_v29 }
  0x37   :  { %368 = vmatprep.subr.bf16.mxu0 %v3282_v28  ;;  %409 = vmatprep.subr.bf16.mxu1 %v3288_v30 }
  0x3a   :  { %369 = vmatpush1.bf16.msra.mxu0 %v3291_v31  ;;  %410 = vmatpush1.bf16.msra.mxu1 %v3298_v33 }
  0x3b   :  { %485 = vmatprep.subr.bf16.mxu0 %v3206_v1  ;;  %526 = vmatprep.subr.bf16.mxu1 %v3211_v3 }
  0x3d   :  { %387 = vmatmul.mubr.bf16.vlgmr.msra.gmra.mxu0 %v193_v34  ;;  %428 = vmatmul.mubr.bf16.vlgmr.msra.gmra.mxu1 %v193_v34 }
  0x3e   :  { %486 = vmatpush1.bf16.msra.mxu0 %v3208_v2  ;;  %517 = vmatprep.mubr.bf16.mxu0 %v4296_v0 }
  0x3f   :  { %487 = vmatprep.subr.bf16.mxu0 %v3216_v5  ;;  %527 = vmatpush1.bf16.msra.mxu1 %v3213_v4 }
  0x40   :  { %558 = vmatprep.mubr.bf16.mxu1 %v4296_v0  ;;  %528 = vmatprep.subr.bf16.mxu1 %v3221_v7 }
  0x42   :  { %488 = vmatpush1.bf16.msra.mxu0 %v3218_v6 }
  0x43   :  { %489 = vmatprep.subr.bf16.mxu0 %v3228_v9  ;;  %529 = vmatpush1.bf16.msra.mxu1 %v3225_v8 }
  0x44   :  { %530 = vmatprep.subr.bf16.mxu1 %v3233_v11 }
  0x46   :  { %490 = vmatpush1.bf16.msra.mxu0 %v3231_v10 }
  0x47   :  { %491 = vmatprep.subr.bf16.mxu0 %v3236_v12  ;;  %531 = vmatpush1.bf16.msra.mxu1 %v3239_v13 }
  0x48   :  { %532 = vmatprep.subr.bf16.mxu1 %v3242_v14 }
  0x4a   :  { %492 = vmatpush1.bf16.msra.mxu0 %v3245_v15 }
  0x4b   :  { %493 = vmatprep.subr.bf16.mxu0 %v3248_v16  ;;  %533 = vmatpush1.bf16.msra.mxu1 %v3251_v17 }
  0x4c   :  { %534 = vmatprep.subr.bf16.mxu1 %v3254_v18 }
  0x4e   :  { %494 = vmatpush1.bf16.msra.mxu0 %v3257_v19 }
  0x4f   :  { %495 = vmatprep.subr.bf16.mxu0 %v3260_v20  ;;  %535 = vmatpush1.bf16.msra.mxu1 %v3263_v21 }
  0x50   :  { %536 = vmatprep.subr.bf16.mxu1 %v3266_v22 }
  0x52   :  { %496 = vmatpush1.bf16.msra.mxu0 %v3269_v23 }
  0x53   :  { %497 = vmatprep.subr.bf16.mxu0 %v3272_v24  ;;  %537 = vmatpush1.bf16.msra.mxu1 %v3275_v25 }
  0x54   :  { %538 = vmatprep.subr.bf16.mxu1 %v3279_v27 }
  0x56   :  { %498 = vmatpush1.bf16.msra.mxu0 %v3277_v26 }
  0x57   :  { %499 = vmatprep.subr.bf16.mxu0 %v3282_v28  ;;  %539 = vmatpush1.bf16.msra.mxu1 %v3285_v29 }
  0x58   :  { %540 = vmatprep.subr.bf16.mxu1 %v3288_v30 }
  0x5a   :  { %500 = vmatpush1.bf16.msra.mxu0 %v3291_v31 }
  0x5b   :  { %616 = vmatprep.subr.bf16.mxu0 %v3206_v1  ;;  %541 = vmatpush1.bf16.msra.mxu1 %v3298_v33 }
  0x5c   :  { %657 = vmatprep.subr.bf16.mxu1 %v3211_v3 }
  0xfd   :  { %v388_v55 = vpop.f32.mrf.mxu0  ;;  %v429_v60 = vpop.f32.mrf.mxu1 }
  0xfe   :  { %v436_v57 = vadd.f32 %v388_v55, %v189_v50  ;;  %v438_v38 = vadd.f32 %v429_v60, %v191_v59 }
  0xff   :  { %v390_v58 = vpop.f32.mrf.mxu0  ;;  %v431_v34 = vpop.f32.mrf.mxu1 }
 0x100   :  { %v440_v61 = vmul.f32 0.5, %v436_v57  ;;  %v437_v62 = vadd.f32 %v390_v58, %v190_v56  ;;  %v439_v48 = vadd.f32 %v431_v34, %v192_v47  ;;  %v2488_v56 = vld [vmem:[%s4271_s3] ss:$0 sm:$0xff]  ;;  %v3422_v47 = vld [vmem:[#allocation5 + $0x18] sm:$0xff]  ;;  %s3142_s3 = smov 64  }
 0x101   :  { %v392_v32 = vpop.f32.mrf.mxu0  ;;  %v433_v42 = vpop.f32.mrf.mxu1  ;;  %4320 = vst [vmem:[#allocation13_spill] sm:$0xff] %v3422_v47 }
 0x102   :  { %2981 = vtanh.f32 %v440_v61  ;;  %v444_v37 = vmul.f32 0.5, %v437_v62  ;;  %v449_v50 = vmul.f32 0.5, %v439_v48  ;;  %v3424_v48 = vld [vmem:[#allocation5 + $0x68] sm:$0xff] }
 0x103   :  { %v393_v41 = vpop.f32.mrf.mxu0  ;;  %v434_v44 = vpop.f32.mrf.mxu1  ;;  %4321 = vst [vmem:[#allocation14_spill] sm:$0xff] %v3424_v48  ;;  %v4283_v35 = vunpack.c.h.bf16 %v3424_v48 }
 0x104   :  { %2983 = vtanh.f32 %v444_v37  ;;  %v4286_v41 = vunpack.c.l.bf16 %v3416_v39  ;;  %v4280_v44 = vunpack.c.h.bf16 %v3416_v39 }
 0x105   :  { %2985 = vtanh.f32 %v438_v38  ;;  %v3414_v38 = vld [vmem:[#allocation5 + $0x10] sm:$0xff] }
 0x106   :  { %2987 = vtanh.f32 %v449_v50  ;;  %v4287_v40 = vunpack.c.l.bf16 %v3414_v38  ;;  %v4285_v42 = vunpack.c.h.bf16 %v3414_v38 }
 0x108   :  { %v480_v50 = vsel %vm150_vm0, %v4287_v40, %v4286_v41 }
 0x10f   :  { %v2982_v51 = vpop.eup %2981 }
 0x110   :  { %v442_v52 = vadd.f32 1.0, %v2982_v51 }
 0x111   :  { %v2984_v54 = vpop.eup %2983 }
 0x112   :  { %v443_v55 = vmul.f32 0.5, %v442_v52  ;;  %v446_v45 = vadd.f32 1.0, %v2984_v54  ;;  %v2986_v46 = vpop.eup %2985  ;;  %v4282_v52 = vunpack.c.l.bf16 %v3422_v47  ;;  %v4281_v54 = vunpack.c.l.bf16 %v3424_v48 }
 0x113   :  { %v2988_v61 = vpop.eup %2987 }
 0x114   :  { %v447_v57 = vmul.f32 0.5, %v446_v45  ;;  %v454_v59 = vmul.f32 %v2986_v46, %v443_v55  ;;  %v451_v62 = vadd.f32 1.0, %v2988_v61  ;;  %v481_v45 = vsel %vm3347_vm1, %v4285_v42, %v4280_v44 }
 0x115   :  { %v482_v61 = vsel %vm3353_vm2, %v4282_v52, %v4281_v54 }
 0x116   :  { %v453_v58 = vmul.f32 %v2488_v56, %v447_v57  ;;  %v452_v63 = vmul.f32 0.5, %v451_v62 }
 0x118   :  { %v3371_v60 = vadd.f32 %v454_v59, %v453_v58 }
 0x11a   :  { %2989 = vtanh.f32 %v3371_v60 }
 0x127   :  { %v2990_v32 = vpop.eup %2989 }
 0x128   :  { %v3374_v34 = vmul.f32 %v2990_v32, %v452_v63 }
 0x12a   :  { %4318 = vst [vmem:[#allocation11_spill] sm:$0xff] %v3374_v34  ;;  %459 = vst.msk [vmem:[#allocation2] sm:$0xff] %vm458_vm4, %v3374_v34  ;;  %v484_v37 = vpack.c.bf16 %v3374_v34, %v3374_v34 }
 0x12c   :  { %518 = vmatmul.mubr.bf16.vlgmr.msra.gmra.mxu0 %v484_v37  ;;  %559 = vmatmul.mubr.bf16.vlgmr.msra.gmra.mxu1 %v484_v37  ;;  %v4284_v37 = vunpack.c.h.bf16 %v3422_v47 }
 0x12d   :  { %617 = vmatpush1.bf16.msra.mxu0 %v3208_v2  ;;  %658 = vmatpush1.bf16.msra.mxu1 %v3213_v4 }
 0x12e   :  { %618 = vmatprep.subr.bf16.mxu0 %v3216_v5  ;;  %659 = vmatprep.subr.bf16.mxu1 %v3221_v7 }
 0x12f   :  { %648 = vmatprep.mubr.bf16.mxu0 %v4296_v0  ;;  %689 = vmatprep.mubr.bf16.mxu1 %v4296_v0 }
 0x131   :  { %619 = vmatpush1.bf16.msra.mxu0 %v3218_v6  ;;  %660 = vmatpush1.bf16.msra.mxu1 %v3225_v8 }
 0x132   :  { %620 = vmatprep.subr.bf16.mxu0 %v3228_v9  ;;  %661 = vmatprep.subr.bf16.mxu1 %v3233_v11 }
 0x135   :  { %621 = vmatpush1.bf16.msra.mxu0 %v3231_v10  ;;  %662 = vmatpush1.bf16.msra.mxu1 %v3239_v13 }
 0x136   :  { %622 = vmatprep.subr.bf16.mxu0 %v3236_v12  ;;  %663 = vmatprep.subr.bf16.mxu1 %v3242_v14 }
 0x139   :  { %623 = vmatpush1.bf16.msra.mxu0 %v3245_v15  ;;  %664 = vmatpush1.bf16.msra.mxu1 %v3251_v17 }
 0x13a   :  { %624 = vmatprep.subr.bf16.mxu0 %v3248_v16  ;;  %665 = vmatprep.subr.bf16.mxu1 %v3254_v18 }
 0x13d   :  { %625 = vmatpush1.bf16.msra.mxu0 %v3257_v19  ;;  %666 = vmatpush1.bf16.msra.mxu1 %v3263_v21 }
 0x13e   :  { %626 = vmatprep.subr.bf16.mxu0 %v3260_v20  ;;  %667 = vmatprep.subr.bf16.mxu1 %v3266_v22 }
 0x141   :  { %627 = vmatpush1.bf16.msra.mxu0 %v3269_v23  ;;  %668 = vmatpush1.bf16.msra.mxu1 %v3275_v25 }
 0x142   :  { %628 = vmatprep.subr.bf16.mxu0 %v3272_v24  ;;  %669 = vmatprep.subr.bf16.mxu1 %v3279_v27 }
 0x145   :  { %629 = vmatpush1.bf16.msra.mxu0 %v3277_v26  ;;  %670 = vmatpush1.bf16.msra.mxu1 %v3285_v29 }
 0x146   :  { %630 = vmatprep.subr.bf16.mxu0 %v3282_v28  ;;  %671 = vmatprep.subr.bf16.mxu1 %v3288_v30 }
 0x149   :  { %631 = vmatpush1.bf16.msra.mxu0 %v3291_v31  ;;  %672 = vmatpush1.bf16.msra.mxu1 %v3298_v33 }
 0x14a   :  { %747 = vmatprep.subr.bf16.mxu0 %v3206_v1  ;;  %788 = vmatprep.subr.bf16.mxu1 %v3211_v3 }
 0x1ec   :  { %v519_v51 = vpop.f32.mrf.mxu0  ;;  %v560_v55 = vpop.f32.mrf.mxu1 }
 0x1ed   :  { %v567_v46 = vadd.f32 %v519_v51, %v480_v50  ;;  %v569_v44 = vadd.f32 %v560_v55, %v482_v61 }
 0x1ee   :  { %v521_v56 = vpop.f32.mrf.mxu0  ;;  %v562_v57 = vpop.f32.mrf.mxu1 }
 0x1ef   :  { %v571_v58 = vmul.f32 0.5, %v567_v46  ;;  %v568_v59 = vadd.f32 %v521_v56, %v481_v45  ;;  %v483_v45 = vsel %vm3362_vm3, %v4284_v37, %v4283_v35 }
 0x1f0   :  { %v523_v62 = vpop.f32.mrf.mxu0  ;;  %v564_v63 = vpop.f32.mrf.mxu1  ;;  %v570_v46 = vadd.f32 %v562_v57, %v483_v45 }
 0x1f1   :  { %2991 = vtanh.f32 %v571_v58  ;;  %v575_v32 = vmul.f32 0.5, %v568_v59 }
 0x1f2   :  { %v524_v50 = vpop.f32.mrf.mxu0  ;;  %v565_v51 = vpop.f32.mrf.mxu1  ;;  %v580_v56 = vmul.f32 0.5, %v570_v46 }
 0x1f3   :  { %2993 = vtanh.f32 %v575_v32 }
 0x1f4   :  { %2995 = vtanh.f32 %v569_v44 }
 0x1f5   :  { %2997 = vtanh.f32 %v580_v56 }
 0x1fe   :  { %v2992_v58 = vpop.eup %2991 }
 0x1ff   :  { %v573_v59 = vadd.f32 1.0, %v2992_v58 }
 0x200   :  { %v2994_v62 = vpop.eup %2993 }
 0x201   :  { %v574_v63 = vmul.f32 0.5, %v573_v59  ;;  %v577_v54 = vadd.f32 1.0, %v2994_v62  ;;  %v2996_v51 = vpop.eup %2995 }
 0x202   :  { %v2998_v52 = vpop.eup %2997 }
 0x203   :  { %v578_v50 = vmul.f32 0.5, %v577_v54  ;;  %v585_v61 = vmul.f32 %v2996_v51, %v574_v63  ;;  %v582_v35 = vadd.f32 1.0, %v2998_v52 }
 0x205   :  { %v584_v55 = vmul.f32 %v578_v50, %v3371_v60  ;;  %v583_v44 = vmul.f32 0.5, %v582_v35  ;;  %v3506_v35 = vld [vmem:[#allocation5 + $0x28] sm:$0xff]  ;;  %v3508_v60 = vld [vmem:[#allocation5 + $0x58] sm:$0xff] }
 0x206   :  { %v4291_v52 = vunpack.c.l.bf16 %v3506_v35  ;;  %v4290_v46 = vunpack.c.l.bf16 %v3508_v60  ;;  %v4288_v37 = vunpack.c.h.bf16 %v3508_v60 }
 0x207   :  { %v3455_v32 = vadd.f32 %v585_v61, %v584_v55 }
 0x208   :  { %v613_v55 = vsel %vm3353_vm2, %v4291_v52, %v4290_v46  ;;  %v3716_v46 = vld [vmem:[#allocation7 + $0x4] ss:$16 sps:$4 sm:$0xff]   ;;  %v3719_v52 = vld [vmem:[#allocation7 + $0xc] ss:$16 sps:$4 sm:$0xff]  }
 0x209   :  { %2999 = vtanh.f32 %v3455_v32 }
 0x216   :  { %v3000_v57 = vpop.eup %2999 }
 0x217   :  { %v3458_v45 = vmul.f32 %v3000_v57, %v583_v44 }
 0x219   :  { %4322 = vst [vmem:[#allocation15_spill] sm:$0xff] %v3458_v45  ;;  %590 = vst.msk [vmem:[#allocation2 + $0x8] sm:$0xff] %vm458_vm4, %v3458_v45  ;;  %v615_v54 = vpack.c.bf16 %v3458_v45, %v3458_v45 }
 0x21b   :  { %649 = vmatmul.mubr.bf16.vlgmr.msra.gmra.mxu0 %v615_v54  ;;  %690 = vmatmul.mubr.bf16.vlgmr.msra.gmra.mxu1 %v615_v54  ;;  %v4289_v54 = vunpack.c.h.bf16 %v3506_v35 }
 0x21c   :  { %748 = vmatpush1.bf16.msra.mxu0 %v3208_v2  ;;  %789 = vmatpush1.bf16.msra.mxu1 %v3213_v4  ;;  %v3498_v2 = vld [vmem:[#allocation5 + $0x20] sm:$0xff]  ;;  %v3500_v4 = vld [vmem:[#allocation5 + $0x50] sm:$0xff] }
 0x21d   :  { %749 = vmatprep.subr.bf16.mxu0 %v3216_v5  ;;  %790 = vmatprep.subr.bf16.mxu1 %v3221_v7  ;;  %v4295_v5 = vunpack.c.l.bf16 %v3498_v2  ;;  %v4293_v7 = vunpack.c.h.bf16 %v3498_v2 }
 0x21e   :  { %779 = vmatprep.mubr.bf16.mxu0 %v4296_v0  ;;  %820 = vmatprep.mubr.bf16.mxu1 %v4296_v0 }
 0x220   :  { %750 = vmatpush1.bf16.msra.mxu0 %v3218_v6  ;;  %791 = vmatpush1.bf16.msra.mxu1 %v3225_v8  ;;  %v4294_v6 = vunpack.c.l.bf16 %v3500_v4  ;;  %v4292_v8 = vunpack.c.h.bf16 %v3500_v4 }
 0x221   :  { %751 = vmatprep.subr.bf16.mxu0 %v3228_v9  ;;  %792 = vmatprep.subr.bf16.mxu1 %v3233_v11 }
 0x222   :  { %v612_v58 = vsel %vm3347_vm1, %v4293_v7, %v4292_v8  ;;  %v3722_v8 = vld [vmem:[#allocation7] ss:$16 sps:$4 sm:$0xff]   ;;  %v3725_v7 = vld [vmem:[#allocation7 + $0x8] ss:$16 sps:$4 sm:$0xff]  }
 0x224   :  { %752 = vmatpush1.bf16.msra.mxu0 %v3231_v10  ;;  %793 = vmatpush1.bf16.msra.mxu1 %v3239_v13 }
 0x225   :  { %753 = vmatprep.subr.bf16.mxu0 %v3236_v12  ;;  %794 = vmatprep.subr.bf16.mxu1 %v3242_v14 }
 0x228   :  { %754 = vmatpush1.bf16.msra.mxu0 %v3245_v15  ;;  %795 = vmatpush1.bf16.msra.mxu1 %v3251_v17 }
 0x229   :  { %755 = vmatprep.subr.bf16.mxu0 %v3248_v16  ;;  %796 = vmatprep.subr.bf16.mxu1 %v3254_v18 }
 0x22c   :  { %756 = vmatpush1.bf16.msra.mxu0 %v3257_v19  ;;  %797 = vmatpush1.bf16.msra.mxu1 %v3263_v21 }
 0x22d   :  { %757 = vmatprep.subr.bf16.mxu0 %v3260_v20  ;;  %798 = vmatprep.subr.bf16.mxu1 %v3266_v22 }
 0x230   :  { %758 = vmatpush1.bf16.msra.mxu0 %v3269_v23  ;;  %799 = vmatpush1.bf16.msra.mxu1 %v3275_v25 }
 0x231   :  { %759 = vmatprep.subr.bf16.mxu0 %v3272_v24  ;;  %800 = vmatprep.subr.bf16.mxu1 %v3279_v27 }
 0x234   :  { %760 = vmatpush1.bf16.msra.mxu0 %v3277_v26  ;;  %801 = vmatpush1.bf16.msra.mxu1 %v3285_v29 }
 0x235   :  { %761 = vmatprep.subr.bf16.mxu0 %v3282_v28  ;;  %802 = vmatprep.subr.bf16.mxu1 %v3288_v30 }
 0x238   :  { %762 = vmatpush1.bf16.msra.mxu0 %v3291_v31  ;;  %803 = vmatpush1.bf16.msra.mxu1 %v3298_v33 }
 0x239   :  { %876 = vmatprep.subr.bf16.mxu0 %v3206_v1  ;;  %917 = vmatprep.subr.bf16.mxu1 %v3211_v3  ;;  %v611_v1 = vsel %vm150_vm0, %v4295_v5, %v4294_v6 }
 0x2db   :  { %v650_v3 = vpop.f32.mrf.mxu0  ;;  %v691_v56 = vpop.f32.mrf.mxu1 }
 0x2dc   :  { %v698_v59 = vadd.f32 %v650_v3, %v611_v1  ;;  %v700_v42 = vadd.f32 %v691_v56, %v613_v55 }
 0x2dd   :  { %v652_v62 = vpop.f32.mrf.mxu0  ;;  %v693_v63 = vpop.f32.mrf.mxu1 }
 0x2de   :  { %v702_v50 = vmul.f32 0.5, %v698_v59  ;;  %v699_v51 = vadd.f32 %v652_v62, %v612_v58  ;;  %v614_v58 = vsel %vm3362_vm3, %v4289_v54, %v4288_v37  ;;  %v3713_v54 = vld [vmem:[#allocation7 + $0x28] ss:$16 sps:$4 sm:$0xff]  }
 0x2df   :  { %v654_v61 = vpop.f32.mrf.mxu0  ;;  %v695_v44 = vpop.f32.mrf.mxu1  ;;  %v701_v59 = vadd.f32 %v693_v63, %v614_v58 }
 0x2e0   :  { %3001 = vtanh.f32 %v702_v50  ;;  %v706_v57 = vmul.f32 0.5, %v699_v51 }
 0x2e1   :  { %v655_v1 = vpop.f32.mrf.mxu0  ;;  %v696_v3 = vpop.f32.mrf.mxu1  ;;  %v711_v62 = vmul.f32 0.5, %v701_v59  ;;  %v3551_v59 = vld [vmem:[#allocation7 + $0xe8] ss:$16 sps:$4 sm:$0xff]  }
 0x2e2   :  { %3003 = vtanh.f32 %v706_v57 }
 0x2e3   :  { %3005 = vtanh.f32 %v700_v42 }
 0x2e4   :  { %3007 = vtanh.f32 %v711_v62  ;;  %v3562_v62 = vld [vmem:[#allocation7 + $0xc0] ss:$16 sps:$4 sm:$0xff]  }
 0x2ed   :  { %v3002_v50 = vpop.eup %3001 }
 0x2ee   :  { %v704_v51 = vadd.f32 1.0, %v3002_v50  ;;  %v3565_v50 = vld [vmem:[#allocation7 + $0xc8] ss:$16 sps:$4 sm:$0xff]  }
 0x2ef   :  { %v3004_v61 = vpop.eup %3003 }
 0x2f0   :  { %v705_v44 = vmul.f32 0.5, %v704_v51  ;;  %v708_v41 = vadd.f32 1.0, %v3004_v61  ;;  %v3006_v3 = vpop.eup %3005 }
 0x2f1   :  { %v3008_v40 = vpop.eup %3007 }
 0x2f2   :  { %v709_v1 = vmul.f32 0.5, %v708_v41  ;;  %v716_v55 = vmul.f32 %v3006_v3, %v705_v44  ;;  %v713_v37 = vadd.f32 1.0, %v3008_v40  ;;  %v3554_v40 = vld [vmem:[#allocation7 + $0xc4] ss:$16 sps:$4 sm:$0xff]  }
 0x2f4   :  { %v715_v56 = vmul.f32 %v709_v1, %v3455_v32  ;;  %v714_v42 = vmul.f32 0.5, %v713_v37  ;;  %v3548_v32 = vld [vmem:[#allocation7 + $0xe0] ss:$16 sps:$4 sm:$0xff]   ;;  %v3557_v37 = vld [vmem:[#allocation7 + $0xcc] ss:$16 sps:$4 sm:$0xff]  }
 0x2f6   :  { %v3539_v57 = vadd.f32 %v716_v55, %v715_v56 }
 0x2f8   :  { %3009 = vtanh.f32 %v3539_v57 }
 0x305   :  { %v3010_v63 = vpop.eup %3009 }
 0x306   :  { %v3542_v58 = vmul.f32 %v3010_v63, %v714_v42 }
 0x308   :  { %4323 = vst [vmem:[#allocation16_spill] sm:$0xff] %v3542_v58  ;;  %721 = vst.msk [vmem:[#allocation2 + $0x10] sm:$0xff] %vm458_vm4, %v3542_v58  ;;  %v746_v41 = vpack.c.bf16 %v3542_v58, %v3542_v58 }
 0x30a   :  { %780 = vmatmul.mubr.bf16.vlgmr.msra.gmra.mxu0 %v746_v41  ;;  %821 = vmatmul.mubr.bf16.vlgmr.msra.gmra.mxu1 %v746_v41 }
 0x30b   :  { %877 = vmatpush1.bf16.msra.mxu0 %v3548_v32  ;;  %918 = vmatpush1.bf16.msra.mxu1 %v3551_v59 }
 0x30c   :  { %878 = vmatprep.subr.bf16.mxu0 %v3554_v40  ;;  %919 = vmatprep.subr.bf16.mxu1 %v3557_v37 }
 0x30d   :  { %908 = vmatprep.mubr.bf16.mxu0 %v4296_v0  ;;  %949 = vmatprep.mubr.bf16.mxu1 %v4296_v0 }
 0x30f   :  { %879 = vmatpush1.bf16.msra.mxu0 %v3562_v62  ;;  %920 = vmatpush1.bf16.msra.mxu1 %v3565_v50 }
 0x310   :  { %880 = vmatprep.subr.bf16.mxu0 %v3228_v9  ;;  %921 = vmatprep.subr.bf16.mxu1 %v3233_v11  ;;  %v3592_v9 = vld [vmem:[#allocation7 + $0xe4] ss:$16 sps:$4 sm:$0xff]  }
 0x311   :  { %v3598_v11 = vld [vmem:[#allocation5 + $0x30] sm:$0xff] }
 0x313   :  { %881 = vmatpush1.bf16.msra.mxu0 %v3231_v10  ;;  %922 = vmatpush1.bf16.msra.mxu1 %v3239_v13  ;;  %v3595_v10 = vld [vmem:[#allocation7 + $0xec] ss:$16 sps:$4 sm:$0xff]   ;;  %v731_v13 = vunpack.c.l.bf16 %v3598_v11 }
 0x314   :  { %882 = vmatprep.subr.bf16.mxu0 %v3236_v12  ;;  %923 = vmatprep.subr.bf16.mxu1 %v3242_v14  ;;  %v3600_v12 = vld [vmem:[#allocation5 + $0x40] sm:$0xff] }
 0x315   :  { %v738_v14 = vunpack.c.l.bf16 %v3600_v12 }
 0x317   :  { %883 = vmatpush1.bf16.msra.mxu0 %v3245_v15  ;;  %924 = vmatpush1.bf16.msra.mxu1 %v3251_v17  ;;  %v732_v15 = vunpack.c.h.bf16 %v3598_v11  ;;  %v3606_v17 = vld [vmem:[#allocation5 + $0x38] sm:$0xff]  ;;  %v871_v6 = vsel %vm150_vm0, %v738_v14, %v731_v13 }
 0x318   :  { %884 = vmatprep.subr.bf16.mxu0 %v3248_v16  ;;  %925 = vmatprep.subr.bf16.mxu1 %v3254_v18  ;;  %v739_v16 = vunpack.c.h.bf16 %v3600_v12  ;;  %v3608_v18 = vld [vmem:[#allocation5 + $0x48] sm:$0xff]  ;;  %v4299_v61 = vunpack.c.h.bf16 %v3606_v17  ;;  %v4325_v45 = vunpack.c.l.bf16 %v3606_v17 }
 0x319   :  { %v4298_v44 = vunpack.c.h.bf16 %v3608_v18 }
 0x31b   :  { %885 = vmatpush1.bf16.msra.mxu0 %v3257_v19  ;;  %926 = vmatpush1.bf16.msra.mxu1 %v3263_v21  ;;  %v742_v19 = vsel %vm150_vm0, %v731_v13, %v738_v14  ;;  %v4301_v21 = vunpack.c.l.bf16 %v3606_v17  ;;  %v745_v55 = vsel %vm3362_vm3, %v4299_v61, %v4298_v44  ;;  %v872_v44 = vsel %vm3347_vm1, %v739_v16, %v732_v15 }
 0x31c   :  { %886 = vmatprep.subr.bf16.mxu0 %v3260_v20  ;;  %927 = vmatprep.subr.bf16.mxu1 %v3266_v22  ;;  %v4300_v22 = vunpack.c.l.bf16 %v3608_v18 }
 0x31f   :  { %887 = vmatpush1.bf16.msra.mxu0 %v3269_v23  ;;  %928 = vmatpush1.bf16.msra.mxu1 %v3275_v25 }
 0x320   :  { %888 = vmatprep.subr.bf16.mxu0 %v3272_v24  ;;  %929 = vmatprep.subr.bf16.mxu1 %v3279_v27  ;;  %v743_v24 = vsel %vm3347_vm1, %v732_v15, %v739_v16 }
 0x323   :  { %889 = vmatpush1.bf16.msra.mxu0 %v3277_v26  ;;  %930 = vmatpush1.bf16.msra.mxu1 %v3285_v29 }
 0x324   :  { %890 = vmatprep.subr.bf16.mxu0 %v3282_v28  ;;  %931 = vmatprep.subr.bf16.mxu1 %v3288_v30  ;;  %v744_v30 = vsel %vm3353_vm2, %v4301_v21, %v4300_v22 }
 0x327   :  { %891 = vmatpush1.bf16.msra.mxu0 %v3291_v31  ;;  %932 = vmatpush1.bf16.msra.mxu1 %v3298_v33 }
 0x328   :  { %1005 = vmatprep.subr.bf16.mxu0 %v3592_v9  ;;  %1046 = vmatprep.subr.bf16.mxu1 %v3595_v10 }
 0x3ca   :  { %v781_v20 = vpop.f32.mrf.mxu0  ;;  %v822_v23 = vpop.f32.mrf.mxu1 }
 0x3cb   :  { %v829_v25 = vadd.f32 %v781_v20, %v742_v19  ;;  %v831_v56 = vadd.f32 %v822_v23, %v744_v30 }
 0x3cc   :  { %v783_v26 = vpop.f32.mrf.mxu0  ;;  %v824_v27 = vpop.f32.mrf.mxu1 }
 0x3cd   :  { %v833_v28 = vmul.f32 0.5, %v829_v25  ;;  %v830_v29 = vadd.f32 %v783_v26, %v743_v24  ;;  %v832_v42 = vadd.f32 %v824_v27, %v745_v55  ;;  %v3662_v55 = vld [vmem:[#allocation7 + $0xa0] ss:$16 sps:$4 sm:$0xff]  }
 0x3ce   :  { %v785_v31 = vpop.f32.mrf.mxu0  ;;  %v826_v33 = vpop.f32.mrf.mxu1 }
 0x3cf   :  { %3011 = vtanh.f32 %v833_v28  ;;  %v837_v51 = vmul.f32 0.5, %v830_v29  ;;  %v842_v63 = vmul.f32 0.5, %v832_v42  ;;  %v3665_v42 = vld [vmem:[#allocation7 + $0xa8] ss:$16 sps:$4 sm:$0xff]  }
 0x3d0   :  { %v786_v1 = vpop.f32.mrf.mxu0  ;;  %v827_v3 = vpop.f32.mrf.mxu1 }
 0x3d1   :  { %3013 = vtanh.f32 %v837_v51 }
 0x3d2   :  { %3015 = vtanh.f32 %v831_v56  ;;  %v3659_v56 = vld [vmem:[#allocation7 + $0xac] ss:$16 sps:$4 sm:$0xff]  }
 0x3d3   :  { %3017 = vtanh.f32 %v842_v63  ;;  %v3668_v63 = vld [vmem:[#allocation7 + $0x84] ss:$16 sps:$4 sm:$0xff]  }
 0x3dc   :  { %v3012_v41 = vpop.eup %3011 }
 0x3dd   :  { %v835_v19 = vadd.f32 1.0, %v3012_v41  ;;  %v3671_v41 = vld [vmem:[#allocation7 + $0x8c] ss:$16 sps:$4 sm:$0xff]  }
 0x3de   :  { %v3014_v20 = vpop.eup %3013 }
 0x3df   :  { %v836_v24 = vmul.f32 0.5, %v835_v19  ;;  %v839_v25 = vadd.f32 1.0, %v3014_v20  ;;  %v3016_v28 = vpop.eup %3015  ;;  %v3674_v19 = vld [vmem:[#allocation7 + $0x80] ss:$16 sps:$4 sm:$0xff]   ;;  %v3677_v20 = vld [vmem:[#allocation7 + $0x88] ss:$16 sps:$4 sm:$0xff]  }
 0x3e0   :  { %v3018_v31 = vpop.eup %3017 }
 0x3e1   :  { %v840_v26 = vmul.f32 0.5, %v839_v25  ;;  %v847_v29 = vmul.f32 %v3016_v28, %v836_v24  ;;  %v844_v33 = vadd.f32 1.0, %v3018_v31  ;;  %v3680_v24 = vld [vmem:[#allocation7 + $0x64] ss:$16 sps:$4 sm:$0xff]   ;;  %v3683_v25 = vld [vmem:[#allocation7 + $0x6c] ss:$16 sps:$4 sm:$0xff]  }
 0x3e2   :  { %v3689_v28 = vld [vmem:[#allocation7 + $0x68] ss:$16 sps:$4 sm:$0xff]   ;;  %v3698_v31 = vld [vmem:[#allocation7 + $0x40] ss:$16 sps:$4 sm:$0xff]  }
 0x3e3   :  { %v846_v23 = vmul.f32 %v840_v26, %v3539_v57  ;;  %v845_v51 = vmul.f32 0.5, %v844_v33  ;;  %v3656_v57 = vld [vmem:[#allocation7 + $0xa4] ss:$16 sps:$4 sm:$0xff]   ;;  %v3686_v26 = vld [vmem:[#allocation7 + $0x60] ss:$16 sps:$4 sm:$0xff]  }
 0x3e4   :  { %v3701_v33 = vld [vmem:[#allocation7 + $0x48] ss:$16 sps:$4 sm:$0xff]  }
 0x3e5   :  { %v3639_v30 = vadd.f32 %v847_v29, %v846_v23  ;;  %v3692_v23 = vld [vmem:[#allocation7 + $0x44] ss:$16 sps:$4 sm:$0xff]   ;;  %v3695_v29 = vld [vmem:[#allocation7 + $0x4c] ss:$16 sps:$4 sm:$0xff]  }
 0x3e7   :  { %3019 = vtanh.f32 %v3639_v30 }
 0x3f4   :  { %v3020_v27 = vpop.eup %3019 }
 0x3f5   :  { %v3642_v1 = vmul.f32 %v3020_v27, %v845_v51  ;;  %v3704_v51 = vld [vmem:[#allocation7 + $0x24] ss:$16 sps:$4 sm:$0xff]   ;;  %v3707_v27 = vld [vmem:[#allocation7 + $0x2c] ss:$16 sps:$4 sm:$0xff]  }
 0x3f7   :  { %4324 = vst [vmem:[#allocation17_spill] sm:$0xff] %v3642_v1  ;;  %852 = vst.msk [vmem:[#allocation2 + $0x18] sm:$0xff] %vm458_vm4, %v3642_v1  ;;  %v875_v3 = vpack.c.bf16 %v3642_v1, %v3642_v1  ;;  %v4326_v1 = vunpack.c.l.bf16 %v3608_v18 }
 0x3f9   :  { %909 = vmatmul.mubr.bf16.vlgmr.msra.gmra.mxu0 %v875_v3  ;;  %950 = vmatmul.mubr.bf16.vlgmr.msra.gmra.mxu1 %v875_v3  ;;  %v3710_v3 = vld [vmem:[#allocation7 + $0x20] ss:$16 sps:$4 sm:$0xff]   ;;  %v873_v13 = vsel %vm3353_vm2, %v4326_v1, %v4325_v45 }
 0x3fa   :  { %1006 = vmatpush1.bf16.msra.mxu0 %v3548_v32  ;;  %1047 = vmatpush1.bf16.msra.mxu1 %v3551_v59 }
 0x3fb   :  { %1007 = vmatprep.subr.bf16.mxu0 %v3554_v40  ;;  %1048 = vmatprep.subr.bf16.mxu1 %v3557_v37 }
 0x3fc   :  { %1037 = vmatprep.mubr.bf16.mxu0 %v4296_v0  ;;  %1078 = vmatprep.mubr.bf16.mxu1 %v4296_v0 }
 0x3fe   :  { %1008 = vmatpush1.bf16.msra.mxu0 %v3562_v62  ;;  %1049 = vmatpush1.bf16.msra.mxu1 %v3565_v50 }
 0x3ff   :  { %1009 = vmatprep.subr.bf16.mxu0 %v3656_v57  ;;  %1050 = vmatprep.subr.bf16.mxu1 %v3659_v56 }
 0x402   :  { %1010 = vmatpush1.bf16.msra.mxu0 %v3662_v55  ;;  %1051 = vmatpush1.bf16.msra.mxu1 %v3665_v42 }
 0x403   :  { %1011 = vmatprep.subr.bf16.mxu0 %v3668_v63  ;;  %1052 = vmatprep.subr.bf16.mxu1 %v3671_v41 }
 0x406   :  { %1012 = vmatpush1.bf16.msra.mxu0 %v3674_v19  ;;  %1053 = vmatpush1.bf16.msra.mxu1 %v3677_v20 }
 0x407   :  { %1013 = vmatprep.subr.bf16.mxu0 %v3680_v24  ;;  %1054 = vmatprep.subr.bf16.mxu1 %v3683_v25 }
 0x40a   :  { %1014 = vmatpush1.bf16.msra.mxu0 %v3686_v26  ;;  %1055 = vmatpush1.bf16.msra.mxu1 %v3689_v28 }
 0x40b   :  { %1015 = vmatprep.subr.bf16.mxu0 %v3692_v23  ;;  %1056 = vmatprep.subr.bf16.mxu1 %v3695_v29 }
 0x40e   :  { %1016 = vmatpush1.bf16.msra.mxu0 %v3698_v31  ;;  %1057 = vmatpush1.bf16.msra.mxu1 %v3701_v33 }
 0x40f   :  { %1017 = vmatprep.subr.bf16.mxu0 %v3704_v51  ;;  %1058 = vmatprep.subr.bf16.mxu1 %v3707_v27 }
 0x412   :  { %1018 = vmatpush1.bf16.msra.mxu0 %v3710_v3  ;;  %1059 = vmatpush1.bf16.msra.mxu1 %v3713_v54 }
 0x413   :  { %1019 = vmatprep.subr.bf16.mxu0 %v3716_v46  ;;  %1060 = vmatprep.subr.bf16.mxu1 %v3719_v52 }
 0x416   :  { %1020 = vmatpush1.bf16.msra.mxu0 %v3722_v8  ;;  %1061 = vmatpush1.bf16.msra.mxu1 %v3725_v7 }
 0x417   :  { %1134 = vmatprep.subr.bf16.mxu0 %v3592_v9  ;;  %1175 = vmatprep.subr.bf16.mxu1 %v3595_v10 }
 0x4b9   :  { %v910_v5 = vpop.f32.mrf.mxu0  ;;  %v951_v0 = vpop.f32.mrf.mxu1 }
 0x4ba   :  { %v958_v61 = vadd.f32 %v910_v5, %v871_v6  ;;  %v960_v39 = vadd.f32 %v951_v0, %v873_v13  ;;  %v4327_v5 = vunpack.c.h.bf16 %v3606_v17  ;;  %v4328_v6 = vunpack.c.h.bf16 %v3608_v18 }
 0x4bb   :  { %v912_v22 = vpop.f32.mrf.mxu0  ;;  %v953_v21 = vpop.f32.mrf.mxu1 }
 0x4bc   :  { %v962_v58 = vmul.f32 0.5, %v958_v61  ;;  %v959_v34 = vadd.f32 %v912_v22, %v872_v44  ;;  %v874_v15 = vsel %vm3362_vm3, %v4328_v6, %v4327_v5  ;;  %v4331_v5 = vunpack.c.l.bf16 %v3500_v4 }
 0x4bd   :  { %v914_v14 = vpop.f32.mrf.mxu0  ;;  %v955_v48 = vpop.f32.mrf.mxu1  ;;  %v961_v16 = vadd.f32 %v953_v21, %v874_v15 }
 0x4be   :  { %3021 = vtanh.f32 %v962_v58  ;;  %v966_v11 = vmul.f32 0.5, %v959_v34 }
 0x4bf   :  { %v915_v12 = vpop.f32.mrf.mxu0  ;;  %v956_v47 = vpop.f32.mrf.mxu1  ;;  %v971_v22 = vmul.f32 0.5, %v961_v16 }
 0x4c0   :  { %3023 = vtanh.f32 %v966_v11  ;;  %v4330_v12 = vunpack.c.l.bf16 %v3498_v2 }
 0x4c1   :  { %3025 = vtanh.f32 %v960_v39 }
 0x4c2   :  { %3027 = vtanh.f32 %v971_v22  ;;  %v1000_v6 = vsel %vm150_vm0, %v4331_v5, %v4330_v12  ;;  %v4332_v22 = vunpack.c.h.bf16 %v3498_v2 }
 0x4cb   :  { %v3022_v61 = vpop.eup %3021 }
 0x4cc   :  { %v964_v45 = vadd.f32 1.0, %v3022_v61  ;;  %v4333_v61 = vunpack.c.h.bf16 %v3500_v4 }
 0x4cd   :  { %v3024_v44 = vpop.eup %3023 }
 0x4ce   :  { %v965_v48 = vmul.f32 0.5, %v964_v45  ;;  %v968_v58 = vadd.f32 1.0, %v3024_v44  ;;  %v3026_v47 = vpop.eup %3025  ;;  %v1001_v45 = vsel %vm3347_vm1, %v4333_v61, %v4332_v22 }
 0x4cf   :  { %v3028_v18 = vpop.eup %3027 }
 0x4d0   :  { %v969_v34 = vmul.f32 0.5, %v968_v58  ;;  %v976_v1 = vmul.f32 %v3026_v47, %v965_v48  ;;  %v973_v13 = vadd.f32 1.0, %v3028_v18  ;;  %v4335_v47 = vunpack.c.l.bf16 %v3508_v60 }
 0x4d2   :  { %v975_v0 = vmul.f32 %v969_v34, %v3639_v30  ;;  %v974_v39 = vmul.f32 0.5, %v973_v13  ;;  %v4329_v30 = vmov 0   ;;  %v4334_v34 = vunpack.c.l.bf16 %v3506_v35 }
 0x4d4   :  { %v3755_v17 = vadd.f32 %v976_v1, %v975_v0  ;;  %v1002_v0 = vsel %vm3353_vm2, %v4335_v47, %v4334_v34 }
 0x4d6   :  { %3029 = vtanh.f32 %v3755_v17 }
 0x4e3   :  { %v3030_v21 = vpop.eup %3029 }
 0x4e4   :  { %v3758_v14 = vmul.f32 %v3030_v21, %v974_v39  ;;  %v4336_v21 = vunpack.c.h.bf16 %v3506_v35 }
 0x4e6   :  { %981 = vst.msk [vmem:[#allocation2 + $0x20] sm:$0xff] %vm458_vm4, %v3758_v14  ;;  %v1004_v11 = vpack.c.bf16 %v3758_v14, %v3758_v14 }
 0x4e8   :  { %1038 = vmatmul.mubr.bf16.vlgmr.msra.gmra.mxu0 %v1004_v11  ;;  %1079 = vmatmul.mubr.bf16.vlgmr.msra.gmra.mxu1 %v1004_v11  ;;  %v4337_v11 = vunpack.c.h.bf16 %v3508_v60 }
 0x4e9   :  { %1135 = vmatpush1.bf16.msra.mxu0 %v3548_v32  ;;  %1176 = vmatpush1.bf16.msra.mxu1 %v3551_v59 }
 0x4ea   :  { %1136 = vmatprep.subr.bf16.mxu0 %v3554_v40  ;;  %1177 = vmatprep.subr.bf16.mxu1 %v3557_v37  ;;  %v1003_v12 = vsel %vm3362_vm3, %v4337_v11, %v4336_v21 }
 0x4eb   :  { %1166 = vmatprep.mubr.bf16.mxu0 %v4329_v30  ;;  %1207 = vmatprep.mubr.bf16.mxu1 %v4329_v30 }
 0x4ed   :  { %1137 = vmatpush1.bf16.msra.mxu0 %v3562_v62  ;;  %1178 = vmatpush1.bf16.msra.mxu1 %v3565_v50 }
 0x4ee   :  { %1138 = vmatprep.subr.bf16.mxu0 %v3656_v57  ;;  %1179 = vmatprep.subr.bf16.mxu1 %v3659_v56 }
 0x4f1   :  { %1139 = vmatpush1.bf16.msra.mxu0 %v3662_v55  ;;  %1180 = vmatpush1.bf16.msra.mxu1 %v3665_v42 }
 0x4f2   :  { %1140 = vmatprep.subr.bf16.mxu0 %v3668_v63  ;;  %1181 = vmatprep.subr.bf16.mxu1 %v3671_v41 }
 0x4f5   :  { %1141 = vmatpush1.bf16.msra.mxu0 %v3674_v19  ;;  %1182 = vmatpush1.bf16.msra.mxu1 %v3677_v20 }
 0x4f6   :  { %1142 = vmatprep.subr.bf16.mxu0 %v3680_v24  ;;  %1183 = vmatprep.subr.bf16.mxu1 %v3683_v25 }
 0x4f9   :  { %1143 = vmatpush1.bf16.msra.mxu0 %v3686_v26  ;;  %1184 = vmatpush1.bf16.msra.mxu1 %v3689_v28 }
 0x4fa   :  { %1144 = vmatprep.subr.bf16.mxu0 %v3692_v23  ;;  %1185 = vmatprep.subr.bf16.mxu1 %v3695_v29 }
 0x4fd   :  { %1145 = vmatpush1.bf16.msra.mxu0 %v3698_v31  ;;  %1186 = vmatpush1.bf16.msra.mxu1 %v3701_v33 }
 0x4fe   :  { %1146 = vmatprep.subr.bf16.mxu0 %v3704_v51  ;;  %1187 = vmatprep.subr.bf16.mxu1 %v3707_v27 }
 0x501   :  { %1147 = vmatpush1.bf16.msra.mxu0 %v3710_v3  ;;  %1188 = vmatpush1.bf16.msra.mxu1 %v3713_v54 }
 0x502   :  { %1148 = vmatprep.subr.bf16.mxu0 %v3716_v46  ;;  %1189 = vmatprep.subr.bf16.mxu1 %v3719_v52 }
 0x505   :  { %1149 = vmatpush1.bf16.msra.mxu0 %v3722_v8  ;;  %1190 = vmatpush1.bf16.msra.mxu1 %v3725_v7 }
 0x506   :  { %1263 = vmatprep.subr.bf16.mxu0 %v3592_v9  ;;  %1304 = vmatprep.subr.bf16.mxu1 %v3595_v10 }
 0x5a8   :  { %v1039_v15 = vpop.f32.mrf.mxu0  ;;  %v1080_v16 = vpop.f32.mrf.mxu1 }
 0x5a9   :  { %v1087_v44 = vadd.f32 %v1039_v15, %v1000_v6  ;;  %v1089_v39 = vadd.f32 %v1080_v16, %v1002_v0 }
 0x5aa   :  { %v1041_v9 = vpop.f32.mrf.mxu0  ;;  %v1082_v48 = vpop.f32.mrf.mxu1 }
 0x5ab   :  { %v1091_v10 = vmul.f32 0.5, %v1087_v44  ;;  %v1088_v58 = vadd.f32 %v1041_v9, %v1001_v45  ;;  %v1090_v5 = vadd.f32 %v1082_v48, %v1003_v12 }
 0x5ac   :  { %v1043_v1 = vpop.f32.mrf.mxu0  ;;  %v1084_v18 = vpop.f32.mrf.mxu1 }
 0x5ad   :  { %3031 = vtanh.f32 %v1091_v10  ;;  %v1095_v2 = vmul.f32 0.5, %v1088_v58  ;;  %v1100_v6 = vmul.f32 0.5, %v1090_v5 }
 0x5ae   :  { %v1044_v4 = vpop.f32.mrf.mxu0  ;;  %v1085_v13 = vpop.f32.mrf.mxu1 }
 0x5af   :  { %3033 = vtanh.f32 %v1095_v2 }
 0x5b0   :  { %3035 = vtanh.f32 %v1089_v39 }
 0x5b1   :  { %3037 = vtanh.f32 %v1100_v6 }
 0x5ba   :  { %v3032_v15 = vpop.eup %3031 }
 0x5bb   :  { %v1093_v22 = vadd.f32 1.0, %v3032_v15 }
 0x5bc   :  { %v3034_v61 = vpop.eup %3033 }
 0x5bd   :  { %v1094_v45 = vmul.f32 0.5, %v1093_v22  ;;  %v1097_v44 = vadd.f32 1.0, %v3034_v61  ;;  %v3036_v10 = vpop.eup %3035 }
 0x5be   :  { %v3038_v60 = vpop.eup %3037 }
 0x5bf   :  { %v1098_v9 = vmul.f32 0.5, %v1097_v44  ;;  %v1105_v58 = vmul.f32 %v3036_v10, %v1094_v45  ;;  %v1102_v34 = vadd.f32 1.0, %v3038_v60  ;;  %v4349_v44 = vld [vmem:[#allocation17_spill] sm:$0xff]  ;;  %v4351_v10 = vld [vmem:[#allocation11_spill] sm:$0xff] }
 0x5c1   :  { %v1104_v16 = vmul.f32 %v1098_v9, %v3755_v17  ;;  %v1103_v47 = vmul.f32 0.5, %v1102_v34  ;;  %v4350_v9 = vld [vmem:[#allocation15_spill] sm:$0xff]  ;;  %v1246_v34 = vld [vmem:[#allocation5 + $0x70] sm:$0xff] }
 0x5c3   :  { %v3823_v35 = vadd.f32 %v1105_v58, %v1104_v16 }
 0x5c5   :  { %3039 = vtanh.f32 %v3823_v35 }
 0x5d2   :  { %v3040_v48 = vpop.eup %3039 }
 0x5d3   :  { %v3826_v0 = vmul.f32 %v3040_v48, %v1103_v47  ;;  %v1252_v47 = vld [vmem:[#allocation5] sm:$0xff]  ;;  %v1248_v48 = vunpack.c.l.bf16 %v1246_v34 }
 0x5d5   :  { %1110 = vst.msk [vmem:[#allocation2 + $0x28] sm:$0xff] %vm458_vm4, %v3826_v0  ;;  %v1133_v1 = vpack.c.bf16 %v3826_v0, %v3826_v0 }
 0x5d7   :  { %1167 = vmatmul.mubr.bf16.vlgmr.msra.gmra.mxu0 %v1133_v1  ;;  %1208 = vmatmul.mubr.bf16.vlgmr.msra.gmra.mxu1 %v1133_v1  ;;  %v1254_v1 = vunpack.c.l.bf16 %v1252_v47 }
 0x5d8   :  { %1264 = vmatpush1.bf16.msra.mxu0 %v3548_v32  ;;  %1305 = vmatpush1.bf16.msra.mxu1 %v3551_v59  ;;  %v4338_v32 = vunpack.c.l.bf16 %v3414_v38  ;;  %v4339_v59 = vld [vmem:[#allocation12_spill] sm:$0xff] }
 0x5d9   :  { %1265 = vmatprep.subr.bf16.mxu0 %v3554_v40  ;;  %1306 = vmatprep.subr.bf16.mxu1 %v3557_v37  ;;  %v4340_v40 = vunpack.c.l.bf16 %v4339_v59 }
 0x5da   :  { %1295 = vmatprep.mubr.bf16.mxu0 %v4329_v30  ;;  %1336 = vmatprep.mubr.bf16.mxu1 %v4329_v30 }
 0x5db   :  { %v1129_v37 = vsel %vm150_vm0, %v4340_v40, %v4338_v32  ;;  %v1249_v32 = vunpack.c.h.bf16 %v1246_v34  ;;  %v1247_v40 = vld [vmem:[#allocation5 + $0x78] sm:$0xff]  ;;  %v2926_v34 = vld [vmem:[%s4272_s4 + $0xa0] sm:$0xff]  }
 0x5dc   :  { %1266 = vmatpush1.bf16.msra.mxu0 %v3562_v62  ;;  %1307 = vmatpush1.bf16.msra.mxu1 %v3565_v50 }
 0x5dd   :  { %1267 = vmatprep.subr.bf16.mxu0 %v3656_v57  ;;  %1308 = vmatprep.subr.bf16.mxu1 %v3659_v56  ;;  %v4341_v57 = vunpack.c.h.bf16 %v3414_v38 }
 0x5e0   :  { %1268 = vmatpush1.bf16.msra.mxu0 %v3662_v55  ;;  %1309 = vmatpush1.bf16.msra.mxu1 %v3665_v42  ;;  %v4343_v42 = vld [vmem:[#allocation13_spill] sm:$0xff] }
 0x5e1   :  { %1269 = vmatprep.subr.bf16.mxu0 %v3668_v63  ;;  %1310 = vmatprep.subr.bf16.mxu1 %v3671_v41  ;;  %v4344_v63 = vunpack.c.l.bf16 %v4343_v42  ;;  %v4345_v41 = vld [vmem:[#allocation14_spill] sm:$0xff] }
 0x5e4   :  { %1270 = vmatpush1.bf16.msra.mxu0 %v3674_v19  ;;  %1311 = vmatpush1.bf16.msra.mxu1 %v3677_v20  ;;  %v4346_v19 = vunpack.c.l.bf16 %v4345_v41 }
 0x5e5   :  { %1271 = vmatprep.subr.bf16.mxu0 %v3680_v24  ;;  %1312 = vmatprep.subr.bf16.mxu1 %v3683_v25 }
 0x5e6   :  { %v1131_v20 = vsel %vm3353_vm2, %v4346_v19, %v4344_v63 }
 0x5e8   :  { %1272 = vmatpush1.bf16.msra.mxu0 %v3686_v26  ;;  %1313 = vmatpush1.bf16.msra.mxu1 %v3689_v28 }
 0x5e9   :  { %1273 = vmatprep.subr.bf16.mxu0 %v3692_v23  ;;  %1314 = vmatprep.subr.bf16.mxu1 %v3695_v29  ;;  %v4347_v29 = vunpack.c.h.bf16 %v4343_v42 }
 0x5ec   :  { %1274 = vmatpush1.bf16.msra.mxu0 %v3698_v31  ;;  %1315 = vmatpush1.bf16.msra.mxu1 %v3701_v33  ;;  %v4348_v31 = vunpack.c.h.bf16 %v4345_v41 }
 0x5ed   :  { %1275 = vmatprep.subr.bf16.mxu0 %v3704_v51  ;;  %1316 = vmatprep.subr.bf16.mxu1 %v3707_v27 }
 0x5ee   :  { %v1132_v33 = vsel %vm3362_vm3, %v4348_v31, %v4347_v29 }
 0x5f0   :  { %1276 = vmatpush1.bf16.msra.mxu0 %v3710_v3  ;;  %1317 = vmatpush1.bf16.msra.mxu1 %v3713_v54  ;;  %v4342_v54 = vunpack.c.h.bf16 %v4339_v59  ;;  %v1255_v59 = vunpack.c.h.bf16 %v1252_v47  ;;  %v2929_v47 = vld [vmem:[%s4272_s4 + $0xd8] sm:$0xff]  }
 0x5f1   :  { %1277 = vmatprep.subr.bf16.mxu0 %v3716_v46  ;;  %1318 = vmatprep.subr.bf16.mxu1 %v3719_v52 }
 0x5f2   :  { %v1130_v52 = vsel %vm3347_vm1, %v4342_v54, %v4341_v57  ;;  %v1250_v57 = vunpack.c.l.bf16 %v1247_v40 }
 0x5f4   :  { %1278 = vmatpush1.bf16.msra.mxu0 %v3722_v8  ;;  %1319 = vmatpush1.bf16.msra.mxu1 %v3725_v7 }
 0x697   :  { %v1168_v62 = vpop.f32.mrf.mxu0  ;;  %v1209_v50 = vpop.f32.mrf.mxu1 }
 0x698   :  { %v1216_v46 = vadd.f32 %v1168_v62, %v1129_v37  ;;  %v1218_v23 = vadd.f32 %v1209_v50, %v1131_v20  ;;  %v1253_v37 = vld [vmem:[#allocation5 + $0x8] sm:$0xff]  ;;  %v1258_v62 = vsel %vm150_vm0, %v1248_v48, %v1254_v1  ;;  %v1251_v20 = vunpack.c.h.bf16 %v1247_v40  ;;  %v2924_v48 = vld [vmem:[%s4272_s4 + $0x18] sm:$0xff]   ;;  %v2927_v1 = vld [vmem:[%s4272_s4 + $0x50] sm:$0xff]  }
 0x699   :  { %v1170_v8 = vpop.f32.mrf.mxu0  ;;  %v1211_v56 = vpop.f32.mrf.mxu1  ;;  %v1256_v54 = vunpack.c.l.bf16 %v1253_v37  ;;  %v2931_v40 = vld [vmem:[%s4272_s4 + $0x48] sm:$0xff]  }
 0x69a   :  { %v1220_v7 = vmul.f32 0.5, %v1216_v46  ;;  %v1217_v55 = vadd.f32 %v1170_v8, %v1130_v52  ;;  %v1219_v51 = vadd.f32 %v1211_v56, %v1132_v33  ;;  %v1259_v46 = vsel %vm3347_vm1, %v1249_v32, %v1255_v59  ;;  %v2930_v32 = vld [vmem:[%s4272_s4 + $0x98] sm:$0xff]   ;;  %v2928_v59 = vld [vmem:[%s4272_s4 + $0x10] sm:$0xff]  }
 0x69b   :  { %v1172_v24 = vpop.f32.mrf.mxu0  ;;  %v1213_v25 = vpop.f32.mrf.mxu1  ;;  %v1260_v63 = vsel %vm3353_vm2, %v1250_v57, %v1256_v54  ;;  %v2935_v57 = vld [vmem:[%s4272_s4 + $0x40] sm:$0xff]  }
 0x69c   :  { %3041 = vtanh.f32 %v1220_v7  ;;  %v1224_v38 = vmul.f32 0.5, %v1217_v55  ;;  %v1229_v27 = vmul.f32 0.5, %v1219_v51  ;;  %v1257_v24 = vunpack.c.h.bf16 %v1253_v37  ;;  %v2932_v37 = vld [vmem:[%s4272_s4 + $0x8] sm:$0xff]   ;;  %v2936_v54 = vld [vmem:[%s4272_s4] sm:$0xff]  }
 0x69d   :  { %v1173_v26 = vpop.f32.mrf.mxu0  ;;  %v1214_v28 = vpop.f32.mrf.mxu1 }
 0x69e   :  { %3043 = vtanh.f32 %v1224_v38  ;;  %v1261_v49 = vsel %vm3362_vm3, %v1251_v20, %v1257_v24 }
 0x69f   :  { %3045 = vtanh.f32 %v1218_v23 }
 0x6a0   :  { %3047 = vtanh.f32 %v1229_v27 }
 0x6a9   :  { %v3042_v3 = vpop.eup %3041 }
 0x6aa   :  { %v1222_v17 = vadd.f32 1.0, %v3042_v3 }
 0x6ab   :  { %v3044_v18 = vpop.eup %3043 }
 0x6ac   :  { %v1223_v2 = vmul.f32 0.5, %v1222_v17  ;;  %v1226_v4 = vadd.f32 1.0, %v3044_v18  ;;  %v3046_v39 = vpop.eup %3045 }
 0x6ad   :  { %v3048_v5 = vpop.eup %3047 }
 0x6ae   :  { %v1227_v13 = vmul.f32 0.5, %v1226_v4  ;;  %v1234_v11 = vmul.f32 %v3046_v39, %v1223_v2  ;;  %v1231_v6 = vadd.f32 1.0, %v3048_v5  ;;  %v2911_v5 = vld [vmem:[%s4272_s4 + $0x70] sm:$0xff]  }
 0x6b0   :  { %v1233_v21 = vmul.f32 %v1227_v13, %v3823_v35  ;;  %v1232_v15 = vmul.f32 0.5, %v1231_v6  ;;  %v2913_v6 = vld [vmem:[%s4272_s4 + $0xf8] sm:$0xff]  }
 0x6b1   :  { %2656 = vmatprep.subr.bf16.mxu1 %v2913_v6 }
 0x6b2   :  { %v3889_v12 = vadd.f32 %v1234_v11, %v1233_v21  ;;  %v2909_v11 = vld [vmem:[%s4272_s4 + $0x78] sm:$0xff]  }
 0x6b3   :  { %2616 = vmatprep.subr.bf16.mxu0 %v2909_v11 }
 0x6b4   :  { %3049 = vtanh.f32 %v3889_v12 }
 0x6c1   :  { %v3050_v22 = vpop.eup %3049 }
 0x6c2   :  { %v1237_v61 = vmul.f32 %v3050_v22, %v1232_v15  ;;  %v4352_v15 = vld [vmem:[#allocation16_spill] sm:$0xff]  ;;  %v2912_v22 = vld [vmem:[%s4272_s4 + $0x30] sm:$0xff]  }
 0x6c4   :  { %1241 = vrot.lane.b32.xlu1 %v1237_v61, %s3142_s3  ;;  %1239 = vst.msk [vmem:[#allocation2 + $0x30] sm:$0xff] %vm458_vm4, %v1237_v61  ;;  %v1262_v45 = vpack.c.bf16 %v1237_v61, %v1237_v61  ;;  %v2915_v61 = vld [vmem:[%s4272_s4 + $0x68] sm:$0xff]  }
 0x6c6   :  { %1296 = vmatmul.mubr.bf16.vlgmr.msra.gmra.mxu0 %v1262_v45  ;;  %1337 = vmatmul.mubr.bf16.vlgmr.msra.gmra.mxu1 %v1262_v45  ;;  %v2918_v45 = vld [vmem:[%s4272_s4 + $0xb0] sm:$0xff]  }
 0x6c8   :  { %854 = vrot.lane.b32.xlu1 %v4349_v44, %s3142_s3  ;;  %v2921_v44 = vld [vmem:[%s4272_s4 + $0xe8] sm:$0xff]  }
 0x6cc   :  { %592 = vrot.lane.b32.xlu1 %v4350_v9, %s3142_s3  ;;  %v2916_v9 = vld [vmem:[%s4272_s4 + $0x28] sm:$0xff]  }
 0x6d0   :  { %461 = vrot.lane.b32.xlu1 %v4351_v10, %s3142_s3  ;;  %v2919_v10 = vld [vmem:[%s4272_s4 + $0x60] sm:$0xff]  }
 0x736   :  { %v1242_v16 = vpop.permute.xlu1 %1241 }
 0x737   :  { %1245 = vst.msk [vmem:[#allocation3 + $0x8] sm:$0xff] %vm458_vm4, %v1242_v16  ;;  %v2922_v16 = vld [vmem:[%s4272_s4 + $0xa8] sm:$0xff]  }
 0x73a   :  { %v855_v58 = vpop.permute.xlu1 %854 }
 0x73b   :  { %858 = vst.msk [vmem:[#allocation3 + $0x20] sm:$0xff] %vm458_vm4, %v855_v58  ;;  %v2925_v58 = vld [vmem:[%s4272_s4 + $0xe0] sm:$0xff]  }
 0x73e   :  { %v593_v35 = vpop.permute.xlu1 %592  ;;  %v1383_v20 = vld [vmem:[#allocation3 + $0x8] sm:$0xff] }
 0x73f   :  { %596 = vst.msk [vmem:[#allocation3 + $0x30] sm:$0xff] %vm458_vm4, %v593_v35  ;;  %v2920_v35 = vld [vmem:[%s4272_s4 + $0x20] sm:$0xff]  }
 0x742   :  { %v462_v60 = vpop.permute.xlu1 %461 }
 0x743   :  { %465 = vst.msk [vmem:[#allocation3 + $0x38] sm:$0xff] %vm458_vm4, %v462_v60  ;;  %v2923_v60 = vld [vmem:[%s4272_s4 + $0x58] sm:$0xff]  }
 0x786   :  { %v1297_v50 = vpop.f32.mrf.mxu0  ;;  %v1338_v52 = vpop.f32.mrf.mxu1 }
 0x787   :  { %v1345_v8 = vadd.f32 %v1297_v50, %v1258_v62  ;;  %v1347_v26 = vadd.f32 %v1338_v52, %v1260_v63  ;;  %v2933_v62 = vld [vmem:[%s4272_s4 + $0xd0] sm:$0xff]   ;;  %v2937_v52 = vld [vmem:[%s4272_s4 + $0xc8] sm:$0xff]  }
 0x788   :  { %v1299_v56 = vpop.f32.mrf.mxu0  ;;  %v1340_v7 = vpop.f32.mrf.mxu1  ;;  %v2934_v50 = vld [vmem:[%s4272_s4 + $0x90] sm:$0xff]  }
 0x789   :  { %v1349_v55 = vmul.f32 0.5, %v1345_v8  ;;  %v1346_v42 = vadd.f32 %v1299_v56, %v1259_v46  ;;  %v1348_v28 = vadd.f32 %v1340_v7, %v1261_v49  ;;  %v2938_v8 = vld [vmem:[%s4272_s4 + $0x88] sm:$0xff]   ;;  %v2939_v56 = vld [vmem:[%s4272_s4 + $0x138] sm:$0xff]  }
 0x78a   :  { %v1301_v41 = vpop.f32.mrf.mxu0  ;;  %v1342_v19 = vpop.f32.mrf.mxu1 }
 0x78b   :  { %3051 = vtanh.f32 %v1349_v55  ;;  %v1353_v36 = vmul.f32 0.5, %v1346_v42  ;;  %v1358_v23 = vmul.f32 0.5, %v1348_v28  ;;  %v2940_v55 = vld [vmem:[%s4272_s4 + $0xc0] sm:$0xff]   ;;  %v2943_v19 = vld [vmem:[%s4274_s6 + $0x78] sm:$0xff]  }
 0x78c   :  { %v1302_v25 = vpop.f32.mrf.mxu0  ;;  %v1343_v38 = vpop.f32.mrf.mxu1  ;;  %v2941_v42 = vld [vmem:[%s4272_s4 + $0x80] sm:$0xff]  }
 0x78d   :  { %3053 = vtanh.f32 %v1353_v36 }
 0x78e   :  { %3055 = vtanh.f32 %v1347_v26  ;;  %v1386_v26 = vld [vmem:[#allocation3 + $0x20] sm:$0xff] }
 0x78f   :  { %3057 = vtanh.f32 %v1358_v23  ;;  %v1388_v23 = vld [vmem:[#allocation3 + $0x30] sm:$0xff] }
 0x798   :  { %v3052_v29 = vpop.eup %3051 }
 0x799   :  { %v1351_v31 = vadd.f32 1.0, %v3052_v29 }
 0x79a   :  { %v3054_v53 = vpop.eup %3053 }
 0x79b   :  { %v1352_v33 = vmul.f32 0.5, %v1351_v31  ;;  %v1355_v51 = vadd.f32 1.0, %v3054_v53  ;;  %v3056_v3 = vpop.eup %3055  ;;  %v1389_v31 = vld [vmem:[#allocation3 + $0x38] sm:$0xff]  ;;  %v1374_v53 = vld [vmem:[#allocation2] sm:$0xff] }
 0x79c   :  { %v3058_v4 = vpop.eup %3057 }
 0x79d   :  { %v1356_v27 = vmul.f32 0.5, %v1355_v51  ;;  %v1363_v18 = vmul.f32 %v3056_v3, %v1352_v33  ;;  %v1360_v13 = vadd.f32 1.0, %v3058_v4 }
 0x79f   :  { %v1362_v17 = vmul.f32 %v1356_v27, %v3889_v12  ;;  %v1361_v43 = vmul.f32 0.5, %v1360_v13  ;;  %v2910_v12 = vld [vmem:[%s4272_s4 + $0x38] sm:$0xff]  }
 0x7a0   :  { %2617 = vmatpush3.bf16.msra.mxu0 %v2910_v12 }
 0x7a1   :  { %v1364_v2 = vadd.f32 %v1363_v18, %v1362_v17  ;;  %2618 = vmatprep.subr.bf16.mxu0 %v2911_v5  ;;  %v4035_v17 = vcombine.low %v4329_v30, %v4329_v30 }
 0x7a3   :  { %3059 = vtanh.f32 %v1364_v2 }
 0x7a4   :  { %2619 = vmatpush3.bf16.msra.mxu0 %v2912_v22 }
 0x7a5   :  { %2620 = vmatprep.subr.bf16.mxu0 %v2915_v61  ;;  %v1378_v61 = vld [vmem:[#allocation2 + $0x20] sm:$0xff] }
 0x7a8   :  { %2621 = vmatpush3.bf16.msra.mxu0 %v2916_v9  ;;  %v2944_v9 = vld [vmem:[%s4274_s6 + $0x38] sm:$0xff]  }
 0x7a9   :  { %2622 = vmatprep.subr.bf16.mxu0 %v2919_v10  ;;  %v2945_v10 = vld [vmem:[%s4272_s4 + $0x128] sm:$0xff]  }
 0x7ac   :  { %2623 = vmatpush3.bf16.msra.mxu0 %v2920_v35  ;;  %v2946_v35 = vld [vmem:[%s4274_s6 + $0x70] sm:$0xff]  }
 0x7ad   :  { %2624 = vmatprep.subr.bf16.mxu0 %v2923_v60 }
 0x7b0   :  { %v3060_v39 = vpop.eup %3059  ;;  %2625 = vmatpush3.bf16.msra.mxu0 %v2924_v48 }
 0x7b1   :  { %v1366_v21 = vmul.f32 %v3060_v39, %v1361_v43  ;;  %2626 = vmatprep.subr.bf16.mxu0 %v2927_v1  ;;  %v2942_v43 = vld [vmem:[%s4272_s4 + $0x130] sm:$0xff]   ;;  %v1375_v39 = vld [vmem:[#allocation2 + $0x8] sm:$0xff] }
 0x7b3   :  { %1370 = vrot.lane.b32.xlu0 %v1366_v21, %s3142_s3  ;;  %1368 = vst.msk [vmem:[#allocation2 + $0x38] sm:$0xff] %vm458_vm4, %v1366_v21  ;;  %v1376_v21 = vld [vmem:[#allocation2 + $0x10] sm:$0xff] }
 0x7b4   :  { %2627 = vmatpush3.bf16.msra.mxu0 %v2928_v59  ;;  %v1379_v59 = vld [vmem:[#allocation2 + $0x28] sm:$0xff] }
 0x7b5   :  { %2628 = vmatprep.subr.bf16.mxu0 %v2931_v40  ;;  %v1380_v40 = vld [vmem:[#allocation2 + $0x30] sm:$0xff] }
 0x7b7   :  { %1112 = vrot.lane.b32.xlu0 %v3826_v0, %s3142_s3  ;;  %v2917_v0 = vld [vmem:[%s4272_s4 + $0xf0] sm:$0xff]  }
 0x7b8   :  { %2629 = vmatpush3.bf16.msra.mxu0 %v2932_v37 }
 0x7b9   :  { %2630 = vmatprep.subr.bf16.mxu0 %v2935_v57 }
 0x7bb   :  { %983 = vrot.lane.b32.xlu0 %v3758_v14, %s3142_s3  ;;  %v2914_v14 = vld [vmem:[%s4272_s4 + $0xb8] sm:$0xff]  }
 0x7bc   :  { %2657 = vmatpush3.bf16.msra.mxu1 %v2914_v14  ;;  %2631 = vmatpush3.bf16.msra.mxu0 %v2936_v54 }
 0x7bd   :  { %2658 = vmatprep.subr.bf16.mxu1 %v2917_v0  ;;  %2800 = vmatprep.subr.bf16.mxu0 %v2939_v56  ;;  %v1377_v0 = vld [vmem:[#allocation2 + $0x18] sm:$0xff] }
 0x7bf   :  { %723 = vrot.lane.b32.xlu0 %v4352_v15, %s3142_s3 }
 0x7c0   :  { %2659 = vmatpush3.bf16.msra.mxu1 %v2918_v45 }
 0x7c1   :  { %2660 = vmatprep.subr.bf16.mxu1 %v2921_v44 }
 0x7c4   :  { %2661 = vmatpush3.bf16.msra.mxu1 %v2922_v16 }
 0x7c5   :  { %2662 = vmatprep.subr.bf16.mxu1 %v2925_v58 }
 0x7c8   :  { %2663 = vmatpush3.bf16.msra.mxu1 %v2926_v34 }
 0x7c9   :  { %2664 = vmatprep.subr.bf16.mxu1 %v2929_v47 }
 0x7cc   :  { %2665 = vmatpush3.bf16.msra.mxu1 %v2930_v32  ;;  %v2948_v32 = vld [vmem:[%s4272_s4 + $0x120] sm:$0xff]  }
 0x7cd   :  { %2666 = vmatprep.subr.bf16.mxu1 %v2933_v62 }
 0x7d0   :  { %2667 = vmatpush3.bf16.msra.mxu1 %v2934_v50  ;;  %v2947_v50 = vld [vmem:[%s4274_s6 + $0x30] sm:$0xff]  }
 0x7d1   :  { %2668 = vmatprep.subr.bf16.mxu1 %v2937_v52  ;;  %v2949_v52 = vld [vmem:[%s4274_s6 + $0x68] sm:$0xff]  }
 0x7d4   :  { %2669 = vmatpush3.bf16.msra.mxu1 %v2938_v8 }
 0x7d5   :  { %2670 = vmatprep.subr.bf16.mxu1 %v2940_v55  ;;  %v2951_v55 = vld [vmem:[%s4272_s4 + $0x118] sm:$0xff]  }
 0x7d8   :  { %2671 = vmatpush3.bf16.msra.mxu1 %v2941_v42  ;;  %v2950_v42 = vld [vmem:[%s4274_s6 + $0x28] sm:$0xff]  }
 0x7d9   :  { %2708 = vmatprep.subr.bf16.mxu1 %v2943_v19 }
 0x825   :  { %v1371_v46 = vpop.permute.xlu0 %1370 }
 0x826   :  { %1373 = vst.msk [vmem:[#allocation3] sm:$0xff] %vm458_vm4, %v1371_v46 }
 0x829   :  { %v1113_v7 = vpop.permute.xlu0 %1112 }
 0x82a   :  { %1116 = vst.msk [vmem:[#allocation3 + $0x10] sm:$0xff] %vm458_vm4, %v1113_v7 }
 0x82d   :  { %v984_v63 = vpop.permute.xlu0 %983  ;;  %v1382_v41 = vld [vmem:[#allocation3] sm:$0xff] }
 0x82e   :  { %987 = vst.msk [vmem:[#allocation3 + $0x18] sm:$0xff] %vm458_vm4, %v984_v63  ;;  %1398 = vrot.lane.b32.xlu0 %v1382_v41, %s3142_s3  ;;  %v2952_v41 = vld [vmem:[%s4274_s6 + $0x60] sm:$0xff]  }
 0x831   :  { %v724_v36 = vpop.permute.xlu0 %723  ;;  %v1384_v24 = vld [vmem:[#allocation3 + $0x10] sm:$0xff] }
 0x832   :  { %727 = vst.msk [vmem:[#allocation3 + $0x28] sm:$0xff] %vm458_vm4, %v724_v36  ;;  %v2846_v25 = vpack.i.bf16 %v1384_v24, %v1383_v20  ;;  %v2954_v20 = vld [vmem:[%s4272_s4 + $0x110] sm:$0xff]   ;;  %v2953_v24 = vld [vmem:[%s4274_s6 + $0x20] sm:$0xff]  }
 0x834   :  { %2847 = vrot.lane.b32.xlu1 %v2846_v25, %s3142_s3  ;;  %v2955_v25 = vld [vmem:[%s4274_s6 + $0x58] sm:$0xff]  }
 0x835   :  { %v1385_v38 = vld [vmem:[#allocation3 + $0x18] sm:$0xff] }
 0x836   :  { %v2851_v49 = vpack.i.bf16 %v1386_v26, %v1385_v38  ;;  %v2957_v26 = vld [vmem:[%s4272_s4 + $0x108] sm:$0xff]  }
 0x838   :  { %2852 = vrot.lane.b32.xlu0 %v2851_v49, %s3142_s3  ;;  %v2956_v49 = vld [vmem:[%s4274_s6 + $0x18] sm:$0xff]  }
 0x839   :  { %v1387_v28 = vld [vmem:[#allocation3 + $0x28] sm:$0xff] }
 0x83a   :  { %v2856_v29 = vpack.i.bf16 %v1388_v23, %v1387_v28  ;;  %v2958_v23 = vld [vmem:[%s4274_s6 + $0x50] sm:$0xff]  }
 0x83c   :  { %1412 = vrot.lane.b32.xlu0 %v1389_v31, %s3142_s3  ;;  %2857 = vrot.lane.b32.xlu1 %v2856_v29, %s3142_s3  ;;  %v2960_v31 = vld [vmem:[%s4272_s4 + $0x100] sm:$0xff]  }
 0x8a0   :  { %v1399_v33 = vpop.permute.xlu0 %1398 }
 0x8a1   :  { %v1422_v51 = vsel %vm458_vm4, %v1374_v53, %v1399_v33  ;;  %v2959_v53 = vld [vmem:[%s4274_s6 + $0x10] sm:$0xff]   ;;  %v2963_v33 = vld [vmem:[%s4274_s6 + $0xf8] sm:$0xff]  }
 0x8a2   :  { %v1430_v27 = vmax.f32 %v1422_v51, 0.0  ;;  %v2962_v51 = vld [vmem:[%s4274_s6 + $0x8] sm:$0xff]  }
 0x8a4   :  { %v1438_v3 = vpack.c.bf16 %v1430_v27, %v1430_v27 }
 0x8a6   :  { %v2848_v18 = vpop.permute.xlu1 %2847  ;;  %v4038_v2 = vcombine.low %v4329_v30, %v1438_v3  ;;  %v2965_v3 = vld [vmem:[%s4274_s6 + $0x40] sm:$0xff]  }
 0x8a7   :  { %v2850_v4 = vunpack.i.h.bf16 %v2848_v18  ;;  %v2849_v13 = vunpack.i.l.bf16 %v2848_v18  ;;  %v2964_v18 = vld [vmem:[%s4274_s6 + $0xb8] sm:$0xff]  }
 0x8a8   :  { %1843 = vmatprep.mubr.bf16.mxu0 %v4038_v2 }
 0x8a9   :  { %v1424_v11 = vsel %vm458_vm4, %v1376_v21, %v2850_v4  ;;  %v1423_v12 = vsel %vm458_vm4, %v1375_v39, %v2849_v13  ;;  %1844 = vmatmul.mubr.bf16.vlgmr.msra.gmra.mxu0 %v4035_v17  ;;  %v2967_v4 = vld [vmem:[%s4274_s6 + $0xf0] sm:$0xff]   ;;  %v2966_v13 = vld [vmem:[%s4274_s6] sm:$0xff]   ;;  %v2969_v39 = vld [vmem:[%s4274_s6 + $0xe8] sm:$0xff]  }
 0x8aa   :  { %v1432_v5 = vmax.f32 %v1424_v11, 0.0  ;;  %v1431_v6 = vmax.f32 %v1423_v12, 0.0  ;;  %2801 = vmatpush3.bf16.msra.mxu0 %v2939_v56  ;;  %v2853_v14 = vpop.permute.xlu0 %2852  ;;  %v1381_v56 = vld [vmem:[#allocation2 + $0x38] sm:$0xff]  ;;  %v2971_v21 = vld [vmem:[%s4274_s6 + $0xe0] sm:$0xff]  }
 0x8ab   :  { %v2855_v15 = vunpack.i.h.bf16 %v2853_v14  ;;  %v2854_v22 = vunpack.i.l.bf16 %v2853_v14  ;;  %2802 = vmatprep.subr.bf16.mxu0 %v2942_v43  ;;  %v2972_v11 = vld [vmem:[%s4274_s6 + $0xa0] sm:$0xff]   ;;  %v2973_v12 = vld [vmem:[%s4274_s6 + $0xd8] sm:$0xff]   ;;  %v2976_v14 = vld [vmem:[%s4274_s6 + $0x90] sm:$0xff]  }
 0x8ac   :  { %v4047_v45 = vpack.c.bf16 %v1432_v5, %v1431_v6  ;;  %v4049_v44 = vpack.c.bf16 %v1431_v6, %v1430_v27  ;;  %v2975_v6 = vld [vmem:[%s4274_s6 + $0xd0] sm:$0xff]  }
 0x8ad   :  { %v1426_v16 = vsel %vm458_vm4, %v1378_v61, %v2855_v15  ;;  %v1425_v58 = vsel %vm458_vm4, %v1377_v0, %v2854_v22  ;;  %v2977_v0 = vld [vmem:[%s4274_s6 + $0xc8] sm:$0xff]   ;;  %v2979_v22 = vld [vmem:[%s4274_s6 + $0xc0] sm:$0xff]  }
 0x8ae   :  { %v1434_v60 = vmax.f32 %v1426_v16, 0.0  ;;  %v1433_v34 = vmax.f32 %v1425_v58, 0.0  ;;  %2803 = vmatpush3.bf16.msra.mxu0 %v2942_v43  ;;  %1908 = vmatprep.mubr.bf16.mxu1 %v4047_v45  ;;  %v2858_v47 = vpop.permute.xlu1 %2857  ;;  %v1413_v37 = vpop.permute.xlu0 %1412  ;;  %v2968_v43 = vld [vmem:[%s4274_s6 + $0xb0] sm:$0xff]   ;;  %v2978_v15 = vld [vmem:[%s4274_s6 + $0x88] sm:$0xff]   ;;  %v2980_v61 = vld [vmem:[%s4274_s6 + $0x80] sm:$0xff]  }
 0x8af   :  { %v2860_v48 = vunpack.i.h.bf16 %v2858_v47  ;;  %v2859_v1 = vunpack.i.l.bf16 %v2858_v47  ;;  %1851 = vmatprep.mubr.bf16.mxu0 %v4047_v45  ;;  %1909 = vmatmul.mubr.bf16.vlgmr.msra.gmra.mxu1 %v4049_v44  ;;  %v1429_v7 = vsel %vm458_vm4, %v1381_v56, %v1413_v37  ;;  %v4229_v58 = vld [vmem:[%s4273_s5] ss:$0 sm:$0xff] }
 0x8b0   :  { %2709 = vmatpush3.bf16.msra.mxu1 %v2944_v9  ;;  %2804 = vmatprep.subr.bf16.mxu0 %v2945_v10  ;;  %v4068_v62 = vpack.c.bf16 %v1434_v60, %v1433_v34  ;;  %v4090_v63 = vpack.c.bf16 %v1433_v34, %v1432_v5  ;;  %v1437_v19 = vmax.f32 %v1429_v7, 0.0  ;;  %v2974_v5 = vld [vmem:[%s4274_s6 + $0x98] sm:$0xff]  }
 0x8b1   :  { %v1428_v57 = vsel %vm458_vm4, %v1380_v40, %v2860_v48  ;;  %v1427_v54 = vsel %vm458_vm4, %v1379_v59, %v2859_v1  ;;  %1852 = vmatmul.mubr.bf16.gmra.mxu0 %v4049_v44  ;;  %2710 = vmatprep.subr.bf16.mxu1 %v2946_v35 }
 0x8b2   :  { %v4079_v46 = vmax.f32 %v1428_v57, 0.0  ;;  %v1435_v8 = vmax.f32 %v1427_v54, 0.0  ;;  %2805 = vmatpush3.bf16.msra.mxu0 %v2945_v10  ;;  %1859 = vmatprep.mubr.bf16.mxu0 %v4068_v62  ;;  %v4110_v38 = vpack.c.bf16 %v1437_v19, %v1437_v19 }
 0x8b3   :  { %1916 = vmatprep.mubr.bf16.mxu1 %v4068_v62  ;;  %2806 = vmatprep.subr.bf16.mxu0 %v2948_v32 }
 0x8b4   :  { %2711 = vmatpush3.bf16.msra.mxu1 %v2947_v50  ;;  %v4096_v36 = vpack.c.bf16 %v4079_v46, %v1435_v8  ;;  %v4119_v28 = vpack.c.bf16 %v1435_v8, %v1434_v60  ;;  %v4126_v29 = vcombine.low %v4110_v38, %v4329_v30  ;;  %v2961_v30 = vld [vmem:[%s4274_s6 + $0x48] sm:$0xff]   ;;  %v4148_v27 = vpack.c.bf16 %v1437_v19, %v4079_v46 }
 0x8b5   :  { %2712 = vmatprep.subr.bf16.mxu1 %v2949_v52 }
 0x8b6   :  { %2807 = vmatpush3.bf16.msra.mxu0 %v2948_v32 }
 0x8b7   :  { %1917 = vmatmul.mubr.bf16.gmra.mxu1 %v4090_v63  ;;  %2808 = vmatprep.subr.bf16.mxu0 %v2951_v55 }
 0x8b8   :  { %2713 = vmatpush3.bf16.msra.mxu1 %v2950_v42  ;;  %1924 = vmatprep.mubr.bf16.mxu1 %v4096_v36 }
 0x8b9   :  { %1860 = vmatmul.mubr.bf16.gmra.mxu0 %v4090_v63  ;;  %2714 = vmatprep.subr.bf16.mxu1 %v2952_v41 }
 0x8ba   :  { %2809 = vmatpush3.bf16.msra.mxu0 %v2951_v55  ;;  %1867 = vmatprep.mubr.bf16.mxu0 %v4096_v36 }
 0x8bb   :  { %2810 = vmatprep.subr.bf16.mxu0 %v2954_v20 }
 0x8bc   :  { %2715 = vmatpush3.bf16.msra.mxu1 %v2953_v24 }
 0x8bd   :  { %2716 = vmatprep.subr.bf16.mxu1 %v2955_v25 }
 0x8be   :  { %2811 = vmatpush3.bf16.msra.mxu0 %v2954_v20 }
 0x8bf   :  { %1925 = vmatmul.mubr.bf16.gmra.mxu1 %v4119_v28  ;;  %2812 = vmatprep.subr.bf16.mxu0 %v2957_v26 }
 0x8c0   :  { %2717 = vmatpush3.bf16.msra.mxu1 %v2956_v49  ;;  %1932 = vmatprep.mubr.bf16.mxu1 %v4126_v29 }
 0x8c1   :  { %1868 = vmatmul.mubr.bf16.gmra.mxu0 %v4119_v28  ;;  %2718 = vmatprep.subr.bf16.mxu1 %v2958_v23 }
 0x8c2   :  { %2813 = vmatpush3.bf16.msra.mxu0 %v2957_v26  ;;  %2816 = vmatprep.mubr.bf16.mxu0 %v4090_v63 }
 0x8c3   :  { %2814 = vmatprep.subr.bf16.mxu0 %v2960_v31 }
 0x8c4   :  { %2719 = vmatpush3.bf16.msra.mxu1 %v2959_v53 }
 0x8c5   :  { %2720 = vmatprep.subr.bf16.mxu1 %v2961_v30 }
 0x8c6   :  { %2815 = vmatpush3.bf16.msra.mxu0 %v2960_v31 }
 0x8c7   :  { %1933 = vmatmul.mubr.bf16.gmra.mxu1 %v4148_v27  ;;  %2754 = vmatprep.subr.bf16.mxu0 %v2963_v33 }
 0x8c8   :  { %2721 = vmatpush3.bf16.msra.mxu1 %v2962_v51  ;;  %2320 = vmatprep.mubr.bf16.mxu1 %v4038_v2  ;;  %v2970_v2 = vld [vmem:[%s4274_s6 + $0xa8] sm:$0xff]  }
 0x8c9   :  { %2817 = vmatmul.mubr.bf16.vlgmr.msra.gmra.mxu0 %v4119_v28  ;;  %2722 = vmatprep.subr.bf16.mxu1 %v2965_v3 }
 0x8ca   :  { %2755 = vmatpush3.bf16.msra.mxu0 %v2964_v18  ;;  %2820 = vmatprep.mubr.bf16.mxu0 %v4148_v27 }
 0x8cb   :  { %2756 = vmatprep.subr.bf16.mxu0 %v2967_v4 }
 0x8cc   :  { %2723 = vmatpush3.bf16.msra.mxu1 %v2966_v13 }
 0x8cd   :  { %2824 = vmatprep.subr.bf16.mxu1 %v2963_v33 }
 0x8ce   :  { %2757 = vmatpush3.bf16.msra.mxu0 %v2968_v43 }
 0x8cf   :  { %2321 = vmatmul.mubr.bf16.vlgmr.msra.gmra.mxu1 %v4035_v17  ;;  %2758 = vmatprep.subr.bf16.mxu0 %v2969_v39 }
 0x8d0   :  { %2832 = vmatpush3.bf16.msra.mxu1 %v2964_v18  ;;  %2328 = vmatprep.mubr.bf16.mxu1 %v4047_v45 }
 0x8d1   :  { %2821 = vmatmul.mubr.bf16.gmra.mxu0 %v4035_v17  ;;  %2825 = vmatprep.subr.bf16.mxu1 %v2967_v4 }
 0x8d2   :  { %2759 = vmatpush3.bf16.msra.mxu0 %v2970_v2  ;;  %2392 = vmatprep.mubr.bf16.mxu0 %v4047_v45  ;;  %v2614_v45 = vpack.c.bf16 %v4079_v46, %v4079_v46 }
 0x8d3   :  { %2760 = vmatprep.subr.bf16.mxu0 %v2971_v21 }
 0x8d4   :  { %2833 = vmatpush3.bf16.msra.mxu1 %v2968_v43 }
 0x8d5   :  { %2826 = vmatprep.subr.bf16.mxu1 %v2969_v39 }
 0x8d6   :  { %2761 = vmatpush3.bf16.msra.mxu0 %v2972_v11 }
 0x8d7   :  { %2329 = vmatmul.mubr.bf16.gmra.mxu1 %v4049_v44  ;;  %2762 = vmatprep.subr.bf16.mxu0 %v2973_v12 }
 0x8d8   :  { %2336 = vmatprep.mubr.bf16.mxu1 %v4068_v62  ;;  %2834 = vmatpush3.bf16.msra.mxu1 %v2970_v2 }
 0x8d9   :  { %2827 = vmatprep.subr.bf16.mxu1 %v2971_v21 }
 0x8da   :  { %2763 = vmatpush3.bf16.msra.mxu0 %v2974_v5 }
 0x8db   :  { %2764 = vmatprep.subr.bf16.mxu0 %v2975_v6 }
 0x8dc   :  { %2835 = vmatpush3.bf16.msra.mxu1 %v2972_v11 }
 0x8dd   :  { %2828 = vmatprep.subr.bf16.mxu1 %v2973_v12 }
 0x8de   :  { %2765 = vmatpush3.bf16.msra.mxu0 %v2976_v14 }
 0x8df   :  { %2337 = vmatmul.mubr.bf16.gmra.mxu1 %v4090_v63  ;;  %2766 = vmatprep.subr.bf16.mxu0 %v2977_v0 }
 0x8e0   :  { %2344 = vmatprep.mubr.bf16.mxu1 %v4096_v36  ;;  %2836 = vmatpush3.bf16.msra.mxu1 %v2974_v5 }
 0x8e1   :  { %2829 = vmatprep.subr.bf16.mxu1 %v2975_v6 }
 0x8e2   :  { %2767 = vmatpush3.bf16.msra.mxu0 %v2978_v15 }
 0x8e3   :  { %2768 = vmatprep.subr.bf16.mxu0 %v2979_v22 }
 0x8e4   :  { %2837 = vmatpush3.bf16.msra.mxu1 %v2976_v14 }
 0x8e5   :  { %2830 = vmatprep.subr.bf16.mxu1 %v2977_v0 }
 0x8e6   :  { %2769 = vmatpush3.bf16.msra.mxu0 %v2980_v61 }
 0x8e7   :  { %2345 = vmatmul.mubr.bf16.gmra.mxu1 %v4119_v28 }
 0x8e8   :  { %2352 = vmatprep.mubr.bf16.mxu1 %v4110_v38  ;;  %2838 = vmatpush3.bf16.msra.mxu1 %v2978_v15 }
 0x8e9   :  { %2393 = vmatmul.mubr.bf16.vlgmr.msra.gmra.mxu0 %v4049_v44  ;;  %2831 = vmatprep.subr.bf16.mxu1 %v2979_v22 }
 0x8ea   :  { %2400 = vmatprep.mubr.bf16.mxu0 %v4068_v62 }
 0x8ec   :  { %2839 = vmatpush3.bf16.msra.mxu1 %v2980_v61 }
 0x8ef   :  { %2353 = vmatmul.mubr.bf16.gmra.mxu1 %v2614_v45 }
 0x8f0   :  { %2416 = vmatprep.mubr.bf16.mxu1 %v4126_v29 }
 0x8f1   :  { %2401 = vmatmul.mubr.bf16.gmra.mxu0 %v4090_v63 }
 0x8f2   :  { %2408 = vmatprep.mubr.bf16.mxu0 %v4096_v36 }
 0x8f7   :  { %2417 = vmatmul.mubr.bf16.vlgmr.msra.gmra.mxu1 %v4148_v27 }
 0x8f8   :  { %2424 = vmatprep.mubr.bf16.mxu1 %v4035_v17 }
 0x8f9   :  { %2409 = vmatmul.mubr.bf16.gmra.mxu0 %v4119_v28 }
 0x8ff   :  { %2425 = vmatmul.mubr.bf16.gmra.mxu1 %v4035_v17 }
 0x969   :  { %v2632_v44 = vpop.f32.mrf.mxu0 }
 0x96b   :  { %v2633_v9 = vpop.f32.mrf.mxu0 }
 0x96c   :  { %v2634_v10 = vadd.f32 %v2633_v9, %v2632_v44 }
 0x96d   :  { %v2635_v16 = vpop.f32.mrf.mxu0 }
 0x96e   :  { %v1846_v48 = vadd.f32 %v2634_v10, %v4229_v58 }
 0x96f   :  { %v2636_v35 = vpop.f32.mrf.mxu0  ;;  %v2672_v60 = vpop.f32.mrf.mxu1 }
 0x970   :  { %v2637_v1 = vadd.f32 %v2636_v35, %v2635_v16 }
 0x971   :  { %v2638_v34 = vpop.f32.mrf.mxu0  ;;  %v2673_v47 = vpop.f32.mrf.mxu1 }
 0x972   :  { %v2674_v32 = vadd.f32 %v2673_v47, %v2672_v60  ;;  %v1849_v50 = vadd.f32 %v2637_v1, %v4229_v58 }
 0x973   :  { %v2639_v59 = vpop.f32.mrf.mxu0  ;;  %v2675_v40 = vpop.f32.mrf.mxu1 }
 0x974   :  { %v1911_v17 = vadd.f32 %v2674_v32, %v1846_v48  ;;  %v2640_v51 = vadd.f32 %v2639_v59, %v2638_v34 }
 0x975   :  { %v2641_v37 = vpop.f32.mrf.mxu0  ;;  %v2676_v62 = vpop.f32.mrf.mxu1 }
 0x976   :  { %v2677_v57 = vadd.f32 %v2676_v62, %v2675_v40  ;;  %v1854_v11 = vadd.f32 %v2640_v51, %v4229_v58 }
 0x977   :  { %v2642_v54 = vpop.f32.mrf.mxu0  ;;  %v2678_v52 = vpop.f32.mrf.mxu1 }
 0x978   :  { %v1914_v46 = vadd.f32 %v2677_v57, %v1849_v50  ;;  %v2643_v18 = vadd.f32 %v2642_v54, %v2641_v37 }
 0x979   :  { %v2644_v8 = vpop.f32.mrf.mxu0  ;;  %v2679_v56 = vpop.f32.mrf.mxu1 }
 0x97a   :  { %v2680_v7 = vadd.f32 %v2679_v56, %v2678_v52  ;;  %v1857_v14 = vadd.f32 %v2643_v18, %v4229_v58 }
 0x97b   :  { %v2645_v55 = vpop.f32.mrf.mxu0  ;;  %v2681_v42 = vpop.f32.mrf.mxu1 }
 0x97c   :  { %v2646_v4 = vadd.f32 %v2645_v55, %v2644_v8  ;;  %v1919_v45 = vadd.f32 %v2680_v7, %v1854_v11 }
 0x97d   :  { %v2647_v63 = vpop.f32.mrf.mxu0  ;;  %v2682_v41 = vpop.f32.mrf.mxu1 }
 0x97e   :  { %v2683_v19 = vadd.f32 %v2682_v41, %v2681_v42  ;;  %v1862_v0 = vadd.f32 %v2646_v4, %v4229_v58 }
 0x97f   :  { %v2648_v36 = vpop.f32.mrf.mxu0  ;;  %v2684_v20 = vpop.f32.mrf.mxu1 }
 0x980   :  { %v2649_v12 = vadd.f32 %v2648_v36, %v2647_v63  ;;  %v1922_v35 = vadd.f32 %v2683_v19, %v1857_v14 }
 0x981   :  { %v2650_v24 = vpop.f32.mrf.mxu0  ;;  %v2685_v25 = vpop.f32.mrf.mxu1 }
 0x982   :  { %v2686_v38 = vadd.f32 %v2685_v25, %v2684_v20  ;;  %v1865_v47 = vadd.f32 %v2649_v12, %v4229_v58 }
 0x983   :  { %v2651_v26 = vpop.f32.mrf.mxu0  ;;  %v2687_v49 = vpop.f32.mrf.mxu1 }
 0x984   :  { %v2652_v33 = vadd.f32 %v2651_v26, %v2650_v24  ;;  %v1927_v34 = vadd.f32 %v2686_v38, %v1862_v0 }
 0x985   :  { %v2653_v28 = vpop.f32.mrf.mxu0  ;;  %v2688_v23 = vpop.f32.mrf.mxu1 }
 0x986   :  { %v1870_v2 = vadd.f32 %v2652_v33, %v4229_v58  ;;  %v2689_v61 = vadd.f32 %v2688_v23, %v2687_v49 }
 0x987   :  { %v2654_v29 = vpop.f32.mrf.mxu0  ;;  %v2690_v31 = vpop.f32.mrf.mxu1 }
 0x988   :  { %v2655_v21 = vadd.f32 %v2654_v29, %v2653_v28  ;;  %v1930_v54 = vadd.f32 %v2689_v61, %v1865_v47 }
 0x989   :  { %v2691_v53 = vpop.f32.mrf.mxu1  ;;  %v2818_v30 = vpop.f32.mrf.mxu0 }
 0x98a   :  { %v2692_v13 = vadd.f32 %v2691_v53, %v2690_v31  ;;  %v1873_v16 = vadd.f32 %v2655_v21, %v4229_v58  ;;  %v1984_v48 = vadd.f32 %v2818_v30, %v1919_v45 }
 0x98b   :  { %v2693_v27 = vpop.f32.mrf.mxu1  ;;  %v1975_v3 = vpop.f32.mrf.mxu0 }
 0x98c   :  { %v1935_v22 = vadd.f32 %v2692_v13, %v1870_v2  ;;  %v1976_v44 = vadd.f32 %v1975_v3, %v1911_v17  ;;  %v2008_v7 = vmax.f32 %v1984_v48, 0.0 }
 0x98d   :  { %v2694_v43 = vpop.f32.mrf.mxu1  ;;  %v2819_v39 = vpop.f32.mrf.mxu0 }
 0x98e   :  { %v2695_v15 = vadd.f32 %v2694_v43, %v2693_v27  ;;  %v1987_v59 = vadd.f32 %v2819_v39, %v1922_v35  ;;  %v2006_v62 = vmax.f32 %v1976_v44, 0.0 }
 0x98f   :  { %v1978_v5 = vpop.f32.mrf.mxu0  ;;  %v4235_v6 = vpop.f32.mrf.mxu1 }
 0x990   :  { %v1938_v37 = vadd.f32 %v2695_v15, %v1873_v16  ;;  %v1979_v17 = vadd.f32 %v1978_v5, %v1914_v46  ;;  %v2009_v63 = vmax.f32 %v1987_v59, 0.0 }
 0x991   :  { %v2822_v9 = vpop.f32.mrf.mxu0  ;;  %v2725_v10 = vpop.f32.mrf.mxu1 }
 0x992   :  { %v2000_v60 = vadd.f32 %v2822_v9, %v1935_v22  ;;  %v2007_v20 = vmax.f32 %v1979_v17, 0.0  ;;  %v2726_v15 = vadd.f32 %v2725_v10, %v4235_v6  ;;  %v2572_v22 = vld [vmem:[%s4275_s7] ss:$0 sm:$0xff] }
 0x993   :  { %v1991_v1 = vpop.f32.mrf.mxu0  ;;  %v2727_v32 = vpop.f32.mrf.mxu1 }
 0x994   :  { %v1992_v40 = vadd.f32 %v1991_v1, %v1927_v34  ;;  %v2012_v52 = vmax.f32 %v2000_v60, 0.0  ;;  %v2323_v59 = vadd.f32 %v2726_v15, %v2572_v22 }
 0x995   :  { %v2823_v50 = vpop.f32.mrf.mxu0  ;;  %v2728_v57 = vpop.f32.mrf.mxu1 }
 0x996   :  { %v2010_v8 = vmax.f32 %v1992_v40, 0.0  ;;  %v2003_v56 = vadd.f32 %v2823_v50, %v1938_v37  ;;  %v2016_v24 = vmax.f32 %v2008_v7, %v2012_v52  ;;  %v2729_v61 = vadd.f32 %v2728_v57, %v2727_v32 }
 0x997   :  { %v1994_v55 = vpop.f32.mrf.mxu0  ;;  %v2730_v42 = vpop.f32.mrf.mxu1 }
 0x998   :  { %v2014_v41 = vmax.f32 %v2006_v62, %v2010_v8  ;;  %v2013_v58 = vmax.f32 %v2003_v56, 0.0  ;;  %v1995_v19 = vadd.f32 %v1994_v55, %v1930_v54  ;;  %v2326_v62 = vadd.f32 %v2729_v61, %v2572_v22 }
 0x999   :  { %v2731_v36 = vpop.f32.mrf.mxu1 }
 0x99a   :  { %v2017_v25 = vmax.f32 %v2009_v63, %v2013_v58  ;;  %v2011_v38 = vmax.f32 %v1995_v19, 0.0  ;;  %v2732_v60 = vadd.f32 %v2731_v36, %v2730_v42 }
 0x99b   :  { %v2733_v26 = vpop.f32.mrf.mxu1 }
 0x99c   :  { %v2019_v49 = vmax.f32 %v2016_v24, %v2017_v25  ;;  %v2015_v28 = vmax.f32 %v2007_v20, %v2011_v38  ;;  %v2331_v56 = vadd.f32 %v2732_v60, %v2572_v22 }
 0x99d   :  { %v2734_v23 = vpop.f32.mrf.mxu1 }
 0x99e   :  { %v2018_v46 = vmax.f32 %v2014_v41, %v2015_v28  ;;  %v2735_v45 = vadd.f32 %v2734_v23, %v2733_v26 }
 0x99f   :  { %v2736_v29 = vpop.f32.mrf.mxu1 }
 0x9a0   :  { %v4241_v31 = vmax.f32 %v2018_v46, %v2019_v49  ;;  %v2334_v6 = vadd.f32 %v2735_v45, %v2572_v22 }
 0x9a1   :  { %v2737_v53 = vpop.f32.mrf.mxu1 }
 0x9a2   :  { %v2738_v16 = vadd.f32 %v2737_v53, %v2736_v29 }
 0x9a3   :  { %v2739_v30 = vpop.f32.mrf.mxu1 }
 0x9a4   :  { %v2339_v32 = vadd.f32 %v2738_v16, %v2572_v22 }
 0x9a5   :  { %v2740_v33 = vpop.f32.mrf.mxu1 }
 0x9a6   :  { %v2741_v57 = vadd.f32 %v2740_v33, %v2739_v30 }
 0x9a7   :  { %v2742_v51 = vpop.f32.mrf.mxu1 }
 0x9a8   :  { %v2342_v49 = vadd.f32 %v2741_v57, %v2572_v22 }
 0x9a9   :  { %v2770_v27 = vpop.f32.mrf.mxu0  ;;  %v2743_v3 = vpop.f32.mrf.mxu1 }
 0x9aa   :  { %v2744_v35 = vadd.f32 %v2743_v3, %v2742_v51 }
 0x9ab   :  { %v2771_v18 = vpop.f32.mrf.mxu0  ;;  %v2745_v4 = vpop.f32.mrf.mxu1 }
 0x9ac   :  { %v2772_v34 = vadd.f32 %v2771_v18, %v2770_v27  ;;  %v2347_v52 = vadd.f32 %v2744_v35, %v2572_v22 }
 0x9ad   :  { %v2773_v13 = vpop.f32.mrf.mxu0  ;;  %v2746_v43 = vpop.f32.mrf.mxu1 }
 0x9ae   :  { %v2747_v40 = vadd.f32 %v2746_v43, %v2745_v4  ;;  %v2395_v7 = vadd.f32 %v2772_v34, %v2323_v59 }
 0x9af   :  { %v2774_v39 = vpop.f32.mrf.mxu0  ;;  %v2748_v2 = vpop.f32.mrf.mxu1 }
 0x9b0   :  { %v2775_v10 = vadd.f32 %v2774_v39, %v2773_v13  ;;  %v2350_v58 = vadd.f32 %v2747_v40, %v2572_v22  ;;  %v2432_v29 = vmax.f32 %v2395_v7, 0.0  ;;  %v4353_v39 = vlaneseq  ;;  %v2458_v40 = vld [vmem:[%s4276_s8] sm:$0x3] }
 0x9b1   :  { %v2776_v21 = vpop.f32.mrf.mxu0  ;;  %v2749_v11 = vpop.f32.mrf.mxu1 }
 0x9b2   :  { %v2750_v55 = vadd.f32 %v2749_v11, %v2748_v2  ;;  %v2398_v24 = vadd.f32 %v2775_v10, %v2326_v62  ;;  %v2461_v2 = vshrl.u32 %v4353_v39, 7 }
 0x9b3   :  { %v2777_v12 = vpop.f32.mrf.mxu0  ;;  %v2751_v5 = vpop.f32.mrf.mxu1 }
 0x9b4   :  { %v2778_v50 = vadd.f32 %v2777_v12, %v2776_v21  ;;  %v2355_v53 = vadd.f32 %v2750_v55, %v2572_v22  ;;  %v2433_v4 = vmax.f32 %v2398_v24, 0.0  ;;  %v2466_v16 = vsub.s32 1, %v2461_v2 }
 0x9b5   :  { %v2779_v14 = vpop.f32.mrf.mxu0  ;;  %v2752_v0 = vpop.f32.mrf.mxu1 }
 0x9b6   :  { %v2403_v25 = vadd.f32 %v2778_v50, %v2331_v56  ;;  %v2442_v35 = vsel %vm458_vm4, %v2433_v4, -inf }
 0x9b7   :  { %v2780_v44 = vpop.f32.mrf.mxu0  ;;  %v2788_v9 = vpop.f32.mrf.mxu1 }
 0x9b8   :  { %v2781_v47 = vadd.f32 %v2780_v44, %v2779_v14  ;;  %v2434_v13 = vmax.f32 %v2403_v25, 0.0  ;;  %v2441_v14 = vsel %vm458_vm4, %v2432_v29, -inf }
 0x9b9   :  { %v2782_v48 = vpop.f32.mrf.mxu0  ;;  %v2789_v1 = vpop.f32.mrf.mxu1 }
 0x9ba   :  { %v2790_v37 = vadd.f32 %v2789_v1, %v2788_v9  ;;  %v2406_v42 = vadd.f32 %v2781_v47, %v2334_v6  ;;  %v2443_v60 = vsel %vm458_vm4, %v2434_v13, -inf  ;;  %v2462_v47 = vsub.s32 0, %v2461_v2 }
 0x9bb   :  { %v2783_v54 = vpop.f32.mrf.mxu0  ;;  %v2791_v17 = vpop.f32.mrf.mxu1  ;;  %v2467_v6 = vrot.slane %v2458_v40, %v2466_v16 }
 0x9bc   :  { %v2784_v8 = vadd.f32 %v2783_v54, %v2782_v48  ;;  %v2419_v19 = vadd.f32 %v2790_v37, %v2347_v52  ;;  %v2435_v30 = vmax.f32 %v2406_v42, 0.0  ;;  %v2463_v10 = vrot.slane %v2458_v40, %v2462_v47 }
 0x9bd   :  { %v2785_v63 = vpop.f32.mrf.mxu0  ;;  %v2792_v41 = vpop.f32.mrf.mxu1  ;;  %v2477_v52 = vstv %s4277_s9 }
 0x9be   :  { %v2411_v36 = vadd.f32 %v2784_v8, %v2339_v32  ;;  %v2793_v20 = vadd.f32 %v2792_v41, %v2791_v17  ;;  %v2438_v51 = vmax.f32 %v2419_v19, 0.0  ;;  %v2444_v15 = vsel %vm458_vm4, %v2435_v30, -inf }
 0x9bf   :  { %v2786_v38 = vpop.f32.mrf.mxu0  ;;  %v2794_v26 = vpop.f32.mrf.mxu1  ;;  %v2470_v17 = vmul.f32 %v2463_v10, %v4241_v31 }
 0x9c0   :  { %v2436_v28 = vmax.f32 %v2411_v36, 0.0  ;;  %v2422_v23 = vadd.f32 %v2793_v20, %v2350_v58  ;;  %v2787_v46 = vadd.f32 %v2786_v38, %v2785_v63  ;;  %v2449_v22 = vsel %vm458_vm4, %v2438_v51, -inf }
 0x9c1   :  { %v2795_v33 = vpop.f32.mrf.mxu1  ;;  %v2450_v48 = vmax.f32 %v2443_v60, %v2449_v22 }
 0x9c2   :  { %v2439_v27 = vmax.f32 %v2422_v23, 0.0  ;;  %v2414_v3 = vadd.f32 %v2787_v46, %v2342_v49  ;;  %v2796_v18 = vadd.f32 %v2795_v33, %v2794_v26  ;;  %v2445_v21 = vsel %vm458_vm4, %v2436_v28, -inf }
 0x9c3   :  { %v2797_v43 = vpop.f32.mrf.mxu1  ;;  %v2446_v44 = vmax.f32 %v2441_v14, %v2445_v21 }
 0x9c4   :  { %v2451_v11 = vsel %vm458_vm4, %v2439_v27, -inf  ;;  %v2437_v12 = vmax.f32 %v2414_v3, 0.0  ;;  %v2427_v5 = vadd.f32 %v2796_v18, %v2355_v53 }
 0x9c5   :  { %v2798_v0 = vpop.f32.mrf.mxu1  ;;  %v2452_v9 = vmax.f32 %v2444_v15, %v2451_v11 }
 0x9c6   :  { %v2447_v61 = vsel %vm458_vm4, %v2437_v12, -inf  ;;  %v2440_v45 = vmax.f32 %v2427_v5, 0.0 }
 0x9c7   :  { %v2448_v1 = vmax.f32 %v2442_v35, %v2447_v61  ;;  %v2456_v37 = vmax.f32 %v2450_v48, %v2452_v9 }
 0x9c8   :  { %v2453_v34 = vsel %vm458_vm4, %v2440_v45, -inf }
 0x9c9   :  { %v2454_v59 = vmax.f32 %v2446_v44, %v2453_v34 }
 0x9cb   :  { %v2455_v62 = vmax.f32 %v2454_v59, %v2448_v1 }
 0x9cd   :  { %v2457_v50 = vmax.f32 %v2455_v62, %v2456_v37 }
 0x9cf   :  { %v2471_v54 = vmul.f32 %v2467_v6, %v2457_v50 }
 0x9d1   :  { %v2472_v32 = vsel %vm458_vm4, %v2471_v54, 0.0 }
 0x9d2   :  { %v2473_v57 = vadd.f32 %v2472_v32, %v2470_v17 }
 0x9d4   :  { %2474 = vadd.xlane.f32.xlu1 %v2473_v57 }
 0xa5d   :  { %v2475_v8 = vpop.xlane.xlu1 %2474 }
 0xa5e   :  { %v2478_v56 = vadd.f32 %v2477_v52, %v2475_v8 }
 0xa60   :  { %2480 = vst.msk [vmem:[%s4278_s10] sm:$0xff] %vm2479_vm5, %v2478_v56 }
 0xa61   :  { %2485 = vsyncpa [#allocation6], 1 }
 0xa62   :  { %2486 = vsyncpa [#allocation8], 1 }

</bundles_post_ra>
